<compile_context>
chip_gen: v7x
topology: tpu7x:2x2x1
jax: 0.10.0
libtpu: 0.0.40
codegen_flags: <defaults>
</compile_context>

<pallas_src>
import functools

import jax
import jax.numpy as jnp
from jax.experimental import pallas as pl
from jax.experimental.pallas import tpu as pltpu


# ---------------------------------------------------------------------------
# Fused kernel: encode + clip_projector + projector + cosine classifiers
# ---------------------------------------------------------------------------
def _fused_mynet_kernel(feats_ref, clip_ref, clip_w1t_ref, clip_w2t_ref,
                        proj_w1t_ref, proj_w2t_ref, fc_wt_ref, out_ref,
                        *, temperature, moco_t):
    f32 = jnp.float32
    b = clip_ref.shape[0]
    nc2 = fc_wt_ref.shape[1]          # num_classes * 2

    # ---- encode(): adaptive_avg_pool2d(., 1).squeeze() for all 3 streams ----
    # feats: (3B, H*W, C), channels on lanes -> pooled: (3B, C)
    pooled = jnp.mean(feats_ref[...], axis=1)
    x = pooled[:b]                    # encode(im_cla)
    qk = pooled[b:]                   # [encode(im_q); encode(im_k)]

    # ---- clip_projector: Linear(768,768,nb) -> ReLU -> Linear(768,F,nb) ----
    h = jnp.dot(clip_ref[...], clip_w1t_ref[...], preferred_element_type=f32)
    h = jnp.maximum(h, 0.0)
    x_c_feat = jnp.dot(h, clip_w2t_ref[...], preferred_element_type=f32)   # (B, F)

    # ---- projector (shared weights) on stacked q/k ----
    hq = jnp.dot(qk, proj_w1t_ref[...], preferred_element_type=f32)
    hq = jnp.maximum(hq, 0.0)
    qk_proj = jnp.dot(hq, proj_w2t_ref[...], preferred_element_type=f32)   # (2B, moco_dim)
    q = qk_proj[:b]
    k = qk_proj[b:]

    # ---- L2 normalize: x * rsqrt(max(sum(x^2), 1e-24))  (== F.normalize) ----
    def l2n_rows(v, scale=1.0):
        ss = jnp.sum(v * v, axis=-1, keepdims=True)
        return v * (scale * jax.lax.rsqrt(jnp.maximum(ss, 1e-24)))

    xn_t = l2n_rows(x, temperature)       # temperature folded into (B,1) norm
    qn_t = l2n_rows(q, 1.0 / moco_t)      # 1/moco_t folded into (B,1) norm
    kn = l2n_rows(k)
    xcn = l2n_rows(x_c_feat)
    # fc weight is pre-transposed (F, 2*num_classes): normalize its columns.
    fc_w = fc_wt_ref[...]
    fc_ss = jnp.sum(fc_w * fc_w, axis=0, keepdims=True)
    fcn = fc_w * jax.lax.rsqrt(jnp.maximum(fc_ss, 1e-24))

    # ---- cosine logits (contract last dims of both operands; no .T) ----
    dn = (((1,), (1,)), ((), ()))
    logits = jnp.dot(xn_t, fcn, preferred_element_type=f32)                 # (B, 2*NC)
    x_c = jax.lax.dot_general(xn_t, xcn, dn, preferred_element_type=f32)    # (B, B)
    x1 = jax.lax.dot_general(qn_t, kn, dn, preferred_element_type=f32)      # (B, B)

    # ---- pack into one lane-dense (B, >=128) output slab ----
    out_ref[...] = jnp.zeros_like(out_ref)
    out_ref[:, 0:nc2] = logits.astype(out_ref.dtype)
    out_ref[:, nc2:nc2 + b] = x1.astype(out_ref.dtype)
    out_ref[:, nc2 + b:nc2 + 2 * b] = x_c.astype(out_ref.dtype)


# ---------------------------------------------------------------------------
# Parameters (PyTorch Linear-style init; stored pre-transposed to (in, out))
# ---------------------------------------------------------------------------
def init_params(key, num_features, num_classes, moco_dim, clip_dim=768):
    ks = jax.random.split(key, 5)

    def lin_t(k, out_d, in_d):
        bound = 1.0 / jnp.sqrt(jnp.float32(in_d))
        w = jax.random.uniform(k, (out_d, in_d), jnp.float32, -bound, bound)
        return w.T   # (in, out): lane-dense MXU RHS, no in-kernel transpose

    return {
        "fc_wt": lin_t(ks[0], num_classes * 2, num_features),    # self.fc
        "proj_w1t": lin_t(ks[1], num_features, num_features),    # projector[0]
        "proj_w2t": lin_t(ks[2], moco_dim, num_features),        # projector[2]
        "clip_w1t": lin_t(ks[3], clip_dim, clip_dim),             # clip_projector[0]
        "clip_w2t": lin_t(ks[4], num_features, clip_dim),         # clip_projector[2]
    }


# ---------------------------------------------------------------------------
# MYNET.forward(im_cla, im_q, im_k) with 'cos' in mode and im_q != None.
# Returns (logits_classify, x1, x_c), exactly as the PyTorch module does.
# ---------------------------------------------------------------------------
def mynet_forward(params, feat_cla, feat_q, feat_k, clip_feat, *,
                  temperature, moco_t):
    b, c, h, w = feat_cla.shape
    hw = h * w

    # Host-side layout plumbing: NCHW -> (B, H*W, C), stack the 3 streams so
    # the in-kernel avg-pool reduces over sublanes and runs exactly once.
    def to_bhwc(f):
        return f.reshape(b, c, hw).transpose(0, 2, 1)

    feats = jnp.concatenate(
        [to_bhwc(feat_cla), to_bhwc(feat_q), to_bhwc(feat_k)], axis=0)

    nc2 = params["fc_wt"].shape[1]
    packed = nc2 + 2 * b
    out_w = max(128, ((packed + 127) // 128) * 128)   # lane-dense output width

    kernel = functools.partial(
        _fused_mynet_kernel,
        temperature=float(temperature),
        moco_t=float(moco_t),
    )
    slab = pl.pallas_call(
        kernel,
        out_shape=jax.ShapeDtypeStruct((b, out_w), clip_feat.dtype),
        in_specs=[pl.BlockSpec(memory_space=pltpu.MemorySpace.VMEM)
                  for _ in range(7)],
        out_specs=pl.BlockSpec(memory_space=pltpu.MemorySpace.VMEM),
    )(feats, clip_feat,
      params["clip_w1t"], params["clip_w2t"],
      params["proj_w1t"], params["proj_w2t"],
      params["fc_wt"])

    logits_classify = slab[:, 0:nc2]
    x1 = slab[:, nc2:nc2 + b]
    x_c = slab[:, nc2 + b:nc2 + 2 * b]
    return logits_classify, x1, x_c


if __name__ == "__main__":
    # Small shapes consistent with the cifar100 branch (resnet20 -> 64 features).
    B, C, H, W = 2, 64, 8, 8
    num_classes, moco_dim, clip_dim = 10, 32, 768
    temperature, moco_t = 16.0, 0.07

    key = jax.random.PRNGKey(0)
    k1, k2, k3, k4, kp = jax.random.split(key, 5)
    feat_cla = jax.random.normal(k1, (B, C, H, W), jnp.float32)    # encoder(im_cla)
    feat_q = jax.random.normal(k2, (B, C, H, W), jnp.float32)      # encoder(im_q)
    feat_k = jax.random.normal(k3, (B, C, H, W), jnp.float32)      # encoder(im_k)
    clip_feat = jax.random.normal(k4, (B, clip_dim), jnp.float32)  # CLIP.encode_image(...)

    params = init_params(kp, C, num_classes, moco_dim, clip_dim)

    logits_classify, x1, x_c = mynet_forward(
        params, feat_cla, feat_q, feat_k, clip_feat,
        temperature=temperature, moco_t=moco_t)

    jax.block_until_ready((logits_classify, x1, x_c))
    assert logits_classify.shape == (B, num_classes * 2)
    assert x1.shape == (B, B)
    assert x_c.shape == (B, B)
    print("KERNEL_OK")
</pallas_src>

<mosaic_0001>
module attributes {stable_mosaic.version = 11 : i64} {
  func.func @_fused_mynet_kernel(%arg0: memref<6x64x64xf32, #tpu.memory_space<vmem>>, %arg1: memref<2x768xf32, #tpu.memory_space<vmem>>, %arg2: memref<768x768xf32, #tpu.memory_space<vmem>>, %arg3: memref<768x64xf32, #tpu.memory_space<vmem>>, %arg4: memref<64x64xf32, #tpu.memory_space<vmem>>, %arg5: memref<64x32xf32, #tpu.memory_space<vmem>>, %arg6: memref<64x20xf32, #tpu.memory_space<vmem>>, %arg7: memref<2x128xf32, #tpu.memory_space<vmem>>) attributes {dimension_semantics = [], scalar_prefetch = 0 : i64, scratch_operands = 0 : i64, tpu.core_type = #tpu.core_type<tc>} {
    %c0 = arith.constant 0 : index
    %c0_0 = arith.constant 0 : index
    %c0_1 = arith.constant 0 : index
    %0 = vector.load %arg0[%c0, %c0_0, %c0_1] : memref<6x64x64xf32, #tpu.memory_space<vmem>>, vector<6x64x64xf32>
    %cst = arith.constant dense<0.000000e+00> : vector<6x64xf32>
    %1 = vector.multi_reduction <add>, %0, %cst [1] : vector<6x64x64xf32> to vector<6x64xf32>
    %cst_2 = arith.constant 6.400000e+01 : f32
    %2 = vector.broadcast %cst_2 : f32 to vector<6x64xf32>
    %3 = arith.divf %1, %2 : vector<6x64xf32>
    %4 = vector.extract_strided_slice %3 {offsets = [0, 0], sizes = [2, 64], strides = [1, 1]} : vector<6x64xf32> to vector<2x64xf32>
    %5 = vector.extract_strided_slice %3 {offsets = [2, 0], sizes = [4, 64], strides = [1, 1]} : vector<6x64xf32> to vector<4x64xf32>
    %c0_3 = arith.constant 0 : index
    %c0_4 = arith.constant 0 : index
    %6 = vector.load %arg1[%c0_3, %c0_4] : memref<2x768xf32, #tpu.memory_space<vmem>>, vector<2x768xf32>
    %c0_5 = arith.constant 0 : index
    %c0_6 = arith.constant 0 : index
    %7 = vector.load %arg2[%c0_5, %c0_6] : memref<768x768xf32, #tpu.memory_space<vmem>>, vector<768x768xf32>
    %cst_7 = arith.constant dense<0.000000e+00> : vector<2x768xf32>
    %8 = tpu.matmul %6, %7, %cst_7 {dimension_numbers = #tpu.dot_dimension_numbers<[1], [0], [0], [1], [0, 0, 1, 1], [], []>} : vector<2x768xf32>, vector<768x768xf32>, vector<2x768xf32> -> vector<2x768xf32>
    %cst_8 = arith.constant 0.000000e+00 : f32
    %9 = vector.broadcast %cst_8 : f32 to vector<2x768xf32>
    %10 = arith.maximumf %8, %9 : vector<2x768xf32>
    %c0_9 = arith.constant 0 : index
    %c0_10 = arith.constant 0 : index
    %11 = vector.load %arg3[%c0_9, %c0_10] : memref<768x64xf32, #tpu.memory_space<vmem>>, vector<768x64xf32>
    %cst_11 = arith.constant dense<0.000000e+00> : vector<2x64xf32>
    %12 = tpu.matmul %10, %11, %cst_11 {dimension_numbers = #tpu.dot_dimension_numbers<[1], [0], [0], [1], [0, 0, 1, 1], [], []>} : vector<2x768xf32>, vector<768x64xf32>, vector<2x64xf32> -> vector<2x64xf32>
    %c0_12 = arith.constant 0 : index
    %c0_13 = arith.constant 0 : index
    %13 = vector.load %arg4[%c0_12, %c0_13] : memref<64x64xf32, #tpu.memory_space<vmem>>, vector<64x64xf32>
    %cst_14 = arith.constant dense<0.000000e+00> : vector<4x64xf32>
    %14 = tpu.matmul %5, %13, %cst_14 {dimension_numbers = #tpu.dot_dimension_numbers<[1], [0], [0], [1], [0, 0, 1, 1], [], []>} : vector<4x64xf32>, vector<64x64xf32>, vector<4x64xf32> -> vector<4x64xf32>
    %cst_15 = arith.constant 0.000000e+00 : f32
    %15 = vector.broadcast %cst_15 : f32 to vector<4x64xf32>
    %16 = arith.maximumf %14, %15 : vector<4x64xf32>
    %c0_16 = arith.constant 0 : index
    %c0_17 = arith.constant 0 : index
    %17 = vector.load %arg5[%c0_16, %c0_17] : memref<64x32xf32, #tpu.memory_space<vmem>>, vector<64x32xf32>
    %cst_18 = arith.constant dense<0.000000e+00> : vector<4x32xf32>
    %18 = tpu.matmul %16, %17, %cst_18 {dimension_numbers = #tpu.dot_dimension_numbers<[1], [0], [0], [1], [0, 0, 1, 1], [], []>} : vector<4x64xf32>, vector<64x32xf32>, vector<4x32xf32> -> vector<4x32xf32>
    %19 = vector.extract_strided_slice %18 {offsets = [0, 0], sizes = [2, 32], strides = [1, 1]} : vector<4x32xf32> to vector<2x32xf32>
    %20 = vector.extract_strided_slice %18 {offsets = [2, 0], sizes = [2, 32], strides = [1, 1]} : vector<4x32xf32> to vector<2x32xf32>
    %21 = arith.mulf %4, %4 : vector<2x64xf32>
    %cst_19 = arith.constant dense<0.000000e+00> : vector<2xf32>
    %22 = vector.multi_reduction <add>, %21, %cst_19 [1] : vector<2x64xf32> to vector<2xf32>
    %23 = vector.shape_cast %22 : vector<2xf32> to vector<2x1xf32>
    %cst_20 = arith.constant 1.000000e-24 : f32
    %24 = vector.broadcast %cst_20 : f32 to vector<2x1xf32>
    %25 = arith.maximumf %23, %24 : vector<2x1xf32>
    %26 = math.rsqrt %25 : vector<2x1xf32>
    %cst_21 = arith.constant 1.600000e+01 : f32
    %27 = vector.broadcast %cst_21 : f32 to vector<2x1xf32>
    %28 = arith.mulf %27, %26 : vector<2x1xf32>
    %29 = vector.broadcast %28 : vector<2x1xf32> to vector<2x64xf32>
    %30 = arith.mulf %4, %29 : vector<2x64xf32>
    %31 = arith.mulf %19, %19 : vector<2x32xf32>
    %cst_22 = arith.constant dense<0.000000e+00> : vector<2xf32>
    %32 = vector.multi_reduction <add>, %31, %cst_22 [1] : vector<2x32xf32> to vector<2xf32>
    %33 = vector.shape_cast %32 : vector<2xf32> to vector<2x1xf32>
    %cst_23 = arith.constant 1.000000e-24 : f32
    %34 = vector.broadcast %cst_23 : f32 to vector<2x1xf32>
    %35 = arith.maximumf %33, %34 : vector<2x1xf32>
    %36 = math.rsqrt %35 : vector<2x1xf32>
    %cst_24 = arith.constant 14.2857141 : f32
    %37 = vector.broadcast %cst_24 : f32 to vector<2x1xf32>
    %38 = arith.mulf %37, %36 : vector<2x1xf32>
    %39 = vector.broadcast %38 : vector<2x1xf32> to vector<2x32xf32>
    %40 = arith.mulf %19, %39 : vector<2x32xf32>
    %41 = arith.mulf %20, %20 : vector<2x32xf32>
    %cst_25 = arith.constant dense<0.000000e+00> : vector<2xf32>
    %42 = vector.multi_reduction <add>, %41, %cst_25 [1] : vector<2x32xf32> to vector<2xf32>
    %43 = vector.shape_cast %42 : vector<2xf32> to vector<2x1xf32>
    %cst_26 = arith.constant 1.000000e-24 : f32
    %44 = vector.broadcast %cst_26 : f32 to vector<2x1xf32>
    %45 = arith.maximumf %43, %44 : vector<2x1xf32>
    %46 = math.rsqrt %45 : vector<2x1xf32>
    %cst_27 = arith.constant 1.000000e+00 : f32
    %47 = vector.broadcast %cst_27 : f32 to vector<2x1xf32>
    %48 = arith.mulf %47, %46 : vector<2x1xf32>
    %49 = vector.broadcast %48 : vector<2x1xf32> to vector<2x32xf32>
    %50 = arith.mulf %20, %49 : vector<2x32xf32>
    %51 = arith.mulf %12, %12 : vector<2x64xf32>
    %cst_28 = arith.constant dense<0.000000e+00> : vector<2xf32>
    %52 = vector.multi_reduction <add>, %51, %cst_28 [1] : vector<2x64xf32> to vector<2xf32>
    %53 = vector.shape_cast %52 : vector<2xf32> to vector<2x1xf32>
    %cst_29 = arith.constant 1.000000e-24 : f32
    %54 = vector.broadcast %cst_29 : f32 to vector<2x1xf32>
    %55 = arith.maximumf %53, %54 : vector<2x1xf32>
    %56 = math.rsqrt %55 : vector<2x1xf32>
    %cst_30 = arith.constant 1.000000e+00 : f32
    %57 = vector.broadcast %cst_30 : f32 to vector<2x1xf32>
    %58 = arith.mulf %57, %56 : vector<2x1xf32>
    %59 = vector.broadcast %58 : vector<2x1xf32> to vector<2x64xf32>
    %60 = arith.mulf %12, %59 : vector<2x64xf32>
    %c0_31 = arith.constant 0 : index
    %c0_32 = arith.constant 0 : index
    %61 = vector.load %arg6[%c0_31, %c0_32] : memref<64x20xf32, #tpu.memory_space<vmem>>, vector<64x20xf32>
    %62 = arith.mulf %61, %61 : vector<64x20xf32>
    %cst_33 = arith.constant dense<0.000000e+00> : vector<20xf32>
    %63 = vector.multi_reduction <add>, %62, %cst_33 [0] : vector<64x20xf32> to vector<20xf32>
    %64 = vector.shape_cast %63 : vector<20xf32> to vector<1x20xf32>
    %cst_34 = arith.constant 1.000000e-24 : f32
    %65 = vector.broadcast %cst_34 : f32 to vector<1x20xf32>
    %66 = arith.maximumf %64, %65 : vector<1x20xf32>
    %67 = math.rsqrt %66 : vector<1x20xf32>
    %68 = vector.broadcast %67 : vector<1x20xf32> to vector<64x20xf32>
    %69 = arith.mulf %61, %68 : vector<64x20xf32>
    %cst_35 = arith.constant dense<0.000000e+00> : vector<2x20xf32>
    %70 = tpu.matmul %30, %69, %cst_35 {dimension_numbers = #tpu.dot_dimension_numbers<[1], [0], [0], [1], [0, 0, 1, 1], [], []>} : vector<2x64xf32>, vector<64x20xf32>, vector<2x20xf32> -> vector<2x20xf32>
    %cst_36 = arith.constant dense<0.000000e+00> : vector<2x2xf32>
    %71 = tpu.matmul %30, %60, %cst_36 {dimension_numbers = #tpu.dot_dimension_numbers<[1], [1], [0], [0], [0, 0, 1, 0], [], []>} : vector<2x64xf32>, vector<2x64xf32>, vector<2x2xf32> -> vector<2x2xf32>
    %cst_37 = arith.constant dense<0.000000e+00> : vector<2x2xf32>
    %72 = tpu.matmul %40, %50, %cst_37 {dimension_numbers = #tpu.dot_dimension_numbers<[1], [1], [0], [0], [0, 0, 1, 0], [], []>} : vector<2x32xf32>, vector<2x32xf32>, vector<2x2xf32> -> vector<2x2xf32>
    %cst_38 = arith.constant 0.000000e+00 : f32
    %73 = vector.broadcast %cst_38 : f32 to vector<2x128xf32>
    %c0_39 = arith.constant 0 : index
    %c0_40 = arith.constant 0 : index
    %74 = vector.load %arg7[%c0_39, %c0_40] : memref<2x128xf32, #tpu.memory_space<vmem>>, vector<2x128xf32>
    tpu.vector_store %arg7[%c0_39, %c0_40], %73 {strides = array<i32>} : memref<2x128xf32, #tpu.memory_space<vmem>>, vector<2x128xf32>,
    %c0_41 = arith.constant 0 : index
    %c0_42 = arith.constant 0 : index
    %75 = vector.load %arg7[%c0_41, %c0_42] : memref<2x128xf32, #tpu.memory_space<vmem>>, vector<2x20xf32>
    tpu.vector_store %arg7[%c0_41, %c0_42], %70 {strides = array<i32>} : memref<2x128xf32, #tpu.memory_space<vmem>>, vector<2x20xf32>,
    %c0_43 = arith.constant 0 : index
    %c20 = arith.constant 20 : index
    %76 = vector.load %arg7[%c0_43, %c20] : memref<2x128xf32, #tpu.memory_space<vmem>>, vector<2x2xf32>
    tpu.vector_store %arg7[%c0_43, %c20], %72 {strides = array<i32>} : memref<2x128xf32, #tpu.memory_space<vmem>>, vector<2x2xf32>,
    %c0_44 = arith.constant 0 : index
    %c22 = arith.constant 22 : index
    %77 = vector.load %arg7[%c0_44, %c22] : memref<2x128xf32, #tpu.memory_space<vmem>>, vector<2x2xf32>
    tpu.vector_store %arg7[%c0_44, %c22], %71 {strides = array<i32>} : memref<2x128xf32, #tpu.memory_space<vmem>>, vector<2x2xf32>,
    return
  }
}

</mosaic_0001>

<bundles_post_ra>
// kernel: tpu_custom_call.1
= control target key start
LH: loop header
LB: loop body
LE: loop exit
PB: predicated region body
PF: predicated region fallthrough
CT: control target
= control target key end

     0   :  { %12 = vsyncpa [#allocation3], 0  ;;  %s4033_s0 = inlined_call_operand.hbm [shape: f32[6,64,64], index: 0, kind: input, shape index: {}]   ;;  %s4034_s1 = inlined_call_operand.hbm [shape: f32[2,768], index: 1, kind: input, shape index: {}]   ;;  %s4035_s2 = inlined_call_operand.hbm [shape: f32[768,768], index: 2, kind: input, shape index: {}]   ;;  %s4036_s3 = inlined_call_operand.vmem [shape: f32[768,64], index: 3, kind: input, shape index: {}]   ;;  %s4037_s4 = inlined_call_operand.hbm [shape: f32[64,64], index: 4, kind: input, shape index: {}]   ;;  %s4038_s5 = inlined_call_operand.vmem [shape: f32[64,32], index: 5, kind: input, shape index: {}]   ;;  %s4039_s6 = inlined_call_operand.vmem [shape: f32[64,20], index: 6, kind: input, shape index: {}]   ;;  %s4040_s7 = inlined_call_operand.hbm [shape: f32[2,128], index: 7, kind: output, shape index: {}]  }
   0x1   :  { %13 = vsyncpa [#allocation6], 0 }
   0x2   :  { %14 = vsyncpa [#allocation9], 0 }
   0x3   :  { %15 = vsyncpa [#allocation4], 0  ;;  %s3421_s24 = smov [#allocation5]   ;;  %s3422_s26 = smov [#allocation2]  }
   0x4   :  { %s34_s25 = sshll.u32 %s3421_s24, 4  ;;  %s21_s27 = sshll.u32 %s3422_s26, 4  ;;  %s35_s25 = int_to_ptr.vmem [resolvable:$true] %s34_s25  ;;  %s3476_s27 = int_to_ptr.vmem [resolvable:$true] %s21_s27 }
   0x5   :  { %s3303_s30 = scalar_lea.hbm %s4034_s1, 192 }
   0x6   :  { %p3304_p0 = scmp.ne.s32.totalorder %s4034_s1, %s3303_s30  ;;  %p3307_p1 = scmp.lt.u32.totalorder %s3303_s30, %s4034_s1 }
   0x8   :  { %p3309_p2 = pnand %p3307_p1, %p3304_p0 }
   0xa   :  { %3312 = shalt.err (!%p3309_p2)
}
   0xb   :  { %s3313_s12 = scalar_lea.vmem %s35_s25, 192  ;;  %p3318_p4 = scmp.lt.s32.totalorder %s35_s25, %s35_s25 }
   0xc   :  { %p3314_p3 = scmp.ne.s32.totalorder %s35_s25, %s3313_s12  ;;  %p3319_p5 = scmp.lt.s32.totalorder %s3313_s12, %s3313_s12 }
   0xe   :  { %p3320_p6 = por %p3319_p5, %p3318_p4 }
  0x10   :  { %p3321_p7 = pnand %p3320_p6, %p3314_p3 }
  0x12   :  { %3324 = shalt.err (!%p3321_p7)
}
  0x13   :  { %37 = dma.hbm_to_vmem [thread:$0]  %s4034_s1, 192, %s35_s25, [#allocation6]  }
  0x14   :  { %s3325_s17 = scalar_lea.hbm %s4033_s0, 6144 }
  0x15   :  { %p3326_p8 = scmp.ne.s32.totalorder %s4033_s0, %s3325_s17  ;;  %p3329_p9 = scmp.lt.u32.totalorder %s3325_s17, %s4033_s0 }
  0x17   :  { %p3331_p10 = pnand %p3329_p9, %p3326_p8 }
  0x19   :  { %3334 = shalt.err (!%p3331_p10)
}
  0x1a   :  { %s3335_s22 = scalar_lea.vmem %s3476_s27, 6144  ;;  %p3340_p12 = scmp.lt.s32.totalorder %s3476_s27, %s3476_s27 }
  0x1b   :  { %p3336_p11 = scmp.ne.s32.totalorder %s3476_s27, %s3335_s22  ;;  %p3341_p13 = scmp.lt.s32.totalorder %s3335_s22, %s3335_s22 }
  0x1d   :  { %p3342_p0 = por %p3341_p13, %p3340_p12 }
  0x1f   :  { %p3343_p1 = pnand %p3342_p0, %p3336_p11 }
  0x21   :  { %3346 = shalt.err (!%p3343_p1)
}
  0x22   :  { %s3423_s1 = smov 128   ;;  %s3424_s23 = smov 8  }
  0x23   :  { %27 = dma.hbm_to_vmem [thread:$0]  %s4033_s0, 6144, %s3476_s27, [#allocation3], %s3423_s1, %s3423_s1, %s3424_s23  }
  0x24   :  { %s3425_s26 = smov [#allocation7]   ;;  %s3347_s8 = scalar_lea.hbm %s4035_s2, 73728 }
  0x25   :  { %s43_s28 = sshll.u32 %s3425_s26, 4  ;;  %p3348_p2 = scmp.ne.s32.totalorder %s4035_s2, %s3347_s8  ;;  %s44_s28 = int_to_ptr.vmem [resolvable:$true] %s43_s28 }
  0x26   :  { %p3351_p3 = scmp.lt.u32.totalorder %s3347_s8, %s4035_s2 }
  0x28   :  { %p3353_p4 = pnand %p3351_p3, %p3348_p2 }
  0x2a   :  { %3356 = shalt.err (!%p3353_p4)
}
  0x2b   :  { %s3357_s13 = scalar_lea.vmem %s44_s28, 73728  ;;  %p3362_p6 = scmp.lt.s32.totalorder %s44_s28, %s44_s28 }
  0x2c   :  { %p3358_p5 = scmp.ne.s32.totalorder %s44_s28, %s3357_s13  ;;  %p3363_p7 = scmp.lt.s32.totalorder %s3357_s13, %s3357_s13 }
  0x2e   :  { %p3364_p8 = por %p3363_p7, %p3362_p6 }
  0x30   :  { %p3365_p9 = pnand %p3364_p8, %p3358_p5 }
  0x32   :  { %3368 = shalt.err (!%p3365_p9)
}
  0x33   :  { %s3426_s0 = smov 768   ;;  %s3427_s27 = smov 48  }
  0x34   :  { %49 = dma.hbm_to_vmem [thread:$0]  %s4035_s2, 73728, %s44_s28, [#allocation6], %s3426_s0, %s3426_s0, %s3427_s27  }
  0x35   :  { %s3428_s16 = smov [#allocation8]   ;;  %s3369_s20 = scalar_lea.hbm %s4037_s4, 1024 }
  0x36   :  { %s57_s17 = sshll.u32 %s3428_s16, 4  ;;  %p3370_p10 = scmp.ne.s32.totalorder %s4037_s4, %s3369_s20  ;;  %s58_s17 = int_to_ptr.vmem [resolvable:$true] %s57_s17 }
  0x37   :  { %p3373_p11 = scmp.lt.u32.totalorder %s3369_s20, %s4037_s4 }
  0x39   :  { %p3375_p12 = pnand %p3373_p11, %p3370_p10 }
  0x3b   :  { %3378 = shalt.err (!%p3375_p12)
}
  0x3c   :  { %s3379_s26 = scalar_lea.vmem %s58_s17, 1024  ;;  %p3384_p0 = scmp.lt.s32.totalorder %s58_s17, %s58_s17 }
  0x3d   :  { %p3380_p13 = scmp.ne.s32.totalorder %s58_s17, %s3379_s26  ;;  %p3385_p1 = scmp.lt.s32.totalorder %s3379_s26, %s3379_s26 }
  0x3f   :  { %p3386_p2 = por %p3385_p1, %p3384_p0 }
  0x41   :  { %p3387_p3 = pnand %p3386_p2, %p3380_p13 }
  0x43   :  { %3390 = shalt.err (!%p3387_p3)
}
  0x44   :  { %63 = dma.hbm_to_vmem [thread:$0]  %s4037_s4, 1024, %s58_s17, [#allocation9], %s3423_s1, %s3423_s1, %s3424_s23  }
  0x45   :  { %3413 = dma.done.wait [#allocation3], 6144  }
  0x46   :  { %3414 = vsyncadd [#allocation3], 4294961152 }
  0x47   :  { %3415 = dma.done.wait [#allocation6], 73920  }
  0x48   :  { %3416 = vsyncadd [#allocation6], 4294893376 }
  0x49   :  { %3417 = dma.done.wait [#allocation9], 1024  }
  0x4a   :  { %3418 = vsyncadd [#allocation9], 4294966272  ;;  %v265_v0 = vld [vmem:[#allocation7 + $0x8] sm:$0xff]  ;;  %v271_v1 = vld [vmem:[#allocation7 + $0x38] sm:$0xff]  ;;  %vm128_vm0 = vcmask 523264   ;;  %vm3432_vm1 = vmmov 0  }
  0x4b   :  { %v264_v2 = vld [vmem:[#allocation7] sm:$0xff]  ;;  %v2556_v3 = vpack.c.bf16 %v271_v1, %v265_v0  ;;  %v270_v4 = vld [vmem:[#allocation7 + $0x30] sm:$0xff]  ;;  %v277_v5 = vld [vmem:[#allocation7 + $0x68] sm:$0xff]  ;;  %vm1836_vm2 = vcmask 1041409   ;;  %vm1838_vm3 = vcmask 1042434   ;;  %vm1840_vm4 = vcmask 1043459  }
  0x4c   :  { %v283_v6 = vld [vmem:[#allocation7 + $0x98] sm:$0xff]  ;;  %v2558_v7 = vpack.c.bf16 %v270_v4, %v264_v2  ;;  %v276_v9 = vld [vmem:[#allocation7 + $0x60] sm:$0xff]  ;;  %v282_v10 = vld [vmem:[#allocation7 + $0x90] sm:$0xff]  ;;  %v3429_v2 = vmov 1983009808   ;;  %v846_v4 = vlaneseq  ;;  %vm2002_vm5 = vcmask 517120  }
  0x4d   :  { %v2560_v8 = vpack.c.bf16 %v283_v6, %v277_v5  ;;  %v289_v11 = vld [vmem:[#allocation7 + $0xc8] sm:$0xff]  ;;  %2557 = vmatprep.subr.bf16.mxu0 %v2556_v3  ;;  %v295_v12 = vld [vmem:[#allocation7 + $0xf8] sm:$0xff]  ;;  %v2562_v13 = vpack.c.bf16 %v282_v10, %v276_v9  ;;  %v288_v15 = vld [vmem:[#allocation7 + $0xc0] sm:$0xff]  ;;  %v844_v3 = vunpack.c.l.s4 %v3429_v2  ;;  %vm2054_vm6 = vcmask 162816   ;;  %s3434_s8 = smov 20   ;;  %s3435_s9 = smov [#allocation10]  }
  0x4e   :  { %2559 = vmatpush1.bf16.msra.mxu0 %v2558_v7  ;;  %v2564_v14 = vpack.c.bf16 %v295_v12, %v289_v11  ;;  %v294_v16 = vld [vmem:[#allocation7 + $0xf0] sm:$0xff]  ;;  %v301_v17 = vld [vmem:[#allocation7 + $0x128] sm:$0xff]  ;;  %v307_v18 = vld [vmem:[#allocation7 + $0x158] sm:$0xff]  ;;  %vm2024_vm7 = vcmask 257026   ;;  %vm2016_vm8 = vcmask 254976   ;;  %vm2314_vm9 = vcmask 156672  }
  0x4f   :  { %2561 = vmatprep.subr.bf16.mxu0 %v2560_v8  ;;  %v2566_v19 = vpack.c.bf16 %v294_v16, %v288_v15  ;;  %v2568_v20 = vpack.c.bf16 %v307_v18, %v301_v17  ;;  %v300_v21 = vld [vmem:[#allocation7 + $0x120] sm:$0xff]  ;;  %v306_v22 = vld [vmem:[#allocation7 + $0x150] sm:$0xff]  ;;  %v313_v23 = vld [vmem:[#allocation7 + $0x188] sm:$0xff]  ;;  %v845_v17 = vunpack.c.0.s8 %v844_v3  ;;  %v847_v18 = vshrl.u32 %v846_v4, 7  ;;  %s2334_s10 = sshll.u32 %s3435_s9, 4  ;;  %s2335_s10 = int_to_ptr.vmem [resolvable:$true] %s2334_s10 }
  0x50   :  { %v319_v24 = vld [vmem:[#allocation7 + $0x1b8] sm:$0xff]  ;;  %v273_v26 = vld [vmem:[#allocation7 + $0x48] sm:$0xff]  ;;  %v2570_v27 = vpack.c.bf16 %v306_v22, %v300_v21  ;;  %v312_v28 = vld [vmem:[#allocation7 + $0x180] sm:$0xff]  ;;  %vm2237_vm10 = vcmask 261120   ;;  %vm2320_vm11 = vcmask 173216   ;;  %vm2326_vm12 = vcmask 189616   ;;  %p3396_p5 = scmp.lt.s32.totalorder %s2335_s10, %s2335_s10 }
  0x51   :  { %v267_v25 = vld [vmem:[#allocation7 + $0x18] sm:$0xff]  ;;  %v266_v30 = vld [vmem:[#allocation7 + $0x10] sm:$0xff]  ;;  %v272_v31 = vld [vmem:[#allocation7 + $0x40] sm:$0xff]  ;;  %v2572_v32 = vpack.c.bf16 %v319_v24, %v313_v23  ;;  %s3391_s11 = scalar_lea.vmem %s2335_s10, 32 }
  0x52   :  { %2563 = vmatpush1.bf16.msra.mxu0 %v2562_v13  ;;  %v2748_v29 = vpack.c.bf16 %v273_v26, %v267_v25  ;;  %v318_v33 = vld [vmem:[#allocation7 + $0x1b0] sm:$0xff]  ;;  %v2750_v34 = vpack.c.bf16 %v272_v31, %v266_v30  ;;  %v279_v35 = vld [vmem:[#allocation7 + $0x78] sm:$0xff]  ;;  %v285_v36 = vld [vmem:[#allocation7 + $0xa8] sm:$0xff]  ;;  %v3537_v31 = vsub.s32 %v845_v17, %v847_v18  ;;  %p3392_p4 = scmp.ne.s32.totalorder %s2335_s10, %s3391_s11  ;;  %p3397_p6 = scmp.lt.s32.totalorder %s3391_s11, %s3391_s11 }
  0x53   :  { %2565 = vmatprep.subr.bf16.mxu0 %v2564_v14  ;;  %v325_v37 = vld [vmem:[#allocation7 + $0x1e8] sm:$0xff]  ;;  %v331_v38 = vld [vmem:[#allocation7 + $0x218] sm:$0xff]  ;;  %v2752_v39 = vpack.c.bf16 %v285_v36, %v279_v35  ;;  %v278_v40 = vld [vmem:[#allocation7 + $0x70] sm:$0xff]  ;;  %v2574_v42 = vpack.c.bf16 %v318_v33, %v312_v28 }
  0x54   :  { %2749 = vmatprep.subr.bf16.mxu1 %v2748_v29  ;;  %v284_v41 = vld [vmem:[#allocation7 + $0xa0] sm:$0xff]  ;;  %v291_v45 = vld [vmem:[#allocation7 + $0xd8] sm:$0xff]  ;;  %v297_v46 = vld [vmem:[#allocation7 + $0x108] sm:$0xff]  ;;  %v2576_v47 = vpack.c.bf16 %v331_v38, %v325_v37  ;;  %p3398_p7 = por %p3397_p6, %p3396_p5 }
  0x55   :  { %2751 = vmatpush1.bf16.msra.mxu1 %v2750_v34  ;;  %v324_v43 = vld [vmem:[#allocation7 + $0x1e0] sm:$0xff]  ;;  %v2754_v44 = vpack.c.bf16 %v284_v41, %v278_v40  ;;  %v330_v48 = vld [vmem:[#allocation7 + $0x210] sm:$0xff]  ;;  %v2756_v49 = vpack.c.bf16 %v297_v46, %v291_v45  ;;  %v337_v52 = vld [vmem:[#allocation7 + $0x248] sm:$0xff] }
  0x56   :  { %2567 = vmatpush1.bf16.msra.mxu0 %v2566_v19  ;;  %2753 = vmatprep.subr.bf16.mxu1 %v2752_v39  ;;  %v290_v50 = vld [vmem:[#allocation7 + $0xd0] sm:$0xff]  ;;  %v296_v51 = vld [vmem:[#allocation7 + $0x100] sm:$0xff]  ;;  %v343_v53 = vld [vmem:[#allocation7 + $0x278] sm:$0xff]  ;;  %v2578_v57 = vpack.c.bf16 %v330_v48, %v324_v43  ;;  %p3399_p8 = pnand %p3398_p7, %p3392_p4 }
  0x57   :  { %2569 = vmatprep.subr.bf16.mxu0 %v2568_v20  ;;  %v303_v54 = vld [vmem:[#allocation7 + $0x138] sm:$0xff]  ;;  %v2758_v55 = vpack.c.bf16 %v296_v51, %v290_v50  ;;  %v309_v56 = vld [vmem:[#allocation7 + $0x168] sm:$0xff]  ;;  %v336_v58 = vld [vmem:[#allocation7 + $0x240] sm:$0xff]  ;;  %v2580_v62 = vpack.c.bf16 %v343_v53, %v337_v52 }
  0x58   :  { %v2760_v59 = vpack.c.bf16 %v309_v56, %v303_v54  ;;  %v302_v60 = vld [vmem:[#allocation7 + $0x130] sm:$0xff]  ;;  %v308_v61 = vld [vmem:[#allocation7 + $0x160] sm:$0xff]  ;;  %v315_v0 = vld [vmem:[#allocation7 + $0x198] sm:$0xff] }
  0x59   :  { %2755 = vmatpush1.bf16.msra.mxu1 %v2754_v44  ;;  %v342_v63 = vld [vmem:[#allocation7 + $0x270] sm:$0xff]  ;;  %v321_v1 = vld [vmem:[#allocation7 + $0x1c8] sm:$0xff]  ;;  %v355_v6 = vld [vmem:[#allocation7 + $0x2d8] sm:$0xff]  ;;  %v2762_v7 = vpack.c.bf16 %v308_v61, %v302_v60 }
  0x5a   :  { %2571 = vmatpush1.bf16.msra.mxu0 %v2570_v27  ;;  %2757 = vmatprep.subr.bf16.mxu1 %v2756_v49  ;;  %v349_v5 = vld [vmem:[#allocation7 + $0x2a8] sm:$0xff]  ;;  %v2582_v8 = vpack.c.bf16 %v342_v63, %v336_v58  ;;  %v348_v9 = vld [vmem:[#allocation7 + $0x2a0] sm:$0xff]  ;;  %v2764_v10 = vpack.c.bf16 %v321_v1, %v315_v0  ;;  %v314_v11 = vld [vmem:[#allocation7 + $0x190] sm:$0xff] }
  0x5b   :  { %2573 = vmatprep.subr.bf16.mxu0 %v2572_v32  ;;  %v320_v12 = vld [vmem:[#allocation7 + $0x1c0] sm:$0xff]  ;;  %v2584_v13 = vpack.c.bf16 %v355_v6, %v349_v5  ;;  %v354_v14 = vld [vmem:[#allocation7 + $0x2d0] sm:$0xff]  ;;  %v327_v15 = vld [vmem:[#allocation7 + $0x1f8] sm:$0xff] }
  0x5c   :  { %v333_v16 = vld [vmem:[#allocation7 + $0x228] sm:$0xff]  ;;  %v367_v20 = vld [vmem:[#allocation7 + $0x338] sm:$0xff]  ;;  %v2766_v21 = vpack.c.bf16 %v320_v12, %v314_v11  ;;  %v2586_v22 = vpack.c.bf16 %v354_v14, %v348_v9  ;;  %v360_v23 = vld [vmem:[#allocation7 + $0x300] sm:$0xff] }
  0x5d   :  { %2759 = vmatpush1.bf16.msra.mxu1 %v2758_v55  ;;  %v361_v19 = vld [vmem:[#allocation7 + $0x308] sm:$0xff]  ;;  %v2768_v24 = vpack.c.bf16 %v333_v16, %v327_v15  ;;  %v326_v25 = vld [vmem:[#allocation7 + $0x1f0] sm:$0xff]  ;;  %v332_v26 = vld [vmem:[#allocation7 + $0x220] sm:$0xff] }
  0x5e   :  { %2575 = vmatpush1.bf16.msra.mxu0 %v2574_v42  ;;  %2761 = vmatprep.subr.bf16.mxu1 %v2760_v59  ;;  %v2588_v27 = vpack.c.bf16 %v367_v20, %v361_v19  ;;  %v366_v28 = vld [vmem:[#allocation7 + $0x330] sm:$0xff]  ;;  %v339_v29 = vld [vmem:[#allocation7 + $0x258] sm:$0xff]  ;;  %v345_v30 = vld [vmem:[#allocation7 + $0x288] sm:$0xff]  ;;  %v2770_v35 = vpack.c.bf16 %v332_v26, %v326_v25 }
  0x5f   :  { %2577 = vmatprep.subr.bf16.mxu0 %v2576_v47  ;;  %v373_v32 = vld [vmem:[#allocation7 + $0x368] sm:$0xff]  ;;  %v379_v33 = vld [vmem:[#allocation7 + $0x398] sm:$0xff]  ;;  %v372_v34 = vld [vmem:[#allocation7 + $0x360] sm:$0xff]  ;;  %v2590_v36 = vpack.c.bf16 %v366_v28, %v360_v23  ;;  %v2772_v37 = vpack.c.bf16 %v345_v30, %v339_v29 }
  0x60   :  { %v338_v38 = vld [vmem:[#allocation7 + $0x250] sm:$0xff]  ;;  %v344_v39 = vld [vmem:[#allocation7 + $0x280] sm:$0xff]  ;;  %v2592_v41 = vpack.c.bf16 %v379_v33, %v373_v32  ;;  %v351_v43 = vld [vmem:[#allocation7 + $0x2b8] sm:$0xff] }
  0x61   :  { %2763 = vmatpush1.bf16.msra.mxu1 %v2762_v7  ;;  %v3539_v40 = vld [vmem:[#allocation5] sm:$0xff]  ;;  %v357_v44 = vld [vmem:[#allocation7 + $0x2e8] sm:$0xff]  ;;  %v2774_v48 = vpack.c.bf16 %v344_v39, %v338_v38  ;;  %v384_v51 = vld [vmem:[#allocation7 + $0x3c0] sm:$0xff] }
  0x62   :  { %2579 = vmatpush1.bf16.msra.mxu0 %v2578_v57  ;;  %2765 = vmatprep.subr.bf16.mxu1 %v2764_v10  ;;  %v378_v42 = vld [vmem:[#allocation7 + $0x390] sm:$0xff]  ;;  %v3543_v45 = vrot.slane %v3539_v40, %v3537_v31  ;;  %v385_v46 = vld [vmem:[#allocation7 + $0x3c8] sm:$0xff]  ;;  %v391_v47 = vld [vmem:[#allocation7 + $0x3f8] sm:$0xff]  ;;  %v2776_v52 = vpack.c.bf16 %v357_v44, %v351_v43 }
  0x63   :  { %2581 = vmatprep.subr.bf16.mxu0 %v2580_v62  ;;  %v2594_v50 = vpack.c.bf16 %v378_v42, %v372_v34  ;;  %v350_v53 = vld [vmem:[#allocation7 + $0x2b0] sm:$0xff]  ;;  %v356_v54 = vld [vmem:[#allocation7 + $0x2e0] sm:$0xff]  ;;  %v2596_v55 = vpack.c.bf16 %v391_v47, %v385_v46  ;;  %v363_v57 = vld [vmem:[#allocation7 + $0x318] sm:$0xff] }
  0x64   :  { %v3547_v49 = vcombine.high %v3543_v45, %v3543_v45  ;;  %v390_v56 = vld [vmem:[#allocation7 + $0x3f0] sm:$0xff]  ;;  %v369_v58 = vld [vmem:[#allocation7 + $0x348] sm:$0xff]  ;;  %v403_v60 = vld [vmem:[#allocation7 + $0x458] sm:$0xff]  ;;  %v2778_v61 = vpack.c.bf16 %v356_v54, %v350_v53 }
  0x65   :  { %2767 = vmatpush1.bf16.msra.mxu1 %v2766_v21  ;;  %v397_v59 = vld [vmem:[#allocation7 + $0x428] sm:$0xff]  ;;  %v2598_v62 = vpack.c.bf16 %v390_v56, %v384_v51  ;;  %v396_v63 = vld [vmem:[#allocation7 + $0x420] sm:$0xff]  ;;  %v2780_v0 = vpack.c.bf16 %v369_v58, %v363_v57  ;;  %v362_v1 = vld [vmem:[#allocation7 + $0x310] sm:$0xff] }
  0x66   :  { %2583 = vmatpush1.bf16.msra.mxu0 %v2582_v8  ;;  %2769 = vmatprep.subr.bf16.mxu1 %v2768_v24  ;;  %v368_v2 = vld [vmem:[#allocation7 + $0x340] sm:$0xff]  ;;  %v2600_v3 = vpack.c.bf16 %v403_v60, %v397_v59  ;;  %v402_v4 = vld [vmem:[#allocation7 + $0x450] sm:$0xff]  ;;  %v375_v5 = vld [vmem:[#allocation7 + $0x378] sm:$0xff]  ;;  %v842_v59 = vcombine.high %v3539_v40, %v3539_v40 }
  0x67   :  { %2585 = vmatprep.subr.bf16.mxu0 %v2584_v13  ;;  %937 = vmatprep.mubr.f32.mxu0 %v3547_v49  ;;  %v381_v6 = vld [vmem:[#allocation7 + $0x3a8] sm:$0xff]  ;;  %v415_v8 = vld [vmem:[#allocation7 + $0x4b8] sm:$0xff]  ;;  %v2782_v9 = vpack.c.bf16 %v368_v2, %v362_v1  ;;  %v2602_v10 = vpack.c.bf16 %v402_v4, %v396_v63  ;;  %v408_v11 = vld [vmem:[#allocation7 + $0x480] sm:$0xff] }
  0x68   :  { %1150 = vmatprep.mubr.f32.mxu1 %v3547_v49  ;;  %v409_v7 = vld [vmem:[#allocation7 + $0x488] sm:$0xff]  ;;  %v2784_v12 = vpack.c.bf16 %v381_v6, %v375_v5  ;;  %v374_v13 = vld [vmem:[#allocation7 + $0x370] sm:$0xff]  ;;  %v380_v14 = vld [vmem:[#allocation7 + $0x3a0] sm:$0xff] }
  0x69   :  { %2771 = vmatpush1.bf16.msra.mxu1 %v2770_v35  ;;  %v2604_v15 = vpack.c.bf16 %v415_v8, %v409_v7  ;;  %v414_v16 = vld [vmem:[#allocation7 + $0x4b0] sm:$0xff]  ;;  %v387_v17 = vld [vmem:[#allocation7 + $0x3d8] sm:$0xff]  ;;  %v393_v18 = vld [vmem:[#allocation7 + $0x408] sm:$0xff]  ;;  %v2786_v21 = vpack.c.bf16 %v380_v14, %v374_v13  ;;  %v3554_v8 = vrot.slane %v842_v59, %v3537_v31 }
  0x6a   :  { %2587 = vmatpush1.bf16.msra.mxu0 %v2586_v22  ;;  %2773 = vmatprep.subr.bf16.mxu1 %v2772_v37  ;;  %v421_v19 = vld [vmem:[#allocation7 + $0x4e8] sm:$0xff]  ;;  %v427_v20 = vld [vmem:[#allocation7 + $0x518] sm:$0xff]  ;;  %v2606_v22 = vpack.c.bf16 %v414_v16, %v408_v11  ;;  %v420_v23 = vld [vmem:[#allocation7 + $0x4e0] sm:$0xff]  ;;  %v2788_v24 = vpack.c.bf16 %v393_v18, %v387_v17 }
  0x6b   :  { %2589 = vmatprep.subr.bf16.mxu0 %v2588_v27  ;;  %v386_v25 = vld [vmem:[#allocation7 + $0x3d0] sm:$0xff]  ;;  %v392_v26 = vld [vmem:[#allocation7 + $0x400] sm:$0xff]  ;;  %v2608_v27 = vpack.c.bf16 %v427_v20, %v421_v19  ;;  %v399_v29 = vld [vmem:[#allocation7 + $0x438] sm:$0xff]  ;;  %v3558_v31 = vcombine.high %v3554_v8, %v3554_v8 }
  0x6c   :  { %v426_v28 = vld [vmem:[#allocation7 + $0x510] sm:$0xff]  ;;  %v405_v30 = vld [vmem:[#allocation7 + $0x468] sm:$0xff]  ;;  %v439_v33 = vld [vmem:[#allocation7 + $0x578] sm:$0xff]  ;;  %v2790_v34 = vpack.c.bf16 %v392_v26, %v386_v25 }
  0x6d   :  { %2775 = vmatpush1.bf16.msra.mxu1 %v2774_v48  ;;  %v433_v32 = vld [vmem:[#allocation7 + $0x548] sm:$0xff]  ;;  %v2610_v35 = vpack.c.bf16 %v426_v28, %v420_v23  ;;  %v2792_v37 = vpack.c.bf16 %v405_v30, %v399_v29  ;;  %v398_v38 = vld [vmem:[#allocation7 + $0x430] sm:$0xff]  ;;  %v404_v39 = vld [vmem:[#allocation7 + $0x460] sm:$0xff] }
  0x6e   :  { %2591 = vmatpush1.bf16.msra.mxu0 %v2590_v36  ;;  %2777 = vmatprep.subr.bf16.mxu1 %v2776_v52  ;;  %v432_v36 = vld [vmem:[#allocation7 + $0x540] sm:$0xff]  ;;  %v438_v42 = vld [vmem:[#allocation7 + $0x570] sm:$0xff]  ;;  %v411_v43 = vld [vmem:[#allocation7 + $0x498] sm:$0xff]  ;;  %v2794_v48 = vpack.c.bf16 %v404_v39, %v398_v38 }
  0x6f   :  { %2593 = vmatprep.subr.bf16.mxu0 %v2592_v41  ;;  %v2612_v41 = vpack.c.bf16 %v439_v33, %v433_v32  ;;  %v417_v44 = vld [vmem:[#allocation7 + $0x4c8] sm:$0xff]  ;;  %v451_v47 = vld [vmem:[#allocation7 + $0x5d8] sm:$0xff]  ;;  %v444_v51 = vld [vmem:[#allocation7 + $0x5a0] sm:$0xff] }
  0x70   :  { %v445_v46 = vld [vmem:[#allocation7 + $0x5a8] sm:$0xff]  ;;  %v2796_v52 = vpack.c.bf16 %v417_v44, %v411_v43  ;;  %v410_v53 = vld [vmem:[#allocation7 + $0x490] sm:$0xff]  ;;  %v416_v54 = vld [vmem:[#allocation7 + $0x4c0] sm:$0xff] }
  0x71   :  { %2779 = vmatpush1.bf16.msra.mxu1 %v2778_v61  ;;  %v450_v56 = vld [vmem:[#allocation7 + $0x5d0] sm:$0xff]  ;;  %v423_v57 = vld [vmem:[#allocation7 + $0x4f8] sm:$0xff]  ;;  %v429_v58 = vld [vmem:[#allocation7 + $0x528] sm:$0xff] }
  0x72   :  { %2595 = vmatpush1.bf16.msra.mxu0 %v2594_v50  ;;  %2781 = vmatprep.subr.bf16.mxu1 %v2780_v0  ;;  %v2614_v50 = vpack.c.bf16 %v438_v42, %v432_v36  ;;  %v457_v60 = vld [vmem:[#allocation7 + $0x608] sm:$0xff]  ;;  %v463_v61 = vld [vmem:[#allocation7 + $0x638] sm:$0xff]  ;;  %v2618_v63 = vpack.c.bf16 %v450_v56, %v444_v51  ;;  %v456_v0 = vld [vmem:[#allocation7 + $0x600] sm:$0xff]  ;;  %v2800_v1 = vpack.c.bf16 %v429_v58, %v423_v57 }
  0x73   :  { %2597 = vmatprep.subr.bf16.mxu0 %v2596_v55  ;;  %v2616_v55 = vpack.c.bf16 %v451_v47, %v445_v46  ;;  %v422_v2 = vld [vmem:[#allocation7 + $0x4f0] sm:$0xff]  ;;  %v2620_v4 = vpack.c.bf16 %v463_v61, %v457_v60  ;;  %v435_v6 = vld [vmem:[#allocation7 + $0x558] sm:$0xff]  ;;  %v441_v7 = vld [vmem:[#allocation7 + $0x588] sm:$0xff] }
  0x74   :  { %v462_v5 = vld [vmem:[#allocation7 + $0x630] sm:$0xff]  ;;  %v469_v40 = vld [vmem:[#allocation7 + $0x668] sm:$0xff]  ;;  %v2804_v13 = vpack.c.bf16 %v441_v7, %v435_v6  ;;  %v447_v18 = vld [vmem:[#allocation7 + $0x5b8] sm:$0xff] }
  0x75   :  { %2783 = vmatpush1.bf16.msra.mxu1 %v2782_v9  ;;  %v475_v9 = vld [vmem:[#allocation7 + $0x698] sm:$0xff]  ;;  %v2622_v11 = vpack.c.bf16 %v462_v5, %v456_v0  ;;  %v434_v14 = vld [vmem:[#allocation7 + $0x550] sm:$0xff]  ;;  %v453_v19 = vld [vmem:[#allocation7 + $0x5e8] sm:$0xff] }
  0x76   :  { %2599 = vmatpush1.bf16.msra.mxu0 %v2598_v62  ;;  %2785 = vmatprep.subr.bf16.mxu1 %v2784_v12  ;;  %v2798_v62 = vpack.c.bf16 %v416_v54, %v410_v53  ;;  %v468_v12 = vld [vmem:[#allocation7 + $0x660] sm:$0xff]  ;;  %v2624_v16 = vpack.c.bf16 %v475_v9, %v469_v40  ;;  %v474_v17 = vld [vmem:[#allocation7 + $0x690] sm:$0xff]  ;;  %v481_v20 = vld [vmem:[#allocation7 + $0x6c8] sm:$0xff]  ;;  %v2808_v25 = vpack.c.bf16 %v453_v19, %v447_v18 }
  0x77   :  { %2601 = vmatprep.subr.bf16.mxu0 %v2600_v3  ;;  %v428_v3 = vld [vmem:[#allocation7 + $0x520] sm:$0xff]  ;;  %v2626_v23 = vpack.c.bf16 %v474_v17, %v468_v12  ;;  %v446_v26 = vld [vmem:[#allocation7 + $0x5b0] sm:$0xff]  ;;  %v459_v30 = vld [vmem:[#allocation7 + $0x618] sm:$0xff] }
  0x78   :  { %v486_v29 = vld [vmem:[#allocation7 + $0x6f0] sm:$0xff]  ;;  %v465_v32 = vld [vmem:[#allocation7 + $0x648] sm:$0xff]  ;;  %v471_v44 = vld [vmem:[#allocation7 + $0x678] sm:$0xff] }
  0x79   :  { %2787 = vmatpush1.bf16.msra.mxu1 %v2786_v21  ;;  %v487_v21 = vld [vmem:[#allocation7 + $0x6f8] sm:$0xff]  ;;  %v493_v33 = vld [vmem:[#allocation7 + $0x728] sm:$0xff]  ;;  %v2812_v38 = vpack.c.bf16 %v465_v32, %v459_v30  ;;  %v458_v39 = vld [vmem:[#allocation7 + $0x610] sm:$0xff] }
  0x7a   :  { %2603 = vmatpush1.bf16.msra.mxu0 %v2602_v10  ;;  %2789 = vmatprep.subr.bf16.mxu1 %v2788_v24  ;;  %v2802_v10 = vpack.c.bf16 %v428_v3, %v422_v2  ;;  %v480_v24 = vld [vmem:[#allocation7 + $0x6c0] sm:$0xff]  ;;  %v2628_v28 = vpack.c.bf16 %v487_v21, %v481_v20  ;;  %v498_v43 = vld [vmem:[#allocation7 + $0x750] sm:$0xff]  ;;  %v477_v46 = vld [vmem:[#allocation7 + $0x6a8] sm:$0xff] }
  0x7b   :  { %2605 = vmatprep.subr.bf16.mxu0 %v2604_v15  ;;  %v440_v15 = vld [vmem:[#allocation7 + $0x580] sm:$0xff]  ;;  %v2630_v36 = vpack.c.bf16 %v486_v29, %v480_v24  ;;  %v505_v47 = vld [vmem:[#allocation7 + $0x788] sm:$0xff]  ;;  %v2816_v53 = vpack.c.bf16 %v477_v46, %v471_v44  ;;  %v470_v54 = vld [vmem:[#allocation7 + $0x670] sm:$0xff] }
  0x7c   :  { %v510_v57 = vld [vmem:[#allocation7 + $0x7b0] sm:$0xff]  ;;  %v483_v58 = vld [vmem:[#allocation7 + $0x6d8] sm:$0xff]  ;;  %v489_v59 = vld [vmem:[#allocation7 + $0x708] sm:$0xff] }
  0x7d   :  { %2791 = vmatpush1.bf16.msra.mxu1 %v2790_v34  ;;  %v499_v34 = vld [vmem:[#allocation7 + $0x758] sm:$0xff]  ;;  %v517_v60 = vld [vmem:[#allocation7 + $0x7e8] sm:$0xff]  ;;  %v516_v0 = vld [vmem:[#allocation7 + $0x7e0] sm:$0xff] }
  0x7e   :  { %2607 = vmatpush1.bf16.msra.mxu0 %v2606_v22  ;;  %2793 = vmatprep.subr.bf16.mxu1 %v2792_v37  ;;  %v2806_v22 = vpack.c.bf16 %v440_v15, %v434_v14  ;;  %v492_v37 = vld [vmem:[#allocation7 + $0x720] sm:$0xff]  ;;  %v2632_v42 = vpack.c.bf16 %v499_v34, %v493_v33  ;;  %v523_v61 = vld [vmem:[#allocation7 + $0x818] sm:$0xff]  ;;  %v482_v2 = vld [vmem:[#allocation7 + $0x6d0] sm:$0xff] }
  0x7f   :  { %2609 = vmatprep.subr.bf16.mxu0 %v2608_v27  ;;  %v452_v27 = vld [vmem:[#allocation7 + $0x5e0] sm:$0xff]  ;;  %v2634_v51 = vpack.c.bf16 %v498_v43, %v492_v37  ;;  %v522_v5 = vld [vmem:[#allocation7 + $0x810] sm:$0xff]  ;;  %v495_v6 = vld [vmem:[#allocation7 + $0x738] sm:$0xff] }
  0x80   :  { %v488_v3 = vld [vmem:[#allocation7 + $0x700] sm:$0xff]  ;;  %v501_v7 = vld [vmem:[#allocation7 + $0x768] sm:$0xff]  ;;  %v535_v9 = vld [vmem:[#allocation7 + $0x878] sm:$0xff] }
  0x81   :  { %2795 = vmatpush1.bf16.msra.mxu1 %v2794_v48  ;;  %v511_v48 = vld [vmem:[#allocation7 + $0x7b8] sm:$0xff]  ;;  %v529_v40 = vld [vmem:[#allocation7 + $0x848] sm:$0xff]  ;;  %v528_v12 = vld [vmem:[#allocation7 + $0x840] sm:$0xff] }
  0x82   :  { %2611 = vmatpush1.bf16.msra.mxu0 %v2610_v35  ;;  %2797 = vmatprep.subr.bf16.mxu1 %v2796_v52  ;;  %v2810_v35 = vpack.c.bf16 %v452_v27, %v446_v26  ;;  %v504_v52 = vld [vmem:[#allocation7 + $0x780] sm:$0xff]  ;;  %v2636_v56 = vpack.c.bf16 %v511_v48, %v505_v47  ;;  %v494_v14 = vld [vmem:[#allocation7 + $0x730] sm:$0xff]  ;;  %v507_v18 = vld [vmem:[#allocation7 + $0x798] sm:$0xff] }
  0x83   :  { %2613 = vmatprep.subr.bf16.mxu0 %v2612_v41  ;;  %v464_v41 = vld [vmem:[#allocation7 + $0x640] sm:$0xff]  ;;  %v534_v17 = vld [vmem:[#allocation7 + $0x870] sm:$0xff]  ;;  %v513_v19 = vld [vmem:[#allocation7 + $0x7c8] sm:$0xff] }
  0x84   :  { %v500_v15 = vld [vmem:[#allocation7 + $0x760] sm:$0xff]  ;;  %v541_v20 = vld [vmem:[#allocation7 + $0x8a8] sm:$0xff]  ;;  %v547_v21 = vld [vmem:[#allocation7 + $0x8d8] sm:$0xff] }
  0x85   :  { %2799 = vmatpush1.bf16.msra.mxu1 %v2798_v62  ;;  %v540_v24 = vld [vmem:[#allocation7 + $0x8a0] sm:$0xff]  ;;  %v506_v26 = vld [vmem:[#allocation7 + $0x790] sm:$0xff]  ;;  %v519_v30 = vld [vmem:[#allocation7 + $0x7f8] sm:$0xff] }
  0x86   :  { %2615 = vmatpush1.bf16.msra.mxu0 %v2614_v50  ;;  %2801 = vmatprep.subr.bf16.mxu1 %v2800_v1  ;;  %v2814_v50 = vpack.c.bf16 %v464_v41, %v458_v39  ;;  %v2820_v1 = vpack.c.bf16 %v489_v59, %v483_v58  ;;  %v512_v27 = vld [vmem:[#allocation7 + $0x7c0] sm:$0xff]  ;;  %v546_v29 = vld [vmem:[#allocation7 + $0x8d0] sm:$0xff]  ;;  %v525_v32 = vld [vmem:[#allocation7 + $0x828] sm:$0xff] }
  0x87   :  { %2617 = vmatprep.subr.bf16.mxu0 %v2616_v55  ;;  %v476_v55 = vld [vmem:[#allocation7 + $0x6a0] sm:$0xff]  ;;  %v553_v33 = vld [vmem:[#allocation7 + $0x908] sm:$0xff]  ;;  %v559_v34 = vld [vmem:[#allocation7 + $0x938] sm:$0xff] }
  0x88   :  { %v2818_v62 = vpack.c.bf16 %v476_v55, %v470_v54  ;;  %v552_v37 = vld [vmem:[#allocation7 + $0x900] sm:$0xff]  ;;  %v518_v39 = vld [vmem:[#allocation7 + $0x7f0] sm:$0xff]  ;;  %v531_v44 = vld [vmem:[#allocation7 + $0x858] sm:$0xff] }
  0x89   :  { %2803 = vmatpush1.bf16.msra.mxu1 %v2802_v10  ;;  %v2822_v10 = vpack.c.bf16 %v488_v3, %v482_v2  ;;  %v524_v41 = vld [vmem:[#allocation7 + $0x820] sm:$0xff]  ;;  %v558_v43 = vld [vmem:[#allocation7 + $0x930] sm:$0xff]  ;;  %v537_v46 = vld [vmem:[#allocation7 + $0x888] sm:$0xff] }
  0x8a   :  { %2619 = vmatpush1.bf16.msra.mxu0 %v2618_v63  ;;  %2805 = vmatprep.subr.bf16.mxu1 %v2804_v13  ;;  %v2638_v63 = vpack.c.bf16 %v510_v57, %v504_v52  ;;  %v2824_v13 = vpack.c.bf16 %v501_v7, %v495_v6  ;;  %v565_v47 = vld [vmem:[#allocation7 + $0x968] sm:$0xff]  ;;  %v571_v48 = vld [vmem:[#allocation7 + $0x998] sm:$0xff]  ;;  %v564_v52 = vld [vmem:[#allocation7 + $0x960] sm:$0xff] }
  0x8b   :  { %2621 = vmatprep.subr.bf16.mxu0 %v2620_v4  ;;  %v2640_v4 = vpack.c.bf16 %v523_v61, %v517_v60  ;;  %v530_v54 = vld [vmem:[#allocation7 + $0x850] sm:$0xff]  ;;  %v536_v55 = vld [vmem:[#allocation7 + $0x880] sm:$0xff]  ;;  %v543_v58 = vld [vmem:[#allocation7 + $0x8b8] sm:$0xff] }
  0x8c   :  { %v570_v57 = vld [vmem:[#allocation7 + $0x990] sm:$0xff]  ;;  %v549_v59 = vld [vmem:[#allocation7 + $0x8e8] sm:$0xff]  ;;  %v583_v61 = vld [vmem:[#allocation7 + $0x9f8] sm:$0xff] }
  0x8d   :  { %938 = vmatmul.mubr.f32.vlgmr.msra.gmra.mrb[0].mxu0 %v3543_v45  ;;  %2807 = vmatpush1.bf16.msra.mxu1 %v2806_v22  ;;  %v2826_v22 = vpack.c.bf16 %v500_v15, %v494_v14  ;;  %v577_v60 = vld [vmem:[#allocation7 + $0x9c8] sm:$0xff]  ;;  %v542_v2 = vld [vmem:[#allocation7 + $0x8b0] sm:$0xff]  ;;  %v548_v3 = vld [vmem:[#allocation7 + $0x8e0] sm:$0xff] }
  0x8e   :  { %2623 = vmatpush1.bf16.msra.mxu0 %v2622_v11  ;;  %1008 = vmatprep.mubr.f32.mxu0 %v3558_v31  ;;  %v2642_v11 = vpack.c.bf16 %v522_v5, %v516_v0  ;;  %v576_v0 = vld [vmem:[#allocation7 + $0x9c0] sm:$0xff]  ;;  %v582_v5 = vld [vmem:[#allocation7 + $0x9f0] sm:$0xff]  ;;  %v555_v6 = vld [vmem:[#allocation7 + $0x918] sm:$0xff] }
  0x8f   :  { %2625 = vmatprep.subr.bf16.mxu0 %v2624_v16  ;;  %2809 = vmatprep.subr.bf16.mxu1 %v2808_v25  ;;  %v2644_v16 = vpack.c.bf16 %v535_v9, %v529_v40  ;;  %v2828_v25 = vpack.c.bf16 %v513_v19, %v507_v18  ;;  %v561_v7 = vld [vmem:[#allocation7 + $0x948] sm:$0xff]  ;;  %v595_v9 = vld [vmem:[#allocation7 + $0xa58] sm:$0xff]  ;;  %v554_v14 = vld [vmem:[#allocation7 + $0x910] sm:$0xff] }
  0x90   :  { %v589_v40 = vld [vmem:[#allocation7 + $0xa28] sm:$0xff]  ;;  %v560_v15 = vld [vmem:[#allocation7 + $0x940] sm:$0xff]  ;;  %v567_v18 = vld [vmem:[#allocation7 + $0x978] sm:$0xff] }
  0x91   :  { %2811 = vmatpush1.bf16.msra.mxu1 %v2810_v35  ;;  %v2830_v35 = vpack.c.bf16 %v512_v27, %v506_v26  ;;  %v573_v19 = vld [vmem:[#allocation7 + $0x9a8] sm:$0xff]  ;;  %v566_v26 = vld [vmem:[#allocation7 + $0x970] sm:$0xff]  ;;  %v572_v27 = vld [vmem:[#allocation7 + $0x9a0] sm:$0xff] }
  0x92   :  { %2627 = vmatpush1.bf16.msra.mxu0 %v2626_v23  ;;  %2813 = vmatprep.subr.bf16.mxu1 %v2812_v38  ;;  %v2646_v23 = vpack.c.bf16 %v534_v17, %v528_v12  ;;  %v2832_v38 = vpack.c.bf16 %v525_v32, %v519_v30  ;;  %v588_v12 = vld [vmem:[#allocation7 + $0xa20] sm:$0xff]  ;;  %v594_v17 = vld [vmem:[#allocation7 + $0xa50] sm:$0xff]  ;;  %v579_v30 = vld [vmem:[#allocation7 + $0x9d8] sm:$0xff] }
  0x93   :  { %2629 = vmatprep.subr.bf16.mxu0 %v2628_v28  ;;  %v2648_v28 = vpack.c.bf16 %v547_v21, %v541_v20  ;;  %v601_v20 = vld [vmem:[#allocation7 + $0xa88] sm:$0xff]  ;;  %v607_v21 = vld [vmem:[#allocation7 + $0xab8] sm:$0xff] }
  0x94   :  { %1151 = vmatmul.mubr.f32.vlgmr.msra.gmra.mrb[0].mxu1 %v3543_v45  ;;  %v585_v32 = vld [vmem:[#allocation7 + $0xa08] sm:$0xff] }
  0x95   :  { %2815 = vmatpush1.bf16.msra.mxu1 %v2814_v50  ;;  %1221 = vmatprep.mubr.f32.mxu1 %v3558_v31  ;;  %v2834_v50 = vpack.c.bf16 %v524_v41, %v518_v39  ;;  %v578_v39 = vld [vmem:[#allocation7 + $0x9d0] sm:$0xff]  ;;  %v584_v41 = vld [vmem:[#allocation7 + $0xa00] sm:$0xff] }
  0x96   :  { %2631 = vmatpush1.bf16.msra.mxu0 %v2630_v36  ;;  %2817 = vmatprep.subr.bf16.mxu1 %v2816_v53  ;;  %v2650_v36 = vpack.c.bf16 %v546_v29, %v540_v24  ;;  %v2836_v53 = vpack.c.bf16 %v537_v46, %v531_v44  ;;  %v600_v24 = vld [vmem:[#allocation7 + $0xa80] sm:$0xff]  ;;  %v606_v29 = vld [vmem:[#allocation7 + $0xab0] sm:$0xff]  ;;  %v591_v44 = vld [vmem:[#allocation7 + $0xa38] sm:$0xff] }
  0x97   :  { %2633 = vmatprep.subr.bf16.mxu0 %v2632_v42  ;;  %v2652_v42 = vpack.c.bf16 %v559_v34, %v553_v33  ;;  %v613_v33 = vld [vmem:[#allocation7 + $0xae8] sm:$0xff]  ;;  %v619_v34 = vld [vmem:[#allocation7 + $0xb18] sm:$0xff] }
  0x98   :  { %v597_v46 = vld [vmem:[#allocation7 + $0xa68] sm:$0xff] }
  0x99   :  { %2819 = vmatpush1.bf16.msra.mxu1 %v2818_v62  ;;  %v2838_v62 = vpack.c.bf16 %v536_v55, %v530_v54  ;;  %v590_v54 = vld [vmem:[#allocation7 + $0xa30] sm:$0xff]  ;;  %v596_v55 = vld [vmem:[#allocation7 + $0xa60] sm:$0xff] }
  0x9a   :  { %2635 = vmatpush1.bf16.msra.mxu0 %v2634_v51  ;;  %2821 = vmatprep.subr.bf16.mxu1 %v2820_v1  ;;  %v2654_v51 = vpack.c.bf16 %v558_v43, %v552_v37  ;;  %v2840_v1 = vpack.c.bf16 %v549_v59, %v543_v58  ;;  %v612_v37 = vld [vmem:[#allocation7 + $0xae0] sm:$0xff]  ;;  %v618_v43 = vld [vmem:[#allocation7 + $0xb10] sm:$0xff]  ;;  %v603_v58 = vld [vmem:[#allocation7 + $0xa98] sm:$0xff] }
  0x9b   :  { %2637 = vmatprep.subr.bf16.mxu0 %v2636_v56  ;;  %v2656_v56 = vpack.c.bf16 %v571_v48, %v565_v47  ;;  %v625_v47 = vld [vmem:[#allocation7 + $0xb48] sm:$0xff]  ;;  %v631_v48 = vld [vmem:[#allocation7 + $0xb78] sm:$0xff] }
  0x9c   :  { %v609_v59 = vld [vmem:[#allocation7 + $0xac8] sm:$0xff] }
  0x9d   :  { %2823 = vmatpush1.bf16.msra.mxu1 %v2822_v10  ;;  %v2842_v10 = vpack.c.bf16 %v548_v3, %v542_v2  ;;  %v602_v2 = vld [vmem:[#allocation7 + $0xa90] sm:$0xff]  ;;  %v608_v3 = vld [vmem:[#allocation7 + $0xac0] sm:$0xff] }
  0x9e   :  { %2639 = vmatpush1.bf16.msra.mxu0 %v2638_v63  ;;  %2825 = vmatprep.subr.bf16.mxu1 %v2824_v13  ;;  %v2658_v63 = vpack.c.bf16 %v570_v57, %v564_v52  ;;  %v2844_v13 = vpack.c.bf16 %v561_v7, %v555_v6  ;;  %v624_v52 = vld [vmem:[#allocation7 + $0xb40] sm:$0xff]  ;;  %v630_v57 = vld [vmem:[#allocation7 + $0xb70] sm:$0xff]  ;;  %v615_v6 = vld [vmem:[#allocation7 + $0xaf8] sm:$0xff] }
  0x9f   :  { %2641 = vmatprep.subr.bf16.mxu0 %v2640_v4  ;;  %v2660_v4 = vpack.c.bf16 %v583_v61, %v577_v60  ;;  %v637_v60 = vld [vmem:[#allocation7 + $0xba8] sm:$0xff]  ;;  %v643_v61 = vld [vmem:[#allocation7 + $0xbd8] sm:$0xff] }
  0xa0   :  { %v621_v7 = vld [vmem:[#allocation7 + $0xb28] sm:$0xff] }
  0xa1   :  { %2827 = vmatpush1.bf16.msra.mxu1 %v2826_v22  ;;  %v2846_v22 = vpack.c.bf16 %v560_v15, %v554_v14  ;;  %v614_v14 = vld [vmem:[#allocation7 + $0xaf0] sm:$0xff]  ;;  %v620_v15 = vld [vmem:[#allocation7 + $0xb20] sm:$0xff] }
  0xa2   :  { %2643 = vmatpush1.bf16.msra.mxu0 %v2642_v11  ;;  %2829 = vmatprep.subr.bf16.mxu1 %v2828_v25  ;;  %v2662_v11 = vpack.c.bf16 %v582_v5, %v576_v0  ;;  %v2848_v25 = vpack.c.bf16 %v573_v19, %v567_v18  ;;  %v636_v0 = vld [vmem:[#allocation7 + $0xba0] sm:$0xff]  ;;  %v642_v5 = vld [vmem:[#allocation7 + $0xbd0] sm:$0xff]  ;;  %v627_v18 = vld [vmem:[#allocation7 + $0xb58] sm:$0xff] }
  0xa3   :  { %2645 = vmatprep.subr.bf16.mxu0 %v2644_v16  ;;  %v2664_v16 = vpack.c.bf16 %v595_v9, %v589_v40  ;;  %v649_v40 = vld [vmem:[#allocation7 + $0xc08] sm:$0xff]  ;;  %v655_v9 = vld [vmem:[#allocation7 + $0xc38] sm:$0xff] }
  0xa4   :  { %v633_v19 = vld [vmem:[#allocation7 + $0xb88] sm:$0xff] }
  0xa5   :  { %2831 = vmatpush1.bf16.msra.mxu1 %v2830_v35  ;;  %v2850_v35 = vpack.c.bf16 %v572_v27, %v566_v26  ;;  %v2868_v26 = vpack.c.bf16 %v633_v19, %v627_v18  ;;  %v626_v27 = vld [vmem:[#allocation7 + $0xb50] sm:$0xff] }
  0xa6   :  { %2647 = vmatpush1.bf16.msra.mxu0 %v2646_v23  ;;  %2833 = vmatprep.subr.bf16.mxu1 %v2832_v38  ;;  %v2666_v23 = vpack.c.bf16 %v594_v17, %v588_v12  ;;  %v2852_v38 = vpack.c.bf16 %v585_v32, %v579_v30  ;;  %v648_v12 = vld [vmem:[#allocation7 + $0xc00] sm:$0xff]  ;;  %v654_v17 = vld [vmem:[#allocation7 + $0xc30] sm:$0xff]  ;;  %v639_v32 = vld [vmem:[#allocation7 + $0xbb8] sm:$0xff] }
  0xa7   :  { %2649 = vmatprep.subr.bf16.mxu0 %v2648_v28  ;;  %v2668_v28 = vpack.c.bf16 %v607_v21, %v601_v20  ;;  %v661_v20 = vld [vmem:[#allocation7 + $0xc68] sm:$0xff]  ;;  %v667_v21 = vld [vmem:[#allocation7 + $0xc98] sm:$0xff]  ;;  %v666_v30 = vld [vmem:[#allocation7 + $0xc90] sm:$0xff] }
  0xa8   :  { %v714_v19 = vld [vmem:[#allocation7 + $0xe10] sm:$0xff] }
  0xa9   :  { %2835 = vmatpush1.bf16.msra.mxu1 %v2834_v50  ;;  %v2854_v50 = vpack.c.bf16 %v584_v41, %v578_v39  ;;  %v672_v39 = vld [vmem:[#allocation7 + $0xcc0] sm:$0xff] }
  0xaa   :  { %2651 = vmatpush1.bf16.msra.mxu0 %v2650_v36  ;;  %2837 = vmatprep.subr.bf16.mxu1 %v2836_v53  ;;  %v2670_v36 = vpack.c.bf16 %v606_v29, %v600_v24  ;;  %v2856_v53 = vpack.c.bf16 %v597_v46, %v591_v44  ;;  %v2686_v24 = vpack.c.bf16 %v654_v17, %v648_v12  ;;  %v678_v46 = vld [vmem:[#allocation7 + $0xcf0] sm:$0xff]  ;;  %v680_v17 = vld [vmem:[#allocation7 + $0xd00] sm:$0xff] }
  0xab   :  { %2653 = vmatprep.subr.bf16.mxu0 %v2652_v42  ;;  %v2672_v42 = vpack.c.bf16 %v619_v34, %v613_v33  ;;  %v2688_v29 = vpack.c.bf16 %v667_v21, %v661_v20  ;;  %v645_v33 = vld [vmem:[#allocation7 + $0xbe8] sm:$0xff]  ;;  %v687_v20 = vld [vmem:[#allocation7 + $0xd38] sm:$0xff] }
  0xac   :  { %v2872_v41 = vpack.c.bf16 %v645_v33, %v639_v32  ;;  %v693_v21 = vld [vmem:[#allocation7 + $0xd68] sm:$0xff]  ;;  %v726_v33 = vld [vmem:[#allocation7 + $0xe70] sm:$0xff] }
  0xad   :  { %2839 = vmatpush1.bf16.msra.mxu1 %v2838_v62  ;;  %v2858_v62 = vpack.c.bf16 %v596_v55, %v590_v54  ;;  %v684_v54 = vld [vmem:[#allocation7 + $0xd20] sm:$0xff] }
  0xae   :  { %2655 = vmatpush1.bf16.msra.mxu0 %v2654_v51  ;;  %2841 = vmatprep.subr.bf16.mxu1 %v2840_v1  ;;  %v2674_v51 = vpack.c.bf16 %v618_v43, %v612_v37  ;;  %v2860_v1 = vpack.c.bf16 %v609_v59, %v603_v58  ;;  %v644_v43 = vld [vmem:[#allocation7 + $0xbe0] sm:$0xff]  ;;  %v690_v59 = vld [vmem:[#allocation7 + $0xd50] sm:$0xff] }
  0xaf   :  { %2657 = vmatprep.subr.bf16.mxu0 %v2656_v56  ;;  %v2676_v56 = vpack.c.bf16 %v631_v48, %v625_v47  ;;  %v651_v47 = vld [vmem:[#allocation7 + $0xc18] sm:$0xff]  ;;  %v657_v48 = vld [vmem:[#allocation7 + $0xc48] sm:$0xff] }
  0xb0   :  { %v2876_v55 = vpack.c.bf16 %v657_v48, %v651_v47  ;;  %v738_v48 = vld [vmem:[#allocation7 + $0xed0] sm:$0xff] }
  0xb1   :  { %2843 = vmatpush1.bf16.msra.mxu1 %v2842_v10  ;;  %v2862_v10 = vpack.c.bf16 %v608_v3, %v602_v2  ;;  %v696_v2 = vld [vmem:[#allocation7 + $0xd80] sm:$0xff] }
  0xb2   :  { %2659 = vmatpush1.bf16.msra.mxu0 %v2658_v63  ;;  %2845 = vmatprep.subr.bf16.mxu1 %v2844_v13  ;;  %v2678_v63 = vpack.c.bf16 %v630_v57, %v624_v52  ;;  %v2864_v13 = vpack.c.bf16 %v621_v7, %v615_v6  ;;  %v656_v57 = vld [vmem:[#allocation7 + $0xc40] sm:$0xff]  ;;  %v702_v7 = vld [vmem:[#allocation7 + $0xdb0] sm:$0xff] }
  0xb3   :  { %2661 = vmatprep.subr.bf16.mxu0 %v2660_v4  ;;  %v2680_v4 = vpack.c.bf16 %v643_v61, %v637_v60  ;;  %v663_v60 = vld [vmem:[#allocation7 + $0xc78] sm:$0xff]  ;;  %v669_v61 = vld [vmem:[#allocation7 + $0xca8] sm:$0xff] }
  0xb4   :  { %v2880_v3 = vpack.c.bf16 %v669_v61, %v663_v60  ;;  %v750_v61 = vld [vmem:[#allocation7 + $0xf30] sm:$0xff] }
  0xb5   :  { %2847 = vmatpush1.bf16.msra.mxu1 %v2846_v22  ;;  %v3564_v22 = vld.sshfl [vmem:[#allocation5 + $0x8] sm:$0x33 pattern:$0x76325410] }
  0xb6   :  { %2663 = vmatpush1.bf16.msra.mxu0 %v2662_v11  ;;  %2849 = vmatprep.subr.bf16.mxu1 %v2848_v25  ;;  %v2682_v11 = vpack.c.bf16 %v642_v5, %v636_v0  ;;  %v660_v25 = vld [vmem:[#allocation7 + $0xc60] sm:$0xff]  ;;  %v3568_v34 = vcombine.high %v3564_v22, %v3564_v22 }
  0xb7   :  { %2665 = vmatprep.subr.bf16.mxu0 %v2664_v16  ;;  %v2684_v16 = vpack.c.bf16 %v655_v9, %v649_v40  ;;  %v668_v5 = vld [vmem:[#allocation7 + $0xca0] sm:$0xff]  ;;  %v675_v40 = vld [vmem:[#allocation7 + $0xcd8] sm:$0xff]  ;;  %v681_v9 = vld [vmem:[#allocation7 + $0xd08] sm:$0xff] }
  0xb9   :  { %2851 = vmatpush1.bf16.msra.mxu1 %v2850_v35  ;;  %v673_v35 = vld [vmem:[#allocation7 + $0xcc8] sm:$0xff] }
  0xba   :  { %2667 = vmatpush1.bf16.msra.mxu0 %v2666_v23  ;;  %2853 = vmatprep.subr.bf16.mxu1 %v2852_v38  ;;  %v2866_v23 = vpack.c.bf16 %v620_v15, %v614_v14  ;;  %v2690_v38 = vpack.c.bf16 %v666_v30, %v660_v25  ;;  %v708_v14 = vld [vmem:[#allocation7 + $0xde0] sm:$0xff]  ;;  %v2884_v15 = vpack.c.bf16 %v681_v9, %v675_v40  ;;  %v762_v9 = vld [vmem:[#allocation7 + $0xf90] sm:$0xff] }
  0xbb   :  { %2669 = vmatprep.subr.bf16.mxu0 %v2668_v28  ;;  %v632_v28 = vld [vmem:[#allocation7 + $0xb80] sm:$0xff] }
  0xbc   :  { %v2870_v37 = vpack.c.bf16 %v632_v28, %v626_v27  ;;  %v720_v27 = vld [vmem:[#allocation7 + $0xe40] sm:$0xff]  ;;  %v2888_v28 = vpack.c.bf16 %v693_v21, %v687_v20  ;;  %v774_v21 = vld [vmem:[#allocation7 + $0xff0] sm:$0xff] }
  0xbd   :  { %2855 = vmatpush1.bf16.msra.mxu1 %v2854_v50  ;;  %v685_v50 = vld [vmem:[#allocation7 + $0xd28] sm:$0xff]  ;;  %v692_v30 = vld [vmem:[#allocation7 + $0xd60] sm:$0xff] }
  0xbe   :  { %2671 = vmatpush1.bf16.msra.mxu0 %v2670_v36  ;;  %2857 = vmatprep.subr.bf16.mxu1 %v2856_v53  ;;  %v679_v36 = vld [vmem:[#allocation7 + $0xcf8] sm:$0xff]  ;;  %v2694_v53 = vpack.c.bf16 %v678_v46, %v672_v39  ;;  %v704_v46 = vld [vmem:[#allocation7 + $0xdc0] sm:$0xff] }
  0xbf   :  { %2673 = vmatprep.subr.bf16.mxu0 %v2672_v42  ;;  %v638_v42 = vld [vmem:[#allocation7 + $0xbb0] sm:$0xff]  ;;  %v2692_v44 = vpack.c.bf16 %v679_v36, %v673_v35  ;;  %v699_v35 = vld [vmem:[#allocation7 + $0xd98] sm:$0xff]  ;;  %v705_v36 = vld [vmem:[#allocation7 + $0xdc8] sm:$0xff] }
  0xc0   :  { %v2874_v52 = vpack.c.bf16 %v644_v43, %v638_v42  ;;  %v732_v42 = vld [vmem:[#allocation7 + $0xea0] sm:$0xff]  ;;  %v2892_v43 = vpack.c.bf16 %v705_v36, %v699_v35  ;;  %v786_v36 = vld [vmem:[#allocation7 + $0x1050] sm:$0xff] }
  0xc1   :  { %2859 = vmatpush1.bf16.msra.mxu1 %v2858_v62  ;;  %v697_v62 = vld [vmem:[#allocation7 + $0xd88] sm:$0xff] }
  0xc2   :  { %2675 = vmatpush1.bf16.msra.mxu0 %v2674_v51  ;;  %2861 = vmatprep.subr.bf16.mxu1 %v2860_v1  ;;  %v691_v51 = vld [vmem:[#allocation7 + $0xd58] sm:$0xff]  ;;  %v2698_v1 = vpack.c.bf16 %v690_v59, %v684_v54  ;;  %v716_v59 = vld [vmem:[#allocation7 + $0xe20] sm:$0xff] }
  0xc3   :  { %2677 = vmatprep.subr.bf16.mxu0 %v2676_v56  ;;  %v650_v56 = vld [vmem:[#allocation7 + $0xc10] sm:$0xff]  ;;  %v2696_v58 = vpack.c.bf16 %v691_v51, %v685_v50  ;;  %v711_v50 = vld [vmem:[#allocation7 + $0xdf8] sm:$0xff]  ;;  %v717_v51 = vld [vmem:[#allocation7 + $0xe28] sm:$0xff] }
  0xc4   :  { %v2878_v0 = vpack.c.bf16 %v656_v57, %v650_v56  ;;  %v744_v56 = vld [vmem:[#allocation7 + $0xf00] sm:$0xff]  ;;  %v2896_v57 = vpack.c.bf16 %v717_v51, %v711_v50  ;;  %v798_v51 = vld [vmem:[#allocation7 + $0x10b0] sm:$0xff] }
  0xc5   :  { %2863 = vmatpush1.bf16.msra.mxu1 %v2862_v10  ;;  %v709_v10 = vld [vmem:[#allocation7 + $0xde8] sm:$0xff] }
  0xc6   :  { %2679 = vmatpush1.bf16.msra.mxu0 %v2678_v63  ;;  %2865 = vmatprep.subr.bf16.mxu1 %v2864_v13  ;;  %v703_v63 = vld [vmem:[#allocation7 + $0xdb8] sm:$0xff]  ;;  %v2702_v13 = vpack.c.bf16 %v702_v7, %v696_v2  ;;  %v728_v7 = vld [vmem:[#allocation7 + $0xe80] sm:$0xff] }
  0xc7   :  { %2681 = vmatprep.subr.bf16.mxu0 %v2680_v4  ;;  %v662_v4 = vld [vmem:[#allocation7 + $0xc70] sm:$0xff]  ;;  %v2700_v6 = vpack.c.bf16 %v703_v63, %v697_v62  ;;  %v723_v62 = vld [vmem:[#allocation7 + $0xe58] sm:$0xff]  ;;  %v729_v63 = vld [vmem:[#allocation7 + $0xe88] sm:$0xff] }
  0xc8   :  { %v2882_v12 = vpack.c.bf16 %v668_v5, %v662_v4  ;;  %v756_v4 = vld [vmem:[#allocation7 + $0xf60] sm:$0xff]  ;;  %v2900_v5 = vpack.c.bf16 %v729_v63, %v723_v62  ;;  %v810_v63 = vld [vmem:[#allocation7 + $0x1110] sm:$0xff] }
  0xc9   :  { %2867 = vmatpush1.bf16.msra.mxu1 %v2866_v23  ;;  %v721_v23 = vld [vmem:[#allocation7 + $0xe48] sm:$0xff] }
  0xca   :  { %2683 = vmatpush1.bf16.msra.mxu0 %v2682_v11  ;;  %2869 = vmatprep.subr.bf16.mxu1 %v2868_v26  ;;  %v715_v11 = vld [vmem:[#allocation7 + $0xe18] sm:$0xff]  ;;  %v2706_v26 = vpack.c.bf16 %v714_v19, %v708_v14  ;;  %v740_v19 = vld [vmem:[#allocation7 + $0xee0] sm:$0xff] }
  0xcb   :  { %2685 = vmatprep.subr.bf16.mxu0 %v2684_v16  ;;  %v674_v16 = vld [vmem:[#allocation7 + $0xcd0] sm:$0xff]  ;;  %v2704_v18 = vpack.c.bf16 %v715_v11, %v709_v10  ;;  %v735_v10 = vld [vmem:[#allocation7 + $0xeb8] sm:$0xff]  ;;  %v741_v11 = vld [vmem:[#allocation7 + $0xee8] sm:$0xff] }
  0xcc   :  { %v2886_v25 = vpack.c.bf16 %v680_v17, %v674_v16  ;;  %v768_v16 = vld [vmem:[#allocation7 + $0xfc0] sm:$0xff]  ;;  %v2904_v17 = vpack.c.bf16 %v741_v11, %v735_v10  ;;  %v822_v11 = vld [vmem:[#allocation7 + $0x1170] sm:$0xff] }
  0xcd   :  { %1009 = vmatmul.mubr.f32.vlgmr.msra.gmra.mrb[0].mxu0 %v3554_v8  ;;  %2871 = vmatpush1.bf16.msra.mxu1 %v2870_v37  ;;  %v733_v37 = vld [vmem:[#allocation7 + $0xea8] sm:$0xff] }
  0xce   :  { %2687 = vmatpush1.bf16.msra.mxu0 %v2686_v24  ;;  %1079 = vmatprep.mubr.f32.mxu0 %v3568_v34  ;;  %v727_v24 = vld [vmem:[#allocation7 + $0xe78] sm:$0xff] }
  0xcf   :  { %2689 = vmatprep.subr.bf16.mxu0 %v2688_v29  ;;  %2873 = vmatprep.subr.bf16.mxu1 %v2872_v41  ;;  %v686_v29 = vld [vmem:[#allocation7 + $0xd30] sm:$0xff]  ;;  %v2708_v32 = vpack.c.bf16 %v727_v24, %v721_v23  ;;  %v2710_v41 = vpack.c.bf16 %v726_v33, %v720_v27  ;;  %v747_v23 = vld [vmem:[#allocation7 + $0xf18] sm:$0xff]  ;;  %v753_v24 = vld [vmem:[#allocation7 + $0xf48] sm:$0xff] }
  0xd0   :  { %v2890_v39 = vpack.c.bf16 %v692_v30, %v686_v29  ;;  %v780_v29 = vld [vmem:[#allocation7 + $0x1020] sm:$0xff]  ;;  %v2908_v30 = vpack.c.bf16 %v753_v24, %v747_v23  ;;  %v834_v24 = vld [vmem:[#allocation7 + $0x11d0] sm:$0xff] }
  0xd1   :  { %2875 = vmatpush1.bf16.msra.mxu1 %v2874_v52  ;;  %v745_v52 = vld [vmem:[#allocation7 + $0xf08] sm:$0xff]  ;;  %v752_v33 = vld [vmem:[#allocation7 + $0xf40] sm:$0xff] }
  0xd2   :  { %2691 = vmatpush1.bf16.msra.mxu0 %v2690_v38  ;;  %2877 = vmatprep.subr.bf16.mxu1 %v2876_v55  ;;  %v739_v38 = vld [vmem:[#allocation7 + $0xed8] sm:$0xff]  ;;  %v2714_v55 = vpack.c.bf16 %v738_v48, %v732_v42  ;;  %v764_v48 = vld [vmem:[#allocation7 + $0xfa0] sm:$0xff] }
  0xd3   :  { %2693 = vmatprep.subr.bf16.mxu0 %v2692_v44  ;;  %v698_v44 = vld [vmem:[#allocation7 + $0xd90] sm:$0xff]  ;;  %v2712_v47 = vpack.c.bf16 %v739_v38, %v733_v37  ;;  %v759_v37 = vld [vmem:[#allocation7 + $0xf78] sm:$0xff]  ;;  %v765_v38 = vld [vmem:[#allocation7 + $0xfa8] sm:$0xff] }
  0xd4   :  { %1222 = vmatmul.mubr.f32.vlgmr.msra.gmra.mrb[0].mxu1 %v3554_v8  ;;  %v2894_v54 = vpack.c.bf16 %v704_v46, %v698_v44  ;;  %v792_v44 = vld [vmem:[#allocation7 + $0x1080] sm:$0xff]  ;;  %v2912_v46 = vpack.c.bf16 %v765_v38, %v759_v37  ;;  %v274_v38 = vld [vmem:[#allocation7 + $0x50] sm:$0xff] }
  0xd5   :  { %2879 = vmatpush1.bf16.msra.mxu1 %v2878_v0  ;;  %1292 = vmatprep.mubr.f32.mxu1 %v3568_v34  ;;  %v757_v0 = vld [vmem:[#allocation7 + $0xf68] sm:$0xff] }
  0xd6   :  { %2695 = vmatpush1.bf16.msra.mxu0 %v2694_v53  ;;  %2881 = vmatprep.subr.bf16.mxu1 %v2880_v3  ;;  %v751_v53 = vld [vmem:[#allocation7 + $0xf38] sm:$0xff]  ;;  %v2718_v3 = vpack.c.bf16 %v750_v61, %v744_v56  ;;  %v776_v61 = vld [vmem:[#allocation7 + $0x1000] sm:$0xff] }
  0xd7   :  { %2697 = vmatprep.subr.bf16.mxu0 %v2696_v58  ;;  %v710_v58 = vld [vmem:[#allocation7 + $0xdf0] sm:$0xff]  ;;  %v2716_v60 = vpack.c.bf16 %v751_v53, %v745_v52  ;;  %v771_v52 = vld [vmem:[#allocation7 + $0xfd8] sm:$0xff]  ;;  %v777_v53 = vld [vmem:[#allocation7 + $0x1008] sm:$0xff] }
  0xd8   :  { %v2898_v2 = vpack.c.bf16 %v716_v59, %v710_v58  ;;  %v804_v58 = vld [vmem:[#allocation7 + $0x10e0] sm:$0xff]  ;;  %v2916_v59 = vpack.c.bf16 %v777_v53, %v771_v52  ;;  %v286_v53 = vld [vmem:[#allocation7 + $0xb0] sm:$0xff] }
  0xd9   :  { %2883 = vmatpush1.bf16.msra.mxu1 %v2882_v12  ;;  %v769_v12 = vld [vmem:[#allocation7 + $0xfc8] sm:$0xff] }
  0xda   :  { %2699 = vmatpush1.bf16.msra.mxu0 %v2698_v1  ;;  %2885 = vmatprep.subr.bf16.mxu1 %v2884_v15  ;;  %v763_v1 = vld [vmem:[#allocation7 + $0xf98] sm:$0xff]  ;;  %v2722_v15 = vpack.c.bf16 %v762_v9, %v756_v4  ;;  %v788_v9 = vld [vmem:[#allocation7 + $0x1060] sm:$0xff] }
  0xdb   :  { %2701 = vmatprep.subr.bf16.mxu0 %v2700_v6  ;;  %v722_v6 = vld [vmem:[#allocation7 + $0xe50] sm:$0xff]  ;;  %v2720_v40 = vpack.c.bf16 %v763_v1, %v757_v0  ;;  %v783_v0 = vld [vmem:[#allocation7 + $0x1038] sm:$0xff]  ;;  %v789_v1 = vld [vmem:[#allocation7 + $0x1068] sm:$0xff] }
  0xdc   :  { %v2902_v14 = vpack.c.bf16 %v728_v7, %v722_v6  ;;  %v816_v6 = vld [vmem:[#allocation7 + $0x1140] sm:$0xff]  ;;  %v2920_v7 = vpack.c.bf16 %v789_v1, %v783_v0  ;;  %v298_v1 = vld [vmem:[#allocation7 + $0x110] sm:$0xff] }
  0xdd   :  { %2887 = vmatpush1.bf16.msra.mxu1 %v2886_v25  ;;  %v781_v25 = vld [vmem:[#allocation7 + $0x1028] sm:$0xff]  ;;  %v292_v0 = vld [vmem:[#allocation7 + $0xe0] sm:$0xff] }
  0xde   :  { %2703 = vmatpush1.bf16.msra.mxu0 %v2702_v13  ;;  %2889 = vmatprep.subr.bf16.mxu1 %v2888_v28  ;;  %v775_v13 = vld [vmem:[#allocation7 + $0xff8] sm:$0xff]  ;;  %v2726_v28 = vpack.c.bf16 %v774_v21, %v768_v16  ;;  %v800_v21 = vld [vmem:[#allocation7 + $0x10c0] sm:$0xff] }
  0xdf   :  { %2705 = vmatprep.subr.bf16.mxu0 %v2704_v18  ;;  %v734_v18 = vld [vmem:[#allocation7 + $0xeb0] sm:$0xff]  ;;  %v2724_v20 = vpack.c.bf16 %v775_v13, %v769_v12  ;;  %v795_v12 = vld [vmem:[#allocation7 + $0x1098] sm:$0xff]  ;;  %v801_v13 = vld [vmem:[#allocation7 + $0x10c8] sm:$0xff] }
  0xe0   :  { %v2906_v27 = vpack.c.bf16 %v740_v19, %v734_v18  ;;  %v828_v18 = vld [vmem:[#allocation7 + $0x11a0] sm:$0xff]  ;;  %v2924_v19 = vpack.c.bf16 %v801_v13, %v795_v12 }
  0xe1   :  { %2891 = vmatpush1.bf16.msra.mxu1 %v2890_v39  ;;  %v793_v39 = vld [vmem:[#allocation7 + $0x1088] sm:$0xff]  ;;  %v316_v13 = vld [vmem:[#allocation7 + $0x1a0] sm:$0xff] }
  0xe2   :  { %2707 = vmatpush1.bf16.msra.mxu0 %v2706_v26  ;;  %2893 = vmatprep.subr.bf16.mxu1 %v2892_v43  ;;  %v787_v26 = vld [vmem:[#allocation7 + $0x1058] sm:$0xff]  ;;  %v2730_v43 = vpack.c.bf16 %v786_v36, %v780_v29  ;;  %v812_v36 = vld [vmem:[#allocation7 + $0x1120] sm:$0xff] }
  0xe3   :  { %2709 = vmatprep.subr.bf16.mxu0 %v2708_v32  ;;  %v746_v32 = vld [vmem:[#allocation7 + $0xf10] sm:$0xff]  ;;  %v2728_v35 = vpack.c.bf16 %v787_v26, %v781_v25  ;;  %v807_v25 = vld [vmem:[#allocation7 + $0x10f8] sm:$0xff]  ;;  %v813_v26 = vld [vmem:[#allocation7 + $0x1128] sm:$0xff] }
  0xe4   :  { %v2910_v42 = vpack.c.bf16 %v752_v33, %v746_v32  ;;  %v268_v32 = vld [vmem:[#allocation7 + $0x20] sm:$0xff]  ;;  %v2928_v33 = vpack.c.bf16 %v813_v26, %v807_v25  ;;  %v346_v26 = vld [vmem:[#allocation7 + $0x290] sm:$0xff] }
  0xe5   :  { %2895 = vmatpush1.bf16.msra.mxu1 %v2894_v54  ;;  %v805_v54 = vld [vmem:[#allocation7 + $0x10e8] sm:$0xff]  ;;  %v340_v25 = vld [vmem:[#allocation7 + $0x260] sm:$0xff] }
  0xe6   :  { %2711 = vmatpush1.bf16.msra.mxu0 %v2710_v41  ;;  %2897 = vmatprep.subr.bf16.mxu1 %v2896_v57  ;;  %v799_v41 = vld [vmem:[#allocation7 + $0x10b8] sm:$0xff]  ;;  %v2734_v57 = vpack.c.bf16 %v798_v51, %v792_v44  ;;  %v824_v51 = vld [vmem:[#allocation7 + $0x1180] sm:$0xff] }
  0xe7   :  { %2713 = vmatprep.subr.bf16.mxu0 %v2712_v47  ;;  %v758_v47 = vld [vmem:[#allocation7 + $0xf70] sm:$0xff]  ;;  %v2732_v50 = vpack.c.bf16 %v799_v41, %v793_v39  ;;  %v819_v39 = vld [vmem:[#allocation7 + $0x1158] sm:$0xff]  ;;  %v825_v41 = vld [vmem:[#allocation7 + $0x1188] sm:$0xff] }
  0xe8   :  { %v2914_v56 = vpack.c.bf16 %v764_v48, %v758_v47  ;;  %v280_v47 = vld [vmem:[#allocation7 + $0x80] sm:$0xff]  ;;  %v2932_v48 = vpack.c.bf16 %v825_v41, %v819_v39  ;;  %v370_v39 = vld [vmem:[#allocation7 + $0x350] sm:$0xff]  ;;  %v377_v41 = vld [vmem:[#allocation7 + $0x388] sm:$0xff] }
  0xe9   :  { %2899 = vmatpush1.bf16.msra.mxu1 %v2898_v2  ;;  %v817_v2 = vld [vmem:[#allocation7 + $0x1148] sm:$0xff] }
  0xea   :  { %2715 = vmatpush1.bf16.msra.mxu0 %v2714_v55  ;;  %2901 = vmatprep.subr.bf16.mxu1 %v2900_v5  ;;  %v811_v55 = vld [vmem:[#allocation7 + $0x1118] sm:$0xff]  ;;  %v2738_v5 = vpack.c.bf16 %v810_v63, %v804_v58 }
  0xeb   :  { %2717 = vmatprep.subr.bf16.mxu0 %v2716_v60  ;;  %v770_v60 = vld [vmem:[#allocation7 + $0xfd0] sm:$0xff]  ;;  %v2736_v62 = vpack.c.bf16 %v811_v55, %v805_v54  ;;  %v831_v54 = vld [vmem:[#allocation7 + $0x11b8] sm:$0xff]  ;;  %v837_v55 = vld [vmem:[#allocation7 + $0x11e8] sm:$0xff] }
  0xec   :  { %v2918_v4 = vpack.c.bf16 %v776_v61, %v770_v60  ;;  %v2936_v60 = vpack.c.bf16 %v837_v55, %v831_v54  ;;  %v830_v61 = vld [vmem:[#allocation7 + $0x11b0] sm:$0xff]  ;;  %v401_v55 = vld [vmem:[#allocation7 + $0x448] sm:$0xff] }
  0xed   :  { %2903 = vmatpush1.bf16.msra.mxu1 %v2902_v14  ;;  %v829_v14 = vld [vmem:[#allocation7 + $0x11a8] sm:$0xff]  ;;  %v394_v54 = vld [vmem:[#allocation7 + $0x410] sm:$0xff] }
  0xee   :  { %2719 = vmatpush1.bf16.msra.mxu0 %v2718_v3  ;;  %2905 = vmatprep.subr.bf16.mxu1 %v2904_v17  ;;  %v823_v3 = vld [vmem:[#allocation7 + $0x1178] sm:$0xff]  ;;  %v2742_v17 = vpack.c.bf16 %v822_v11, %v816_v6 }
  0xef   :  { %2721 = vmatprep.subr.bf16.mxu0 %v2720_v40  ;;  %v782_v40 = vld [vmem:[#allocation7 + $0x1030] sm:$0xff]  ;;  %v2740_v10 = vpack.c.bf16 %v823_v3, %v817_v2  ;;  %v305_v2 = vld [vmem:[#allocation7 + $0x148] sm:$0xff]  ;;  %v311_v3 = vld [vmem:[#allocation7 + $0x178] sm:$0xff] }
  0xf0   :  { %v2922_v16 = vpack.c.bf16 %v788_v9, %v782_v40  ;;  %v2952_v6 = vpack.c.bf16 %v311_v3, %v305_v2  ;;  %v310_v40 = vld [vmem:[#allocation7 + $0x170] sm:$0xff]  ;;  %v317_v9 = vld [vmem:[#allocation7 + $0x1a8] sm:$0xff] }
  0xf1   :  { %2907 = vmatpush1.bf16.msra.mxu1 %v2906_v27  ;;  %v269_v27 = vld [vmem:[#allocation7 + $0x28] sm:$0xff]  ;;  %v418_v2 = vld [vmem:[#allocation7 + $0x4d0] sm:$0xff] }
  0xf2   :  { %2723 = vmatpush1.bf16.msra.mxu0 %v2722_v15  ;;  %2909 = vmatprep.subr.bf16.mxu1 %v2908_v30  ;;  %v835_v15 = vld [vmem:[#allocation7 + $0x11d8] sm:$0xff]  ;;  %v2746_v30 = vpack.c.bf16 %v834_v24, %v828_v18  ;;  %v328_v18 = vld [vmem:[#allocation7 + $0x200] sm:$0xff]  ;;  %v425_v3 = vld [vmem:[#allocation7 + $0x508] sm:$0xff] }
  0xf3   :  { %2725 = vmatprep.subr.bf16.mxu0 %v2724_v20  ;;  %v794_v20 = vld [vmem:[#allocation7 + $0x1090] sm:$0xff]  ;;  %v2744_v23 = vpack.c.bf16 %v835_v15, %v829_v14  ;;  %v329_v14 = vld [vmem:[#allocation7 + $0x208] sm:$0xff]  ;;  %v335_v15 = vld [vmem:[#allocation7 + $0x238] sm:$0xff] }
  0xf4   :  { %v2926_v29 = vpack.c.bf16 %v800_v21, %v794_v20  ;;  %v341_v20 = vld [vmem:[#allocation7 + $0x268] sm:$0xff]  ;;  %v347_v21 = vld [vmem:[#allocation7 + $0x298] sm:$0xff] }
  0xf5   :  { %2911 = vmatpush1.bf16.msra.mxu1 %v2910_v42  ;;  %v281_v42 = vld [vmem:[#allocation7 + $0x88] sm:$0xff]  ;;  %v2964_v24 = vpack.c.bf16 %v347_v21, %v341_v20  ;;  %v1518_v20 = vld [vmem:[%s4036_s3] sm:$0xff] }
  0xf6   :  { %2727 = vmatpush1.bf16.msra.mxu0 %v2726_v28  ;;  %2913 = vmatprep.subr.bf16.mxu1 %v2912_v46  ;;  %v275_v28 = vld [vmem:[#allocation7 + $0x58] sm:$0xff]  ;;  %v2942_v46 = vpack.c.bf16 %v274_v38, %v268_v32  ;;  %v358_v32 = vld [vmem:[#allocation7 + $0x2f0] sm:$0xff]  ;;  %v364_v38 = vld [vmem:[#allocation7 + $0x320] sm:$0xff] }
  0xf7   :  { %2729 = vmatprep.subr.bf16.mxu0 %v2728_v35  ;;  %v806_v35 = vld [vmem:[#allocation7 + $0x10f0] sm:$0xff]  ;;  %v2940_v37 = vpack.c.bf16 %v275_v28, %v269_v27  ;;  %v353_v27 = vld [vmem:[#allocation7 + $0x2c8] sm:$0xff]  ;;  %v359_v28 = vld [vmem:[#allocation7 + $0x2f8] sm:$0xff] }
  0xf8   :  { %v2930_v44 = vpack.c.bf16 %v812_v36, %v806_v35  ;;  %v371_v35 = vld [vmem:[#allocation7 + $0x358] sm:$0xff] }
  0xf9   :  { %2915 = vmatpush1.bf16.msra.mxu1 %v2914_v56  ;;  %v293_v56 = vld [vmem:[#allocation7 + $0xe8] sm:$0xff] }
  0xfa   :  { %2731 = vmatpush1.bf16.msra.mxu0 %v2730_v43  ;;  %2917 = vmatprep.subr.bf16.mxu1 %v2916_v59  ;;  %v287_v43 = vld [vmem:[#allocation7 + $0xb8] sm:$0xff]  ;;  %v2946_v59 = vpack.c.bf16 %v286_v53, %v280_v47  ;;  %v382_v47 = vld [vmem:[#allocation7 + $0x3b0] sm:$0xff]  ;;  %v388_v53 = vld [vmem:[#allocation7 + $0x3e0] sm:$0xff] }
  0xfb   :  { %2733 = vmatprep.subr.bf16.mxu0 %v2732_v50  ;;  %v818_v50 = vld [vmem:[#allocation7 + $0x1150] sm:$0xff]  ;;  %v2944_v52 = vpack.c.bf16 %v287_v43, %v281_v42  ;;  %v383_v42 = vld [vmem:[#allocation7 + $0x3b8] sm:$0xff]  ;;  %v2974_v43 = vpack.c.bf16 %v370_v39, %v364_v38  ;;  %v473_v39 = vld [vmem:[#allocation7 + $0x688] sm:$0xff] }
  0xfc   :  { %v2934_v58 = vpack.c.bf16 %v824_v51, %v818_v50  ;;  %v395_v50 = vld [vmem:[#allocation7 + $0x418] sm:$0xff]  ;;  %v1521_v38 = vld [vmem:[%s4036_s3 + $0x18] sm:$0xff] }
  0xfd   :  { %2919 = vmatpush1.bf16.msra.mxu1 %v2918_v4 }
  0xfe   :  { %2735 = vmatpush1.bf16.msra.mxu0 %v2734_v57  ;;  %2921 = vmatprep.subr.bf16.mxu1 %v2920_v7  ;;  %v299_v57 = vld [vmem:[#allocation7 + $0x118] sm:$0xff]  ;;  %v304_v7 = vld [vmem:[#allocation7 + $0x140] sm:$0xff] }
  0xff   :  { %2737 = vmatprep.subr.bf16.mxu0 %v2736_v62  ;;  %v836_v62 = vld [vmem:[#allocation7 + $0x11e0] sm:$0xff]  ;;  %v2948_v63 = vpack.c.bf16 %v299_v57, %v293_v56  ;;  %v2954_v11 = vpack.c.bf16 %v310_v40, %v304_v7  ;;  %v407_v56 = vld [vmem:[#allocation7 + $0x478] sm:$0xff]  ;;  %v2982_v57 = vpack.c.bf16 %v394_v54, %v388_v53  ;;  %v430_v40 = vld [vmem:[#allocation7 + $0x530] sm:$0xff] }
 0x100   :  { %v2938_v4 = vpack.c.bf16 %v836_v62, %v830_v61  ;;  %v413_v61 = vld [vmem:[#allocation7 + $0x4a8] sm:$0xff]  ;;  %v419_v62 = vld [vmem:[#allocation7 + $0x4d8] sm:$0xff]  ;;  %v424_v7 = vld [vmem:[#allocation7 + $0x500] sm:$0xff] }
 0x101   :  { %2923 = vmatpush1.bf16.msra.mxu1 %v2922_v16  ;;  %v478_v53 = vld [vmem:[#allocation7 + $0x6b0] sm:$0xff] }
 0x102   :  { %2739 = vmatpush1.bf16.msra.mxu0 %v2738_v5  ;;  %2925 = vmatprep.subr.bf16.mxu1 %v2924_v19  ;;  %v2950_v5 = vpack.c.bf16 %v298_v1, %v292_v0  ;;  %v334_v19 = vld [vmem:[#allocation7 + $0x230] sm:$0xff]  ;;  %v2988_v0 = vpack.c.bf16 %v419_v62, %v413_v61  ;;  %v412_v1 = vld [vmem:[#allocation7 + $0x4a0] sm:$0xff] }
 0x103   :  { %2741 = vmatprep.subr.bf16.mxu0 %v2740_v10  ;;  %v323_v10 = vld [vmem:[#allocation7 + $0x1d8] sm:$0xff] }
 0x104   :  { %v2956_v12 = vpack.c.bf16 %v323_v10, %v317_v9  ;;  %v437_v9 = vld [vmem:[#allocation7 + $0x568] sm:$0xff]  ;;  %v443_v10 = vld [vmem:[#allocation7 + $0x598] sm:$0xff] }
 0x105   :  { %2927 = vmatpush1.bf16.msra.mxu1 %v2926_v29  ;;  %v2966_v29 = vpack.c.bf16 %v346_v26, %v340_v25  ;;  %v1519_v25 = vld [vmem:[%s4036_s3 + $0x8] sm:$0xff]  ;;  %v461_v26 = vld [vmem:[#allocation7 + $0x628] sm:$0xff]  ;;  %v1542_v62 = vld [vmem:[%s4036_s3 + $0xc0] sm:$0xff] }
 0x106   :  { %2743 = vmatpush1.bf16.msra.mxu0 %v2742_v17  ;;  %2929 = vmatprep.subr.bf16.mxu1 %v2928_v33  ;;  %v2960_v17 = vpack.c.bf16 %v335_v15, %v329_v14  ;;  %v365_v33 = vld [vmem:[#allocation7 + $0x328] sm:$0xff]  ;;  %v455_v15 = vld [vmem:[#allocation7 + $0x5f8] sm:$0xff] }
 0x107   :  { %2745 = vmatprep.subr.bf16.mxu0 %v2744_v23  ;;  %v2962_v23 = vpack.c.bf16 %v334_v19, %v328_v18  ;;  %v449_v14 = vld [vmem:[#allocation7 + $0x5c8] sm:$0xff] }
 0x108   :  { %v3000_v21 = vpack.c.bf16 %v455_v15, %v449_v14  ;;  %v515_v15 = vld [vmem:[#allocation7 + $0x7d8] sm:$0xff] }
 0x109   :  { %2931 = vmatpush1.bf16.msra.mxu1 %v2930_v44  ;;  %v2976_v44 = vpack.c.bf16 %v383_v42, %v377_v41  ;;  %v479_v41 = vld [vmem:[#allocation7 + $0x6b8] sm:$0xff] }
 0x10a   :  { %2747 = vmatpush1.bf16.msra.mxu0 %v2746_v30  ;;  %2933 = vmatprep.subr.bf16.mxu1 %v2932_v48  ;;  %v352_v30 = vld [vmem:[#allocation7 + $0x2c0] sm:$0xff]  ;;  %v389_v48 = vld [vmem:[#allocation7 + $0x3e8] sm:$0xff] }
 0x10b   :  { %2941 = vmatprep.subr.bf16.mxu0 %v2940_v37  ;;  %v2970_v36 = vpack.c.bf16 %v358_v32, %v352_v30  ;;  %v2972_v37 = vpack.c.bf16 %v371_v35, %v365_v33  ;;  %v1520_v33 = vld [vmem:[%s4036_s3 + $0x10] sm:$0xff] }
 0x10c   :  { %v3138_v42 = vpack.c.bf16 %v1521_v38, %v1520_v33  ;;  %v533_v38 = vld [vmem:[#allocation7 + $0x868] sm:$0xff] }
 0x10d   :  { %1080 = vmatmul.mubr.f32.vlgmr.msra.gmra.mrb[0].mxu0 %v3564_v22  ;;  %2935 = vmatpush1.bf16.msra.mxu1 %v2934_v58  ;;  %v2984_v58 = vpack.c.bf16 %v407_v56, %v401_v55  ;;  %v485_v55 = vld [vmem:[#allocation7 + $0x6e8] sm:$0xff]  ;;  %v491_v56 = vld [vmem:[#allocation7 + $0x718] sm:$0xff] }
 0x10e   :  { %2943 = vmatpush1.bf16.msra.mxu0 %v2942_v46  ;;  %1363 = vmatprep.mubr.f32.mxu0 %v3547_v49  ;;  %v322_v49 = vld [vmem:[#allocation7 + $0x1d0] sm:$0xff]  ;;  %v376_v46 = vld [vmem:[#allocation7 + $0x380] sm:$0xff] }
 0x10f   :  { %2945 = vmatprep.subr.bf16.mxu0 %v2944_v52  ;;  %2937 = vmatprep.subr.bf16.mxu1 %v2936_v60  ;;  %v2958_v16 = vpack.c.bf16 %v322_v49, %v316_v13  ;;  %v2978_v51 = vpack.c.bf16 %v382_v47, %v376_v46  ;;  %v2980_v52 = vpack.c.bf16 %v395_v50, %v389_v48  ;;  %v406_v60 = vld [vmem:[#allocation7 + $0x470] sm:$0xff]  ;;  %v436_v13 = vld [vmem:[#allocation7 + $0x560] sm:$0xff] }
 0x110   :  { %v442_v49 = vld [vmem:[#allocation7 + $0x590] sm:$0xff]  ;;  %v1523_v50 = vld [vmem:[%s4036_s3 + $0x28] sm:$0xff] }
 0x111   :  { %2939 = vmatpush1.bf16.msra.mxu1 %v2938_v4  ;;  %v431_v4 = vld [vmem:[#allocation7 + $0x538] sm:$0xff]  ;;  %v2998_v18 = vpack.c.bf16 %v442_v49, %v436_v13  ;;  %v502_v13 = vld [vmem:[#allocation7 + $0x770] sm:$0xff]  ;;  %v509_v49 = vld [vmem:[#allocation7 + $0x7a8] sm:$0xff] }
 0x112   :  { %2947 = vmatpush1.bf16.msra.mxu0 %v2946_v59  ;;  %v400_v59 = vld [vmem:[#allocation7 + $0x440] sm:$0xff]  ;;  %v1522_v48 = vld [vmem:[%s4036_s3 + $0x20] sm:$0xff] }
 0x113   :  { %2949 = vmatprep.subr.bf16.mxu0 %v2948_v63  ;;  %v2986_v63 = vpack.c.bf16 %v406_v60, %v400_v59  ;;  %v3142_v54 = vpack.c.bf16 %v1523_v50, %v1522_v48  ;;  %v1524_v59 = vld [vmem:[%s4036_s3 + $0x30] sm:$0xff] }
 0x114   :  { %1293 = vmatmul.mubr.f32.vlgmr.msra.gmra.mrb[0].mxu1 %v3564_v22  ;;  %v2968_v22 = vpack.c.bf16 %v359_v28, %v353_v27  ;;  %v467_v27 = vld [vmem:[#allocation7 + $0x658] sm:$0xff]  ;;  %v3134_v28 = vpack.c.bf16 %v1519_v25, %v1518_v20  ;;  %v514_v25 = vld [vmem:[#allocation7 + $0x7d0] sm:$0xff]  ;;  %v532_v50 = vld [vmem:[#allocation7 + $0x860] sm:$0xff] }
 0x115   :  { %v3004_v35 = vpack.c.bf16 %v467_v27, %v461_v26  ;;  %v1547_v20 = vld [vmem:[%s4036_s3 + $0xe8] sm:$0xff]  ;;  %v521_v26 = vld [vmem:[#allocation7 + $0x808] sm:$0xff] }
 0x116   :  { %2951 = vmatpush1.bf16.msra.mxu0 %v2950_v5  ;;  %v2990_v5 = vpack.c.bf16 %v418_v2, %v412_v1  ;;  %v484_v1 = vld [vmem:[#allocation7 + $0x6e0] sm:$0xff]  ;;  %v490_v2 = vld [vmem:[#allocation7 + $0x710] sm:$0xff] }
 0x117   :  { %2953 = vmatprep.subr.bf16.mxu0 %v2952_v6  ;;  %v2992_v6 = vpack.c.bf16 %v431_v4, %v425_v3  ;;  %v497_v3 = vld [vmem:[#allocation7 + $0x748] sm:$0xff]  ;;  %v503_v4 = vld [vmem:[#allocation7 + $0x778] sm:$0xff] }
 0x11a   :  { %2955 = vmatpush1.bf16.msra.mxu0 %v2954_v11  ;;  %v2994_v11 = vpack.c.bf16 %v430_v40, %v424_v7  ;;  %v1527_v7 = vld [vmem:[%s4036_s3 + $0x48] sm:$0xff]  ;;  %v1544_v40 = vld [vmem:[%s4036_s3 + $0xd0] sm:$0xff] }
 0x11b   :  { %2957 = vmatprep.subr.bf16.mxu0 %v2956_v12  ;;  %v2996_v12 = vpack.c.bf16 %v443_v10, %v437_v9  ;;  %v1545_v9 = vld [vmem:[%s4036_s3 + $0xd8] sm:$0xff]  ;;  %v3014_v10 = vpack.c.bf16 %v490_v2, %v484_v1  ;;  %v556_v1 = vld [vmem:[#allocation7 + $0x920] sm:$0xff] }
 0x11c   :  { %v562_v2 = vld [vmem:[#allocation7 + $0x950] sm:$0xff] }
 0x11e   :  { %2959 = vmatpush1.bf16.msra.mxu0 %v2958_v16  ;;  %v1534_v16 = vld [vmem:[%s4036_s3 + $0x80] sm:$0xff] }
 0x11f   :  { %2961 = vmatprep.subr.bf16.mxu0 %v2960_v17  ;;  %v1535_v17 = vld [vmem:[%s4036_s3 + $0x88] sm:$0xff] }
 0x120   :  { %v3132_v19 = vpack.c.bf16 %v1535_v17, %v1534_v16  ;;  %v3152_v16 = vpack.c.bf16 %v1545_v9, %v1544_v40  ;;  %v1528_v17 = vld [vmem:[%s4036_s3 + $0x50] sm:$0xff]  ;;  %v587_v9 = vld [vmem:[#allocation7 + $0xa18] sm:$0xff] }
 0x121   :  { %v581_v40 = vld [vmem:[#allocation7 + $0x9e8] sm:$0xff] }
 0x122   :  { %2963 = vmatpush1.bf16.msra.mxu0 %v2962_v23  ;;  %v448_v23 = vld [vmem:[#allocation7 + $0x5c0] sm:$0xff]  ;;  %3133 = vmatprep.subr.bf16.mxu1 %v3132_v19  ;;  %v1546_v19 = vld [vmem:[%s4036_s3 + $0xe0] sm:$0xff] }
 0x123   :  { %2965 = vmatprep.subr.bf16.mxu0 %v2964_v24  ;;  %v454_v24 = vld [vmem:[#allocation7 + $0x5f0] sm:$0xff]  ;;  %3135 = vmatpush3.bf16.msra.mxu1 %v3134_v28  ;;  %v527_v28 = vld [vmem:[#allocation7 + $0x838] sm:$0xff] }
 0x124   :  { %v3002_v30 = vpack.c.bf16 %v454_v24, %v448_v23  ;;  %v3020_v23 = vpack.c.bf16 %v515_v15, %v509_v49  ;;  %v508_v24 = vld [vmem:[#allocation7 + $0x7a0] sm:$0xff]  ;;  %v3024_v33 = vpack.c.bf16 %v527_v28, %v521_v26  ;;  %v593_v49 = vld [vmem:[#allocation7 + $0xa48] sm:$0xff] }
 0x125   :  { %v617_v26 = vld [vmem:[#allocation7 + $0xb08] sm:$0xff] }
 0x126   :  { %2967 = vmatpush1.bf16.msra.mxu0 %v2966_v29  ;;  %v1536_v29 = vld [vmem:[%s4036_s3 + $0x90] sm:$0xff] }
 0x127   :  { %2969 = vmatprep.subr.bf16.mxu0 %v2968_v22  ;;  %v1537_v22 = vld [vmem:[%s4036_s3 + $0x98] sm:$0xff] }
 0x128   :  { %v3136_v32 = vpack.c.bf16 %v1537_v22, %v1536_v29  ;;  %v3156_v29 = vpack.c.bf16 %v1547_v20, %v1546_v19  ;;  %v1530_v22 = vld [vmem:[%s4036_s3 + $0x60] sm:$0xff]  ;;  %v605_v19 = vld [vmem:[#allocation7 + $0xaa8] sm:$0xff] }
 0x129   :  { %v611_v20 = vld [vmem:[#allocation7 + $0xad8] sm:$0xff] }
 0x12a   :  { %2971 = vmatpush1.bf16.msra.mxu0 %v2970_v36  ;;  %v460_v36 = vld [vmem:[#allocation7 + $0x620] sm:$0xff]  ;;  %3137 = vmatprep.subr.bf16.mxu1 %v3136_v32  ;;  %v3022_v32 = vpack.c.bf16 %v514_v25, %v508_v24  ;;  %v610_v25 = vld [vmem:[#allocation7 + $0xad0] sm:$0xff] }
 0x12b   :  { %2973 = vmatprep.subr.bf16.mxu0 %v2972_v37  ;;  %v466_v37 = vld [vmem:[#allocation7 + $0x650] sm:$0xff]  ;;  %3139 = vmatpush3.bf16.msra.mxu1 %v3138_v42  ;;  %v604_v24 = vld [vmem:[#allocation7 + $0xaa0] sm:$0xff] }
 0x12c   :  { %v3006_v46 = vpack.c.bf16 %v466_v37, %v460_v36  ;;  %v526_v36 = vld [vmem:[#allocation7 + $0x830] sm:$0xff]  ;;  %v3054_v28 = vpack.c.bf16 %v610_v25, %v604_v24 }
 0x12d   :  { %v1549_v42 = vld [vmem:[%s4036_s3 + $0xf8] sm:$0xff] }
 0x12e   :  { %2975 = vmatpush1.bf16.msra.mxu0 %v2974_v43  ;;  %v1538_v43 = vld [vmem:[%s4036_s3 + $0xa0] sm:$0xff] }
 0x12f   :  { %2977 = vmatprep.subr.bf16.mxu0 %v2976_v44  ;;  %v1539_v44 = vld [vmem:[%s4036_s3 + $0xa8] sm:$0xff] }
 0x130   :  { %v3140_v47 = vpack.c.bf16 %v1539_v44, %v1538_v43 }
 0x132   :  { %2979 = vmatpush1.bf16.msra.mxu0 %v2978_v51  ;;  %v3008_v51 = vpack.c.bf16 %v479_v41, %v473_v39  ;;  %3141 = vmatprep.subr.bf16.mxu1 %v3140_v47  ;;  %v539_v39 = vld [vmem:[#allocation7 + $0x898] sm:$0xff]  ;;  %v1548_v41 = vld [vmem:[%s4036_s3 + $0xf0] sm:$0xff]  ;;  %v1533_v47 = vld [vmem:[%s4036_s3 + $0x78] sm:$0xff] }
 0x133   :  { %2981 = vmatprep.subr.bf16.mxu0 %v2980_v52  ;;  %v472_v52 = vld [vmem:[#allocation7 + $0x680] sm:$0xff]  ;;  %3143 = vmatpush3.bf16.msra.mxu1 %v3142_v54  ;;  %v3160_v44 = vpack.c.bf16 %v1549_v42, %v1548_v41  ;;  %v3028_v48 = vpack.c.bf16 %v539_v39, %v533_v38  ;;  %v551_v54 = vld [vmem:[#allocation7 + $0x8f8] sm:$0xff]  ;;  %v634_v38 = vld [vmem:[#allocation7 + $0xb90] sm:$0xff] }
 0x134   :  { %v3010_v60 = vpack.c.bf16 %v478_v53, %v472_v52  ;;  %v545_v53 = vld [vmem:[#allocation7 + $0x8c8] sm:$0xff]  ;;  %v647_v41 = vld [vmem:[#allocation7 + $0xbf8] sm:$0xff] }
 0x135   :  { %v641_v39 = vld [vmem:[#allocation7 + $0xbc8] sm:$0xff] }
 0x136   :  { %2983 = vmatpush1.bf16.msra.mxu0 %v2982_v57  ;;  %v1540_v57 = vld [vmem:[%s4036_s3 + $0xb0] sm:$0xff] }
 0x137   :  { %2985 = vmatprep.subr.bf16.mxu0 %v2984_v58  ;;  %v1541_v58 = vld [vmem:[%s4036_s3 + $0xb8] sm:$0xff] }
 0x138   :  { %v3144_v61 = vpack.c.bf16 %v1541_v58, %v1540_v57 }
 0x13a   :  { %2987 = vmatpush1.bf16.msra.mxu0 %v2986_v63  ;;  %v1543_v63 = vld [vmem:[%s4036_s3 + $0xc8] sm:$0xff]  ;;  %3145 = vmatprep.subr.bf16.mxu1 %v3144_v61  ;;  %v550_v61 = vld [vmem:[#allocation7 + $0x8f0] sm:$0xff] }
 0x13b   :  { %2989 = vmatprep.subr.bf16.mxu0 %v2988_v0  ;;  %v3012_v0 = vpack.c.bf16 %v491_v56, %v485_v55  ;;  %v1566_v55 = vld [vmem:[%s4036_s3 + $0x180] sm:$0xff]  ;;  %v1567_v56 = vld [vmem:[%s4036_s3 + $0x188] sm:$0xff] }
 0x13c   :  { %v3164_v58 = vpack.c.bf16 %v1567_v56, %v1566_v55  ;;  %v671_v55 = vld [vmem:[#allocation7 + $0xcb8] sm:$0xff] }
 0x13e   :  { %2991 = vmatpush1.bf16.msra.mxu0 %v2990_v5  ;;  %v3148_v5 = vpack.c.bf16 %v1543_v63, %v1542_v62  ;;  %v563_v62 = vld [vmem:[#allocation7 + $0x958] sm:$0xff] }
 0x13f   :  { %2993 = vmatprep.subr.bf16.mxu0 %v2992_v6  ;;  %v1526_v6 = vld [vmem:[%s4036_s3 + $0x40] sm:$0xff] }
 0x140   :  { %v3150_v14 = vpack.c.bf16 %v1527_v7, %v1526_v6  ;;  %v568_v6 = vld [vmem:[#allocation7 + $0x980] sm:$0xff]  ;;  %v574_v7 = vld [vmem:[#allocation7 + $0x9b0] sm:$0xff] }
 0x142   :  { %2995 = vmatpush1.bf16.msra.mxu0 %v2994_v11  ;;  %v3016_v11 = vpack.c.bf16 %v503_v4, %v497_v3  ;;  %v569_v3 = vld [vmem:[#allocation7 + $0x988] sm:$0xff]  ;;  %v3038_v4 = vpack.c.bf16 %v562_v2, %v556_v1  ;;  %v695_v2 = vld [vmem:[#allocation7 + $0xd78] sm:$0xff] }
 0x143   :  { %2997 = vmatprep.subr.bf16.mxu0 %v2996_v12  ;;  %v496_v12 = vld [vmem:[#allocation7 + $0x740] sm:$0xff]  ;;  %v689_v1 = vld [vmem:[#allocation7 + $0xd48] sm:$0xff] }
 0x146   :  { %2999 = vmatpush1.bf16.msra.mxu0 %v2998_v18  ;;  %v1529_v18 = vld [vmem:[%s4036_s3 + $0x58] sm:$0xff] }
 0x147   :  { %3001 = vmatprep.subr.bf16.mxu0 %v3000_v21  ;;  %v3018_v21 = vpack.c.bf16 %v502_v13, %v496_v12  ;;  %v3154_v27 = vpack.c.bf16 %v1529_v18, %v1528_v17  ;;  %v580_v12 = vld [vmem:[#allocation7 + $0x9e0] sm:$0xff]  ;;  %v586_v13 = vld [vmem:[#allocation7 + $0xa10] sm:$0xff] }
 0x148   :  { %v3046_v15 = vpack.c.bf16 %v586_v13, %v580_v12  ;;  %v592_v17 = vld [vmem:[#allocation7 + $0xa40] sm:$0xff]  ;;  %v598_v18 = vld [vmem:[#allocation7 + $0xa70] sm:$0xff] }
 0x14a   :  { %3003 = vmatpush1.bf16.msra.mxu0 %v3002_v30  ;;  %v1531_v30 = vld [vmem:[%s4036_s3 + $0x68] sm:$0xff] }
 0x14b   :  { %3005 = vmatprep.subr.bf16.mxu0 %v3004_v35  ;;  %v520_v35 = vld [vmem:[#allocation7 + $0x800] sm:$0xff]  ;;  %v3158_v37 = vpack.c.bf16 %v1531_v30, %v1530_v22  ;;  %v622_v30 = vld [vmem:[#allocation7 + $0xb30] sm:$0xff] }
 0x14c   :  { %v3026_v43 = vpack.c.bf16 %v526_v36, %v520_v35  ;;  %v616_v22 = vld [vmem:[#allocation7 + $0xb00] sm:$0xff] }
 0x14d   :  { %1364 = vmatmul.mubr.f32.vlgmr.msra.gmra.mrb[2].mxu0 %v3543_v45  ;;  %v1525_v45 = vld [vmem:[%s4036_s3 + $0x38] sm:$0xff]  ;;  %v3058_v35 = vpack.c.bf16 %v622_v30, %v616_v22 }
 0x14e   :  { %3007 = vmatpush1.bf16.msra.mxu0 %v3006_v46  ;;  %1434 = vmatprep.mubr.f32.mxu0 %v3558_v31  ;;  %v3146_v31 = vpack.c.bf16 %v1525_v45, %v1524_v59  ;;  %v1532_v46 = vld [vmem:[%s4036_s3 + $0x70] sm:$0xff]  ;;  %v3032_v59 = vpack.c.bf16 %v551_v54, %v545_v53  ;;  %v658_v53 = vld [vmem:[#allocation7 + $0xc50] sm:$0xff] }
 0x14f   :  { %3009 = vmatprep.subr.bf16.mxu0 %v3008_v51  ;;  %v538_v51 = vld [vmem:[#allocation7 + $0x890] sm:$0xff]  ;;  %v3162_v52 = vpack.c.bf16 %v1533_v47, %v1532_v46  ;;  %v557_v45 = vld [vmem:[#allocation7 + $0x928] sm:$0xff] }
 0x150   :  { %3147 = vmatpush3.bf16.msra.mxu1 %v3146_v31  ;;  %v3030_v57 = vpack.c.bf16 %v538_v51, %v532_v50  ;;  %v575_v31 = vld [vmem:[#allocation7 + $0x9b8] sm:$0xff]  ;;  %v646_v46 = vld [vmem:[#allocation7 + $0xbf0] sm:$0xff]  ;;  %v653_v47 = vld [vmem:[#allocation7 + $0xc28] sm:$0xff] }
 0x151   :  { %3149 = vmatprep.subr.bf16.mxu1 %v3148_v5  ;;  %v3040_v5 = vpack.c.bf16 %v575_v31, %v569_v3  ;;  %v665_v54 = vld [vmem:[#allocation7 + $0xc88] sm:$0xff]  ;;  %v3080_v31 = vpack.c.bf16 %v695_v2, %v689_v1  ;;  %v808_v1 = vld [vmem:[#allocation7 + $0x1100] sm:$0xff]  ;;  %v814_v2 = vld [vmem:[#allocation7 + $0x1130] sm:$0xff] }
 0x152   :  { %3011 = vmatpush1.bf16.msra.mxu0 %v3010_v60  ;;  %v544_v60 = vld [vmem:[#allocation7 + $0x8c0] sm:$0xff] }
 0x153   :  { %3013 = vmatprep.subr.bf16.mxu0 %v3012_v0  ;;  %v3034_v63 = vpack.c.bf16 %v550_v61, %v544_v60  ;;  %v3036_v0 = vpack.c.bf16 %v563_v62, %v557_v45  ;;  %v677_v60 = vld [vmem:[#allocation7 + $0xce8] sm:$0xff]  ;;  %v683_v61 = vld [vmem:[#allocation7 + $0xd18] sm:$0xff] }
 0x154   :  { %3151 = vmatpush3.bf16.msra.mxu1 %v3150_v14  ;;  %v599_v14 = vld [vmem:[#allocation7 + $0xa78] sm:$0xff]  ;;  %v3076_v62 = vpack.c.bf16 %v683_v61, %v677_v60  ;;  %v796_v60 = vld [vmem:[#allocation7 + $0x10a0] sm:$0xff]  ;;  %v802_v61 = vld [vmem:[#allocation7 + $0x10d0] sm:$0xff] }
 0x155   :  { %3153 = vmatprep.subr.bf16.mxu1 %v3152_v16  ;;  %v3048_v16 = vpack.c.bf16 %v599_v14, %v593_v49  ;;  %v712_v49 = vld [vmem:[#allocation7 + $0xe00] sm:$0xff]  ;;  %v718_v14 = vld [vmem:[#allocation7 + $0xe30] sm:$0xff] }
 0x156   :  { %3015 = vmatpush1.bf16.msra.mxu0 %v3014_v10  ;;  %v3042_v10 = vpack.c.bf16 %v574_v7, %v568_v6  ;;  %v701_v6 = vld [vmem:[#allocation7 + $0xda8] sm:$0xff]  ;;  %v707_v7 = vld [vmem:[#allocation7 + $0xdd8] sm:$0xff] }
 0x157   :  { %3017 = vmatprep.subr.bf16.mxu0 %v3016_v11  ;;  %v3044_v11 = vpack.c.bf16 %v587_v9, %v581_v40  ;;  %v3084_v40 = vpack.c.bf16 %v707_v7, %v701_v6  ;;  %v700_v9 = vld [vmem:[#allocation7 + $0xda0] sm:$0xff]  ;;  %v826_v7 = vld [vmem:[#allocation7 + $0x1190] sm:$0xff] }
 0x158   :  { %3155 = vmatpush3.bf16.msra.mxu1 %v3154_v27  ;;  %v623_v27 = vld [vmem:[#allocation7 + $0xb38] sm:$0xff]  ;;  %v820_v6 = vld [vmem:[#allocation7 + $0x1160] sm:$0xff] }
 0x159   :  { %3157 = vmatprep.subr.bf16.mxu1 %v3156_v29  ;;  %v3056_v29 = vpack.c.bf16 %v623_v27, %v617_v26  ;;  %v736_v26 = vld [vmem:[#allocation7 + $0xec0] sm:$0xff]  ;;  %v742_v27 = vld [vmem:[#allocation7 + $0xef0] sm:$0xff] }
 0x15a   :  { %3019 = vmatpush1.bf16.msra.mxu0 %v3018_v21  ;;  %v3050_v21 = vpack.c.bf16 %v598_v18, %v592_v17  ;;  %v3090_v17 = vpack.c.bf16 %v718_v14, %v712_v49  ;;  %v3098_v22 = vpack.c.bf16 %v742_v27, %v736_v26  ;;  %v1550_v49 = vld [vmem:[%s4036_s3 + $0x100] sm:$0xff]  ;;  %v1551_v14 = vld [vmem:[%s4036_s3 + $0x108] sm:$0xff] }
 0x15b   :  { %3021 = vmatprep.subr.bf16.mxu0 %v3020_v23  ;;  %v3052_v23 = vpack.c.bf16 %v611_v20, %v605_v19  ;;  %v724_v19 = vld [vmem:[#allocation7 + $0xe60] sm:$0xff]  ;;  %v730_v20 = vld [vmem:[#allocation7 + $0xe90] sm:$0xff] }
 0x15c   :  { %3159 = vmatpush3.bf16.msra.mxu1 %v3158_v37  ;;  %v628_v37 = vld [vmem:[#allocation7 + $0xb60] sm:$0xff]  ;;  %v3094_v24 = vpack.c.bf16 %v730_v20, %v724_v19  ;;  %v3166_v20 = vpack.c.bf16 %v1551_v14, %v1550_v49  ;;  %v1570_v26 = vld [vmem:[%s4036_s3 + $0x1a0] sm:$0xff] }
 0x15d   :  { %3161 = vmatprep.subr.bf16.mxu1 %v3160_v44  ;;  %v3062_v42 = vpack.c.bf16 %v634_v38, %v628_v37  ;;  %v640_v44 = vld [vmem:[#allocation7 + $0xbc0] sm:$0xff]  ;;  %v1602_v49 = vld [vmem:[%s4036_s3 + $0x2a0] sm:$0xff] }
 0x15e   :  { %3023 = vmatpush1.bf16.msra.mxu0 %v3022_v32  ;;  %v629_v32 = vld [vmem:[#allocation7 + $0xb68] sm:$0xff]  ;;  %v3066_v50 = vpack.c.bf16 %v646_v46, %v640_v44  ;;  %v1571_v27 = vld [vmem:[%s4036_s3 + $0x1a8] sm:$0xff] }
 0x15f   :  { %3025 = vmatprep.subr.bf16.mxu0 %v3024_v33  ;;  %v635_v33 = vld [vmem:[#allocation7 + $0xb98] sm:$0xff] }
 0x160   :  { %3163 = vmatpush3.bf16.msra.mxu1 %v3162_v52  ;;  %v3060_v36 = vpack.c.bf16 %v635_v33, %v629_v32  ;;  %v652_v52 = vld [vmem:[#allocation7 + $0xc20] sm:$0xff]  ;;  %v754_v33 = vld [vmem:[#allocation7 + $0xf50] sm:$0xff] }
 0x161   :  { %3165 = vmatprep.subr.bf16.mxu1 %v3164_v58  ;;  %v3070_v56 = vpack.c.bf16 %v658_v53, %v652_v52  ;;  %v664_v58 = vld [vmem:[#allocation7 + $0xc80] sm:$0xff] }
 0x162   :  { %3027 = vmatpush1.bf16.msra.mxu0 %v3026_v43  ;;  %v3064_v43 = vpack.c.bf16 %v647_v41, %v641_v39  ;;  %v748_v32 = vld [vmem:[#allocation7 + $0xf20] sm:$0xff]  ;;  %v766_v41 = vld [vmem:[#allocation7 + $0xfb0] sm:$0xff] }
 0x163   :  { %3029 = vmatprep.subr.bf16.mxu0 %v3028_v48  ;;  %v659_v48 = vld [vmem:[#allocation7 + $0xc58] sm:$0xff]  ;;  %v3102_v37 = vpack.c.bf16 %v754_v33, %v748_v32  ;;  %v760_v39 = vld [vmem:[#allocation7 + $0xf80] sm:$0xff]  ;;  %v1573_v33 = vld [vmem:[%s4036_s3 + $0x1b8] sm:$0xff] }
 0x164   :  { %v3068_v51 = vpack.c.bf16 %v659_v48, %v653_v47  ;;  %v3106_v44 = vpack.c.bf16 %v766_v41, %v760_v39  ;;  %v772_v47 = vld [vmem:[#allocation7 + $0xfe0] sm:$0xff]  ;;  %v778_v48 = vld [vmem:[#allocation7 + $0x1010] sm:$0xff] }
 0x165   :  { %v3110_v52 = vpack.c.bf16 %v778_v48, %v772_v47  ;;  %v1572_v32 = vld [vmem:[%s4036_s3 + $0x1b0] sm:$0xff]  ;;  %v1574_v41 = vld [vmem:[%s4036_s3 + $0x1c0] sm:$0xff]  ;;  %v1603_v14 = vld [vmem:[%s4036_s3 + $0x2a8] sm:$0xff] }
 0x166   :  { %3031 = vmatpush1.bf16.msra.mxu0 %v3030_v57  ;;  %v3072_v57 = vpack.c.bf16 %v671_v55, %v665_v54  ;;  %v784_v54 = vld [vmem:[#allocation7 + $0x1040] sm:$0xff]  ;;  %v790_v55 = vld [vmem:[#allocation7 + $0x1070] sm:$0xff] }
 0x167   :  { %3033 = vmatprep.subr.bf16.mxu0 %v3032_v59  ;;  %v670_v59 = vld [vmem:[#allocation7 + $0xcb0] sm:$0xff] }
 0x168   :  { %v3074_v45 = vpack.c.bf16 %v670_v59, %v664_v58  ;;  %v3114_v58 = vpack.c.bf16 %v790_v55, %v784_v54  ;;  %v1558_v48 = vld [vmem:[%s4036_s3 + $0x140] sm:$0xff]  ;;  %v1560_v55 = vld [vmem:[%s4036_s3 + $0x150] sm:$0xff] }
 0x16a   :  { %3035 = vmatpush1.bf16.msra.mxu0 %v3034_v63  ;;  %v676_v63 = vld [vmem:[#allocation7 + $0xce0] sm:$0xff] }
 0x16b   :  { %3037 = vmatprep.subr.bf16.mxu0 %v3036_v0  ;;  %v682_v0 = vld [vmem:[#allocation7 + $0xd10] sm:$0xff] }
 0x16c   :  { %v3078_v3 = vpack.c.bf16 %v682_v0, %v676_v63  ;;  %v3118_v63 = vpack.c.bf16 %v802_v61, %v796_v60  ;;  %v1562_v61 = vld [vmem:[%s4036_s3 + $0x160] sm:$0xff] }
 0x16e   :  { %3039 = vmatpush1.bf16.msra.mxu0 %v3038_v4  ;;  %v688_v4 = vld [vmem:[#allocation7 + $0xd40] sm:$0xff] }
 0x16f   :  { %3041 = vmatprep.subr.bf16.mxu0 %v3040_v5  ;;  %v694_v5 = vld [vmem:[#allocation7 + $0xd70] sm:$0xff] }
 0x172   :  { %3043 = vmatpush1.bf16.msra.mxu0 %v3042_v10  ;;  %v713_v10 = vld [vmem:[#allocation7 + $0xe08] sm:$0xff] }
 0x173   :  { %3045 = vmatprep.subr.bf16.mxu0 %v3044_v11  ;;  %v719_v11 = vld [vmem:[#allocation7 + $0xe38] sm:$0xff] }
 0x174   :  { %v3088_v13 = vpack.c.bf16 %v719_v11, %v713_v10  ;;  %v832_v10 = vld [vmem:[#allocation7 + $0x11c0] sm:$0xff]  ;;  %v838_v11 = vld [vmem:[#allocation7 + $0x11f0] sm:$0xff] }
 0x176   :  { %3047 = vmatpush1.bf16.msra.mxu0 %v3046_v15  ;;  %v725_v15 = vld [vmem:[#allocation7 + $0xe68] sm:$0xff] }
 0x177   :  { %3049 = vmatprep.subr.bf16.mxu0 %v3048_v16  ;;  %v731_v16 = vld [vmem:[#allocation7 + $0xe98] sm:$0xff] }
 0x178   :  { %v3092_v18 = vpack.c.bf16 %v731_v16, %v725_v15  ;;  %v1568_v16 = vld [vmem:[%s4036_s3 + $0x190] sm:$0xff] }
 0x17a   :  { %3051 = vmatpush1.bf16.msra.mxu0 %v3050_v21  ;;  %v737_v21 = vld [vmem:[#allocation7 + $0xec8] sm:$0xff] }
 0x17b   :  { %3053 = vmatprep.subr.bf16.mxu0 %v3052_v23  ;;  %v743_v23 = vld [vmem:[#allocation7 + $0xef8] sm:$0xff] }
 0x17c   :  { %v3096_v25 = vpack.c.bf16 %v743_v23, %v737_v21 }
 0x17e   :  { %3055 = vmatpush1.bf16.msra.mxu0 %v3054_v28  ;;  %v749_v28 = vld [vmem:[#allocation7 + $0xf28] sm:$0xff] }
 0x17f   :  { %3057 = vmatprep.subr.bf16.mxu0 %v3056_v29  ;;  %v755_v29 = vld [vmem:[#allocation7 + $0xf58] sm:$0xff] }
 0x180   :  { %v3100_v30 = vpack.c.bf16 %v755_v29, %v749_v28  ;;  %v3172_v29 = vpack.c.bf16 %v1571_v27, %v1570_v26  ;;  %v1606_v26 = vld [vmem:[%s4036_s3 + $0x2c0] sm:$0xff]  ;;  %v1607_v27 = vld [vmem:[%s4036_s3 + $0x2c8] sm:$0xff] }
 0x182   :  { %3059 = vmatpush1.bf16.msra.mxu0 %v3058_v35  ;;  %v761_v35 = vld [vmem:[#allocation7 + $0xf88] sm:$0xff] }
 0x183   :  { %3061 = vmatprep.subr.bf16.mxu0 %v3060_v36  ;;  %v767_v36 = vld [vmem:[#allocation7 + $0xfb8] sm:$0xff] }
 0x184   :  { %v3104_v38 = vpack.c.bf16 %v767_v36, %v761_v35  ;;  %v3176_v36 = vpack.c.bf16 %v1573_v33, %v1572_v32  ;;  %v1608_v32 = vld [vmem:[%s4036_s3 + $0x2d0] sm:$0xff]  ;;  %v1609_v33 = vld [vmem:[%s4036_s3 + $0x2d8] sm:$0xff] }
 0x186   :  { %3063 = vmatpush1.bf16.msra.mxu0 %v3062_v42  ;;  %v773_v42 = vld [vmem:[#allocation7 + $0xfe8] sm:$0xff] }
 0x187   :  { %3065 = vmatprep.subr.bf16.mxu0 %v3064_v43  ;;  %v779_v43 = vld [vmem:[#allocation7 + $0x1018] sm:$0xff] }
 0x188   :  { %v3108_v46 = vpack.c.bf16 %v779_v43, %v773_v42  ;;  %v1575_v42 = vld [vmem:[%s4036_s3 + $0x1c8] sm:$0xff] }
 0x189   :  { %v3180_v47 = vpack.c.bf16 %v1575_v42, %v1574_v41  ;;  %v1611_v41 = vld [vmem:[%s4036_s3 + $0x2e8] sm:$0xff] }
 0x18a   :  { %3067 = vmatpush1.bf16.msra.mxu0 %v3066_v50  ;;  %v785_v50 = vld [vmem:[#allocation7 + $0x1048] sm:$0xff] }
 0x18b   :  { %3069 = vmatprep.subr.bf16.mxu0 %v3068_v51  ;;  %v791_v51 = vld [vmem:[#allocation7 + $0x1078] sm:$0xff] }
 0x18c   :  { %v3112_v53 = vpack.c.bf16 %v791_v51, %v785_v50  ;;  %v1559_v50 = vld [vmem:[%s4036_s3 + $0x148] sm:$0xff]  ;;  %v1576_v51 = vld [vmem:[%s4036_s3 + $0x1d0] sm:$0xff] }
 0x18d   :  { %1435 = vmatmul.mubr.f32.vlgmr.msra.gmra.mrb[2].mxu0 %v3554_v8  ;;  %v3082_v8 = vpack.c.bf16 %v694_v5, %v688_v4  ;;  %v3122_v4 = vpack.c.bf16 %v814_v2, %v808_v1  ;;  %v1564_v2 = vld [vmem:[%s4036_s3 + $0x170] sm:$0xff] }
 0x18e   :  { %3071 = vmatpush1.bf16.msra.mxu0 %v3070_v56  ;;  %1505 = vmatprep.mubr.f32.mxu0 %v3568_v34  ;;  %v706_v34 = vld [vmem:[#allocation7 + $0xdd0] sm:$0xff]  ;;  %v797_v56 = vld [vmem:[#allocation7 + $0x10a8] sm:$0xff] }
 0x18f   :  { %3073 = vmatprep.subr.bf16.mxu0 %v3072_v57  ;;  %v3086_v12 = vpack.c.bf16 %v706_v34, %v700_v9  ;;  %v803_v57 = vld [vmem:[#allocation7 + $0x10d8] sm:$0xff]  ;;  %v3126_v9 = vpack.c.bf16 %v826_v7, %v820_v6 }
 0x190   :  { %v3116_v59 = vpack.c.bf16 %v803_v57, %v797_v56  ;;  %v1561_v56 = vld [vmem:[%s4036_s3 + $0x158] sm:$0xff]  ;;  %v1578_v57 = vld [vmem:[%s4036_s3 + $0x1e0] sm:$0xff] }
 0x191   :  { %v1582_v7 = vld [vmem:[%s4036_s3 + $0x200] sm:$0xff] }
 0x192   :  { %3075 = vmatpush1.bf16.msra.mxu0 %v3074_v45  ;;  %v809_v45 = vld [vmem:[#allocation7 + $0x1108] sm:$0xff] }
 0x193   :  { %3077 = vmatprep.subr.bf16.mxu0 %v3076_v62  ;;  %v815_v62 = vld [vmem:[#allocation7 + $0x1138] sm:$0xff] }
 0x194   :  { %v3120_v0 = vpack.c.bf16 %v815_v62, %v809_v45  ;;  %v1563_v45 = vld [vmem:[%s4036_s3 + $0x168] sm:$0xff]  ;;  %v1580_v62 = vld [vmem:[%s4036_s3 + $0x1f0] sm:$0xff] }
 0x196   :  { %3079 = vmatpush1.bf16.msra.mxu0 %v3078_v3  ;;  %v821_v3 = vld [vmem:[#allocation7 + $0x1168] sm:$0xff] }
 0x197   :  { %3081 = vmatprep.subr.bf16.mxu0 %v3080_v31  ;;  %v827_v31 = vld [vmem:[#allocation7 + $0x1198] sm:$0xff] }
 0x198   :  { %v3124_v5 = vpack.c.bf16 %v827_v31, %v821_v3  ;;  %v1565_v3 = vld [vmem:[%s4036_s3 + $0x178] sm:$0xff]  ;;  %v1598_v31 = vld [vmem:[%s4036_s3 + $0x280] sm:$0xff] }
 0x19a   :  { %3083 = vmatpush1.bf16.msra.mxu0 %v3082_v8  ;;  %v833_v8 = vld [vmem:[#allocation7 + $0x11c8] sm:$0xff] }
 0x19b   :  { %3085 = vmatprep.subr.bf16.mxu0 %v3084_v40  ;;  %v839_v40 = vld [vmem:[#allocation7 + $0x11f8] sm:$0xff] }
 0x19c   :  { %v3128_v34 = vpack.c.bf16 %v839_v40, %v833_v8  ;;  %v1583_v8 = vld [vmem:[%s4036_s3 + $0x208] sm:$0xff]  ;;  %v1600_v40 = vld [vmem:[%s4036_s3 + $0x290] sm:$0xff] }
 0x19e   :  { %3087 = vmatpush1.bf16.msra.mxu0 %v3086_v12  ;;  %v3130_v12 = vpack.c.bf16 %v838_v11, %v832_v10  ;;  %v3198_v10 = vpack.c.bf16 %v1583_v8, %v1582_v7 }
 0x19f   :  { %3089 = vmatprep.subr.bf16.mxu0 %v3088_v13  ;;  %v3302_v13 = vld.sshfl [vmem:[#allocation5 + $0x8] sm:$0x33 pattern:$0x76325410] }
 0x1a2   :  { %3091 = vmatpush1.bf16.msra.mxu0 %v3090_v17  ;;  %v1569_v17 = vld [vmem:[%s4036_s3 + $0x198] sm:$0xff] }
 0x1a3   :  { %3093 = vmatprep.subr.bf16.mxu0 %v3092_v18  ;;  %v3168_v23 = vpack.c.bf16 %v1569_v17, %v1568_v16  ;;  %v3204_v16 = vpack.c.bf16 %v1603_v14, %v1602_v49  ;;  %v1586_v17 = vld [vmem:[%s4036_s3 + $0x220] sm:$0xff]  ;;  %v122_v14 = vld [vmem:[#allocation2 + $0x150] sm:$0xff] }
 0x1a6   :  { %3095 = vmatpush1.bf16.msra.mxu0 %v3094_v24  ;;  %v1552_v24 = vld [vmem:[%s4036_s3 + $0x110] sm:$0xff] }
 0x1a7   :  { %3097 = vmatprep.subr.bf16.mxu0 %v3096_v25  ;;  %v1553_v25 = vld [vmem:[%s4036_s3 + $0x118] sm:$0xff] }
 0x1a8   :  { %v3170_v28 = vpack.c.bf16 %v1553_v25, %v1552_v24  ;;  %v1588_v24 = vld [vmem:[%s4036_s3 + $0x230] sm:$0xff]  ;;  %v1589_v25 = vld [vmem:[%s4036_s3 + $0x238] sm:$0xff] }
 0x1aa   :  { %3099 = vmatpush1.bf16.msra.mxu0 %v3098_v22  ;;  %v1554_v22 = vld [vmem:[%s4036_s3 + $0x120] sm:$0xff] }
 0x1ab   :  { %3101 = vmatprep.subr.bf16.mxu0 %v3100_v30  ;;  %v1555_v30 = vld [vmem:[%s4036_s3 + $0x128] sm:$0xff] }
 0x1ac   :  { %v3174_v35 = vpack.c.bf16 %v1555_v30, %v1554_v22  ;;  %v1590_v22 = vld [vmem:[%s4036_s3 + $0x240] sm:$0xff]  ;;  %v1591_v30 = vld [vmem:[%s4036_s3 + $0x248] sm:$0xff] }
 0x1ae   :  { %3103 = vmatpush1.bf16.msra.mxu0 %v3102_v37  ;;  %v1556_v37 = vld [vmem:[%s4036_s3 + $0x130] sm:$0xff] }
 0x1af   :  { %3105 = vmatprep.subr.bf16.mxu0 %v3104_v38  ;;  %v1557_v38 = vld [vmem:[%s4036_s3 + $0x138] sm:$0xff] }
 0x1b2   :  { %3107 = vmatpush1.bf16.msra.mxu0 %v3106_v44 }
 0x1b3   :  { %3109 = vmatprep.subr.bf16.mxu0 %v3108_v46  ;;  %v3178_v46 = vpack.c.bf16 %v1557_v38, %v1556_v37  ;;  %v1592_v37 = vld [vmem:[%s4036_s3 + $0x250] sm:$0xff]  ;;  %v1593_v38 = vld [vmem:[%s4036_s3 + $0x258] sm:$0xff] }
 0x1b4   :  { %v3218_v42 = vpack.c.bf16 %v1593_v38, %v1592_v37 }
 0x1b6   :  { %3111 = vmatpush1.bf16.msra.mxu0 %v3110_v52  ;;  %v1577_v52 = vld [vmem:[%s4036_s3 + $0x1d8] sm:$0xff] }
 0x1b7   :  { %3113 = vmatprep.subr.bf16.mxu0 %v3112_v53  ;;  %v3182_v53 = vpack.c.bf16 %v1559_v50, %v1558_v48  ;;  %v3184_v54 = vpack.c.bf16 %v1577_v52, %v1576_v51  ;;  %v1612_v48 = vld [vmem:[%s4036_s3 + $0x2f0] sm:$0xff]  ;;  %v1613_v50 = vld [vmem:[%s4036_s3 + $0x2f8] sm:$0xff] }
 0x1b8   :  { %v3224_v51 = vpack.c.bf16 %v1613_v50, %v1612_v48  ;;  %v1596_v52 = vld [vmem:[%s4036_s3 + $0x270] sm:$0xff] }
 0x1b9   :  { %v102_v50 = vld [vmem:[#allocation2 + $0xb0] sm:$0xff] }
 0x1ba   :  { %3115 = vmatpush1.bf16.msra.mxu0 %v3114_v58  ;;  %v1579_v58 = vld [vmem:[%s4036_s3 + $0x1e8] sm:$0xff] }
 0x1bb   :  { %3117 = vmatprep.subr.bf16.mxu0 %v3116_v59  ;;  %v3186_v59 = vpack.c.bf16 %v1561_v56, %v1560_v55  ;;  %v3188_v60 = vpack.c.bf16 %v1579_v58, %v1578_v57  ;;  %v3430_v55 = vmov 0.0|0.0   ;;  %v3431_v56 = vmov 0.0   ;;  %v96_v57 = vld [vmem:[#allocation2 + $0x80] sm:$0xff]  ;;  %v97_v58 = vld [vmem:[#allocation2 + $0x88] sm:$0xff] }
 0x1bc   :  { %2313 = vst [vmem:[#allocation10] sm:$0x3] %v3431_v56 }
 0x1be   :  { %3119 = vmatpush1.bf16.msra.mxu0 %v3118_v63  ;;  %v1581_v63 = vld [vmem:[%s4036_s3 + $0x1f8] sm:$0xff] }
 0x1bf   :  { %3121 = vmatprep.subr.bf16.mxu0 %v3120_v0  ;;  %v3190_v0 = vpack.c.bf16 %v1563_v45, %v1562_v61  ;;  %v3192_v1 = vpack.c.bf16 %v1581_v63, %v1580_v62  ;;  %v112_v61 = vld [vmem:[#allocation2 + $0x100] sm:$0xff]  ;;  %v113_v45 = vld [vmem:[#allocation2 + $0x108] sm:$0xff]  ;;  %v171_v62 = vsel %vm128_vm0, %v96_v57, 0.0  ;;  %v172_v63 = vsel %vm128_vm0, %v97_v58, 0.0 }
 0x1c0   :  { %v213_v7 = vsel %vm128_vm0, %v112_v61, 0.0  ;;  %v214_v8 = vsel %vm128_vm0, %v113_v45, 0.0  ;;  %v125_v57 = vld [vmem:[#allocation2 + $0x168] sm:$0xff]  ;;  %v118_v61 = vld [vmem:[#allocation2 + $0x130] sm:$0xff]  ;;  %v182_v45 = vsel %vm128_vm0, %v102_v50, 0.0 }
 0x1c2   :  { %3123 = vmatpush1.bf16.msra.mxu0 %v3122_v4  ;;  %v1599_v4 = vld [vmem:[%s4036_s3 + $0x288] sm:$0xff] }
 0x1c3   :  { %3125 = vmatprep.subr.bf16.mxu0 %v3124_v5  ;;  %v3194_v5 = vpack.c.bf16 %v1565_v3, %v1564_v2  ;;  %v3196_v6 = vpack.c.bf16 %v1599_v4, %v1598_v31  ;;  %v98_v2 = vld [vmem:[#allocation2 + $0x90] sm:$0xff]  ;;  %v120_v31 = vld [vmem:[#allocation2 + $0x140] sm:$0xff]  ;;  %v121_v4 = vld [vmem:[#allocation2 + $0x148] sm:$0xff] }
 0x1c4   :  { %v106_v3 = vld [vmem:[#allocation2 + $0xd0] sm:$0xff]  ;;  %v235_v49 = vsel %vm128_vm0, %v121_v4, 0.0 }
 0x1c6   :  { %3127 = vmatpush1.bf16.msra.mxu0 %v3126_v9  ;;  %v1601_v9 = vld [vmem:[%s4036_s3 + $0x298] sm:$0xff] }
 0x1c7   :  { %3129 = vmatprep.subr.bf16.mxu0 %v3128_v34  ;;  %v3200_v11 = vpack.c.bf16 %v1601_v9, %v1600_v40  ;;  %v114_v40 = vld [vmem:[#allocation2 + $0x110] sm:$0xff]  ;;  %v174_v9 = vsel %vm128_vm0, %v98_v2, 0.0 }
 0x1ca   :  { %3131 = vmatpush1.bf16.msra.mxu0 %v3130_v12  ;;  %v1584_v12 = vld [vmem:[%s4036_s3 + $0x210] sm:$0xff] }
 0x1cd   :  { %1506 = vmatmul.mubr.f32.vlgmr.msra.gmra.mrb[2].mxu0 %v3302_v13  ;;  %v1585_v13 = vld [vmem:[%s4036_s3 + $0x218] sm:$0xff] }
 0x1e0   :  { %v1081_v15 = vpop.f32.mrb[0].mxu0 }
 0x1e1   :  { %v1083_v18 = vpop.f32.mrb[1].mxu0  ;;  %v1512_v21 = vmax.f32 %v1081_v15, 0.0  ;;  %v3202_v15 = vpack.c.bf16 %v1585_v13, %v1584_v12  ;;  %v215_v12 = vadd.f32 %v214_v8, %v213_v7  ;;  %v234_v13 = vsel %vm128_vm0, %v120_v31, 0.0  ;;  %v126_v31 = vld [vmem:[#allocation2 + $0x170] sm:$0xff]  ;;  %v119_v7 = vld [vmem:[#allocation2 + $0x138] sm:$0xff] }
 0x1e2   :  { %v1513_v19 = vmax.f32 %v1083_v18, 0.0  ;;  %v1587_v18 = vld [vmem:[%s4036_s3 + $0x228] sm:$0xff] }
 0x1e4   :  { %1678 = vmatprep.mubr.f32.mxu1 %v1513_v19  ;;  %v1604_v19 = vld [vmem:[%s4036_s3 + $0x2b0] sm:$0xff] }
 0x1e5   :  { %1679 = vmatmul.mubr.f32.vlgmr.msra.gmra.mrb[2].mxu1 %v1512_v21  ;;  %v3206_v21 = vpack.c.bf16 %v1587_v18, %v1586_v17  ;;  %v216_v17 = vsel %vm128_vm0, %v114_v40, 0.0  ;;  %v115_v18 = vld [vmem:[#allocation2 + $0x118] sm:$0xff] }
 0x1e6   :  { %3167 = vmatpush3.bf16.msra.mxu1 %v3166_v20  ;;  %v1605_v20 = vld [vmem:[%s4036_s3 + $0x2b8] sm:$0xff] }
 0x1e7   :  { %3169 = vmatprep.subr.bf16.mxu1 %v3168_v23  ;;  %v1294_v39 = vpop.f32.mrb[0].mxu1  ;;  %v3208_v23 = vpack.c.bf16 %v1605_v20, %v1604_v19 }
 0x1e8   :  { %v1296_v43 = vpop.f32.mrb[1].mxu1  ;;  %v1514_v34 = vmax.f32 %v1294_v39, 0.0  ;;  %v1610_v39 = vld [vmem:[%s4036_s3 + $0x2e0] sm:$0xff] }
 0x1e9   :  { %v1515_v44 = vmax.f32 %v1296_v43, 0.0  ;;  %v3220_v43 = vpack.c.bf16 %v1611_v41, %v1610_v39  ;;  %v124_v41 = vld [vmem:[#allocation2 + $0x160] sm:$0xff] }
 0x1ea   :  { %3171 = vmatpush3.bf16.msra.mxu1 %v3170_v28  ;;  %v3210_v28 = vpack.c.bf16 %v1589_v25, %v1588_v24  ;;  %v236_v24 = vadd.f32 %v235_v49, %v234_v13  ;;  %v217_v25 = vadd.f32 %v216_v17, %v215_v12  ;;  %v226_v49 = vsel %vm128_vm0, %v119_v7, 0.0 }
 0x1eb   :  { %3173 = vmatprep.subr.bf16.mxu1 %v3172_v29  ;;  %1748 = vmatprep.mubr.f32.mxu1 %v1515_v44  ;;  %v3212_v29 = vpack.c.bf16 %v1607_v27, %v1606_v26  ;;  %v1594_v44 = vld [vmem:[%s4036_s3 + $0x260] sm:$0xff]  ;;  %v237_v26 = vsel %vm128_vm0, %v122_v14, 0.0  ;;  %v123_v27 = vld [vmem:[#allocation2 + $0x158] sm:$0xff] }
 0x1ec   :  { %v238_v37 = vadd.f32 %v237_v26, %v236_v24  ;;  %v239_v39 = vsel %vm128_vm0, %v123_v27, 0.0 }
 0x1ee   :  { %3175 = vmatpush3.bf16.msra.mxu1 %v3174_v35  ;;  %v3214_v35 = vpack.c.bf16 %v1591_v30, %v1590_v22  ;;  %v218_v22 = vsel %vm128_vm0, %v115_v18, 0.0  ;;  %v116_v30 = vld [vmem:[#allocation2 + $0x120] sm:$0xff] }
 0x1ef   :  { %3177 = vmatprep.subr.bf16.mxu1 %v3176_v36  ;;  %v3216_v36 = vpack.c.bf16 %v1609_v33, %v1608_v32  ;;  %v219_v38 = vadd.f32 %v218_v22, %v217_v25 }
 0x1f2   :  { %3179 = vmatpush3.bf16.msra.mxu1 %v3178_v46  ;;  %v1595_v46 = vld [vmem:[%s4036_s3 + $0x268] sm:$0xff] }
 0x1f3   :  { %3181 = vmatprep.subr.bf16.mxu1 %v3180_v47  ;;  %v3222_v47 = vpack.c.bf16 %v1595_v46, %v1594_v44  ;;  %v220_v44 = vsel %vm128_vm0, %v116_v30, 0.0  ;;  %v117_v46 = vld [vmem:[#allocation2 + $0x128] sm:$0xff] }
 0x1f6   :  { %3183 = vmatpush3.bf16.msra.mxu1 %v3182_v53  ;;  %v1597_v53 = vld [vmem:[%s4036_s3 + $0x278] sm:$0xff] }
 0x1f7   :  { %3185 = vmatprep.subr.bf16.mxu1 %v3184_v54  ;;  %v3226_v54 = vpack.c.bf16 %v1597_v53, %v1596_v52  ;;  %v240_v52 = vadd.f32 %v239_v39, %v238_v37  ;;  %v221_v53 = vadd.f32 %v220_v44, %v219_v38 }
 0x1fa   :  { %3187 = vmatpush3.bf16.msra.mxu1 %v3186_v59  ;;  %v104_v59 = vld [vmem:[#allocation2 + $0xc0] sm:$0xff] }
 0x1fb   :  { %3189 = vmatprep.subr.bf16.mxu1 %v3188_v60  ;;  %v105_v60 = vld [vmem:[#allocation2 + $0xc8] sm:$0xff] }
 0x1fe   :  { %3191 = vmatpush3.bf16.msra.mxu1 %v3190_v0  ;;  %v192_v0 = vsel %vm128_vm0, %v104_v59, 0.0 }
 0x1ff   :  { %3193 = vmatprep.subr.bf16.mxu1 %v3192_v1  ;;  %v193_v1 = vsel %vm128_vm0, %v105_v60, 0.0  ;;  %v222_v60 = vsel %vm128_vm0, %v117_v46, 0.0 }
 0x200   :  { %v223_v2 = vadd.f32 %v222_v60, %v221_v53 }
 0x202   :  { %3195 = vmatpush3.bf16.msra.mxu1 %v3194_v5  ;;  %v173_v5 = vadd.f32 %v172_v63, %v171_v62  ;;  %v103_v63 = vld [vmem:[#allocation2 + $0xb8] sm:$0xff] }
 0x203   :  { %3197 = vmatprep.subr.bf16.mxu1 %v3196_v6  ;;  %v194_v6 = vadd.f32 %v193_v1, %v192_v0  ;;  %v111_v0 = vld [vmem:[#allocation2 + $0xf8] sm:$0xff]  ;;  %v184_v8 = vsel %vm128_vm0, %v103_v63, 0.0 }
 0x204   :  { %v205_v40 = vsel %vm128_vm0, %v111_v0, 0.0  ;;  %v1830_v63 = vld [vmem:[#allocation8 + $0x30] sm:$0xff]  ;;  %v1831_v0 = vld [vmem:[#allocation8 + $0x38] sm:$0xff] }
 0x205   :  { %1749 = vmatmul.mubr.f32.vlgmr.msra.gmra.mrb[4].mxu1 %v1514_v34  ;;  %v195_v34 = vsel %vm128_vm0, %v106_v3, 0.0  ;;  %v243_v3 = vsel %vm128_vm0, %v125_v57, 0.0  ;;  %v1828_v57 = vld [vmem:[#allocation8 + $0x20] sm:$0xff] }
 0x206   :  { %3199 = vmatpush3.bf16.msra.mxu1 %v3198_v10  ;;  %v99_v10 = vld [vmem:[#allocation2 + $0x98] sm:$0xff] }
 0x207   :  { %3201 = vmatprep.subr.bf16.mxu1 %v3200_v11  ;;  %v107_v11 = vld [vmem:[#allocation2 + $0xd8] sm:$0xff]  ;;  %v176_v19 = vsel %vm128_vm0, %v99_v10, 0.0  ;;  %v245_v10 = vsel %vm128_vm0, %v126_v31, 0.0 }
 0x208   :  { %v197_v20 = vsel %vm128_vm0, %v107_v11, 0.0  ;;  %v127_v11 = vld [vmem:[#allocation2 + $0x178] sm:$0xff] }
 0x20a   :  { %3203 = vmatpush3.bf16.msra.mxu1 %v3202_v15  ;;  %v175_v15 = vadd.f32 %v174_v9, %v173_v5 }
 0x20b   :  { %3205 = vmatprep.subr.bf16.mxu1 %v3204_v16  ;;  %v196_v16 = vadd.f32 %v195_v34, %v194_v6  ;;  %v224_v6 = vsel %vm128_vm0, %v118_v61, 0.0 }
 0x20c   :  { %v225_v34 = vadd.f32 %v224_v6, %v223_v2 }
 0x20e   :  { %3207 = vmatpush3.bf16.msra.mxu1 %v3206_v21  ;;  %v100_v21 = vld [vmem:[#allocation2 + $0xa0] sm:$0xff] }
 0x20f   :  { %3209 = vmatprep.subr.bf16.mxu1 %v3208_v23  ;;  %v108_v23 = vld [vmem:[#allocation2 + $0xe0] sm:$0xff]  ;;  %v178_v32 = vsel %vm128_vm0, %v100_v21, 0.0 }
 0x210   :  { %v199_v33 = vsel %vm128_vm0, %v108_v23, 0.0 }
 0x212   :  { %3211 = vmatpush3.bf16.msra.mxu1 %v3210_v28  ;;  %v177_v28 = vadd.f32 %v176_v19, %v175_v15  ;;  %v227_v15 = vadd.f32 %v226_v49, %v225_v34  ;;  %v80_v34 = vld [vmem:[#allocation2] sm:$0xff] }
 0x213   :  { %3213 = vmatprep.subr.bf16.mxu1 %v3212_v29  ;;  %v198_v29 = vadd.f32 %v197_v20, %v196_v16  ;;  %v247_v16 = vsel %vm128_vm0, %v127_v11, 0.0  ;;  %v88_v11 = vld [vmem:[#allocation2 + $0x40] sm:$0xff]  ;;  %v129_v49 = vsel %vm128_vm0, %v80_v34, 0.0 }
 0x214   :  { %v228_v20 = vrot.slane %v227_v15, 4 }
 0x216   :  { %3215 = vmatpush3.bf16.msra.mxu1 %v3214_v35  ;;  %v101_v35 = vld [vmem:[#allocation2 + $0xa8] sm:$0xff]  ;;  %v229_v25 = vadd.f32 %v228_v20, %v227_v15  ;;  %v150_v15 = vsel %vm128_vm0, %v88_v11, 0.0  ;;  %v1915_v11 = vld [vmem:[%s4038_s5] sm:$0xff] }
 0x217   :  { %3217 = vmatprep.subr.bf16.mxu1 %v3216_v36  ;;  %v109_v36 = vld [vmem:[#allocation2 + $0xe8] sm:$0xff] }
 0x218   :  { %v201_v48 = vsel %vm128_vm0, %v109_v36, 0.0 }
 0x21a   :  { %3219 = vmatpush3.bf16.msra.mxu1 %v3218_v42  ;;  %v179_v42 = vadd.f32 %v178_v32, %v177_v28 }
 0x21b   :  { %3221 = vmatprep.subr.bf16.mxu1 %v3220_v43  ;;  %v200_v43 = vadd.f32 %v199_v33, %v198_v29  ;;  %v230_v29 = vrot.slane %v229_v25, 2  ;;  %v1824_v33 = vld [vmem:[#allocation8] sm:$0xff] }
 0x21d   :  { %v202_v59 = vadd.f32 %v201_v48, %v200_v43  ;;  %v231_v36 = vadd.f32 %v230_v29, %v229_v25  ;;  %v1827_v48 = vld [vmem:[#allocation8 + $0x18] sm:$0xff]  ;;  %v83_v25 = vld [vmem:[#allocation2 + $0x18] sm:$0xff] }
 0x21e   :  { %3223 = vmatpush3.bf16.msra.mxu1 %v3222_v47  ;;  %v180_v47 = vsel %vm128_vm0, %v101_v35, 0.0  ;;  %v1825_v35 = vld [vmem:[#allocation8 + $0x8] sm:$0xff] }
 0x21f   :  { %3225 = vmatprep.subr.bf16.mxu1 %v3224_v51  ;;  %v110_v51 = vld [vmem:[#allocation2 + $0xf0] sm:$0xff]  ;;  %v181_v58 = vadd.f32 %v180_v47, %v179_v42  ;;  %v3229_v43 = vpack.c.bf16 %v1825_v35, %v1824_v33  ;;  %v1826_v47 = vld [vmem:[#allocation8 + $0x10] sm:$0xff]  ;;  %v232_v50 = vrot.slane %v231_v36, 1 }
 0x220   :  { %v203_v62 = vsel %vm128_vm0, %v110_v51, 0.0  ;;  %v3232_v53 = vpack.c.bf16 %v1827_v48, %v1826_v47  ;;  %v94_v47 = vld [vmem:[#allocation2 + $0x70] sm:$0xff] }
 0x221   :  { %v183_v4 = vadd.f32 %v182_v45, %v181_v58  ;;  %v204_v5 = vadd.f32 %v203_v62, %v202_v59  ;;  %v1829_v58 = vld [vmem:[#allocation8 + $0x28] sm:$0xff]  ;;  %v233_v59 = vadd.f32 %v232_v50, %v231_v36 }
 0x222   :  { %3227 = vmatpush3.bf16.msra.mxu1 %v3226_v54  ;;  %v241_v54 = vsel %vm128_vm0, %v124_v41, 0.0  ;;  %v3235_v45 = vpack.c.bf16 %v1829_v58, %v1828_v57 }
 0x223   :  { %3228 = vmatprep.subr.bf16.mxu1 %v3430_v55  ;;  %v242_v1 = vadd.f32 %v241_v54, %v240_v52  ;;  %v185_v12 = vadd.f32 %v184_v8, %v183_v4  ;;  %v206_v13 = vadd.f32 %v205_v40, %v204_v5 }
 0x225   :  { %v244_v9 = vadd.f32 %v243_v3, %v242_v1  ;;  %v186_v17 = vrot.slane %v185_v12, 4  ;;  %v207_v18 = vrot.slane %v206_v13, 4  ;;  %v260_v1 = vmul.f32 0.015625, %v233_v59 }
 0x226   :  { %v3238_v3 = vpack.c.bf16 %v1831_v0, %v1830_v63 }
 0x227   :  { %v246_v14 = vadd.f32 %v245_v10, %v244_v9  ;;  %v187_v21 = vadd.f32 %v186_v17, %v185_v12  ;;  %v208_v23 = vadd.f32 %v207_v18, %v206_v13  ;;  %v81_v10 = vld [vmem:[#allocation2 + $0x8] sm:$0xff]  ;;  %v90_v17 = vld [vmem:[#allocation2 + $0x50] sm:$0xff] }
 0x228   :  { %v89_v13 = vld [vmem:[#allocation2 + $0x48] sm:$0xff] }
 0x229   :  { %v248_v19 = vadd.f32 %v247_v16, %v246_v14  ;;  %v188_v26 = vrot.slane %v187_v21, 2  ;;  %v209_v27 = vrot.slane %v208_v23, 2  ;;  %v130_v14 = vsel %vm128_vm0, %v81_v10, 0.0  ;;  %v82_v16 = vld [vmem:[#allocation2 + $0x10] sm:$0xff] }
 0x22a   :  { %v131_v18 = vadd.f32 %v130_v14, %v129_v49 }
 0x22b   :  { %v249_v24 = vrot.slane %v248_v19, 4  ;;  %v189_v22 = vadd.f32 %v188_v26, %v187_v21  ;;  %v210_v30 = vadd.f32 %v209_v27, %v208_v23  ;;  %v132_v21 = vsel %vm128_vm0, %v82_v16, 0.0  ;;  %v91_v26 = vld [vmem:[#allocation2 + $0x58] sm:$0xff] }
 0x22c   :  { %v133_v27 = vadd.f32 %v132_v21, %v131_v18  ;;  %v1918_v16 = vld [vmem:[%s4038_s5 + $0x18] sm:$0xff]  ;;  %v1919_v18 = vld [vmem:[%s4038_s5 + $0x20] sm:$0xff] }
 0x22d   :  { %v250_v28 = vadd.f32 %v249_v24, %v248_v19  ;;  %v190_v38 = vrot.slane %v189_v22, 1  ;;  %v211_v39 = vrot.slane %v210_v30, 1  ;;  %v151_v19 = vsel %vm128_vm0, %v89_v13, 0.0 }
 0x22e   :  { %v152_v23 = vadd.f32 %v151_v19, %v150_v15  ;;  %v153_v24 = vsel %vm128_vm0, %v90_v17, 0.0  ;;  %v1917_v15 = vld [vmem:[%s4038_s5 + $0x10] sm:$0xff]  ;;  %v1920_v19 = vld [vmem:[%s4038_s5 + $0x28] sm:$0xff] }
 0x22f   :  { %v251_v32 = vrot.slane %v250_v28, 2  ;;  %v191_v51 = vadd.f32 %v190_v38, %v189_v22  ;;  %v212_v52 = vadd.f32 %v211_v39, %v210_v30  ;;  %v155_v22 = vsel %vm128_vm0, %v91_v26, 0.0  ;;  %v84_v30 = vld [vmem:[#allocation2 + $0x20] sm:$0xff]  ;;  %v85_v38 = vld [vmem:[#allocation2 + $0x28] sm:$0xff] }
 0x230   :  { %v154_v29 = vadd.f32 %v153_v24, %v152_v23  ;;  %v136_v35 = vsel %vm128_vm0, %v84_v30, 0.0  ;;  %v93_v39 = vld [vmem:[#allocation2 + $0x68] sm:$0xff]  ;;  %v3244_v17 = vpack.c.bf16 %v1918_v16, %v1917_v15  ;;  %v3247_v21 = vpack.c.bf16 %v1920_v19, %v1919_v18  ;;  %v1921_v23 = vld [vmem:[%s4038_s5 + $0x30] sm:$0xff]  ;;  %v1922_v24 = vld [vmem:[%s4038_s5 + $0x38] sm:$0xff] }
 0x231   :  { %v252_v44 = vadd.f32 %v251_v32, %v250_v28  ;;  %v258_v60 = vmul.f32 0.015625, %v191_v51  ;;  %v259_v61 = vmul.f32 0.015625, %v212_v52  ;;  %v134_v28 = vsel %vm128_vm0, %v83_v25, 0.0  ;;  %v92_v32 = vld [vmem:[#allocation2 + $0x60] sm:$0xff] }
 0x232   :  { %v135_v33 = vadd.f32 %v134_v28, %v133_v27  ;;  %v156_v36 = vadd.f32 %v155_v22, %v154_v29  ;;  %v161_v52 = vsel %vm128_vm0, %v94_v47, 0.0  ;;  %v3250_v25 = vpack.c.bf16 %v1922_v24, %v1921_v23  ;;  %v2038_v26 = vld [vmem:[%s4039_s6] sm:$0xff]  ;;  %v2039_v27 = vld [vmem:[%s4039_s6 + $0x8] sm:$0xff]  ;;  %v2040_v22 = vld [vmem:[%s4039_s6 + $0x10] sm:$0xff] }
 0x233   :  { %v253_v54 = vrot.slane %v252_v44, 1  ;;  %v1837_v2 = vsel %vm1836_vm2, %v259_v61, %v258_v60  ;;  %v2046_v28 = vmul.f32 %v2038_v26, %v2038_v26  ;;  %v2047_v29 = vmul.f32 %v2039_v27, %v2039_v27 }
 0x234   :  { %v1839_v4 = vsel %vm1838_vm3, %v260_v1, %v1837_v2  ;;  %v2048_v30 = vmul.f32 %v2040_v22, %v2040_v22 }
 0x235   :  { %v254_v62 = vadd.f32 %v253_v54, %v252_v44  ;;  %v159_v44 = vsel %vm128_vm0, %v93_v39, 0.0  ;;  %v95_v54 = vld [vmem:[#allocation2 + $0x78] sm:$0xff]  ;;  %v2042_v39 = vld [vmem:[%s4039_s6 + $0x20] sm:$0xff] }
 0x236   :  { %v163_v60 = vsel %vm128_vm0, %v95_v54, 0.0  ;;  %v2045_v54 = vld [vmem:[%s4039_s6 + $0x38] sm:$0xff] }
 0x237   :  { %v261_v31 = vmul.f32 0.015625, %v254_v62 }
 0x239   :  { %v1841_v5 = vsel %vm1840_vm4, %v261_v31, %v1839_v4 }
 0x2a0   :  { %v1507_v37 = vpop.f32.mrb[2].mxu0 }
 0x2a1   :  { %v1509_v41 = vpop.f32.mrb[3].mxu0  ;;  %v1516_v46 = vmax.f32 %v1507_v37, 0.0  ;;  %v157_v37 = vsel %vm128_vm0, %v92_v32, 0.0  ;;  %v2055_v32 = vsel %vm2054_vm6, %v2046_v28, 0.0 }
 0x2a2   :  { %v1517_v42 = vmax.f32 %v1509_v41, 0.0  ;;  %v137_v41 = vadd.f32 %v136_v35, %v135_v33  ;;  %v2056_v33 = vsel %vm2054_vm6, %v2047_v29, 0.0  ;;  %v2041_v35 = vld [vmem:[%s4039_s6 + $0x18] sm:$0xff] }
 0x2a4   :  { %1818 = vmatprep.mubr.f32.mxu1 %v1517_v42  ;;  %v138_v42 = vsel %vm128_vm0, %v85_v38, 0.0  ;;  %v2058_v38 = vsel %vm2054_vm6, %v2048_v30, 0.0 }
 0x2a5   :  { %1819 = vmatmul.mubr.f32.vlgmr.msra.gmra.mrb[6].mxu1 %v1516_v46  ;;  %v86_v46 = vld [vmem:[#allocation2 + $0x30] sm:$0xff]  ;;  %v139_v48 = vadd.f32 %v138_v42, %v137_v41  ;;  %v2050_v42 = vmul.f32 %v2042_v39, %v2042_v39 }
 0x2a6   :  { %3230 = vmatpush3.bf16.msra.mxu1 %v3229_v43  ;;  %2505 = vmatprep.mubr.msk.f32.mxu1 %vm3432_vm1, %v3431_v56  ;;  %v158_v43 = vadd.f32 %v157_v37, %v156_v36  ;;  %v140_v50 = vsel %vm128_vm0, %v86_v46, 0.0  ;;  %v2057_v36 = vadd.f32 %v2056_v33, %v2055_v32  ;;  %v2049_v37 = vmul.f32 %v2041_v35, %v2041_v35 }
 0x2a7   :  { %3231 = vmatprep.subr.bf16.mxu1 %v3430_v55  ;;  %v141_v57 = vadd.f32 %v140_v50, %v139_v48  ;;  %v2062_v48 = vsel %vm2054_vm6, %v2050_v42, 0.0  ;;  %v2044_v50 = vld [vmem:[%s4039_s6 + $0x30] sm:$0xff] }
 0x2a8   :  { %v160_v51 = vadd.f32 %v159_v44, %v158_v43  ;;  %v2059_v41 = vadd.f32 %v2058_v38, %v2057_v36  ;;  %v2060_v43 = vsel %vm2054_vm6, %v2049_v37, 0.0  ;;  %v2043_v44 = vld [vmem:[%s4039_s6 + $0x28] sm:$0xff]  ;;  %s3433_s6 = smov 22  }
 0x2a9   :  { %v2051_v47 = vmul.f32 %v2043_v44, %v2043_v44 }
 0x2aa   :  { %3233 = vmatpush3.bf16.msra.mxu1 %v3232_v53  ;;  %v87_v53 = vld [vmem:[#allocation2 + $0x38] sm:$0xff]  ;;  %v162_v59 = vadd.f32 %v161_v52, %v160_v51  ;;  %v2061_v46 = vadd.f32 %v2060_v43, %v2059_v41  ;;  %v2052_v52 = vmul.f32 %v2044_v50, %v2044_v50 }
 0x2ab   :  { %3234 = vmatprep.subr.bf16.mxu1 %v3430_v55  ;;  %v142_v58 = vsel %vm128_vm0, %v87_v53, 0.0  ;;  %v2064_v53 = vsel %vm2054_vm6, %v2051_v47, 0.0 }
 0x2ac   :  { %v143_v61 = vadd.f32 %v142_v58, %v141_v57  ;;  %v2063_v51 = vadd.f32 %v2062_v48, %v2061_v46  ;;  %v2053_v58 = vmul.f32 %v2045_v54, %v2045_v54 }
 0x2ae   :  { %3236 = vmatpush3.bf16.msra.mxu1 %v3235_v45  ;;  %v164_v45 = vadd.f32 %v163_v60, %v162_v59  ;;  %v144_v62 = vrot.slane %v143_v61, 4  ;;  %v2065_v57 = vadd.f32 %v2064_v53, %v2063_v51  ;;  %v2066_v59 = vsel %vm2054_vm6, %v2052_v52, 0.0 }
 0x2af   :  { %3237 = vmatprep.subr.bf16.mxu1 %v3430_v55 }
 0x2b0   :  { %v165_v63 = vrot.slane %v164_v45, 4  ;;  %v145_v0 = vadd.f32 %v144_v62, %v143_v61  ;;  %v2067_v60 = vadd.f32 %v2066_v59, %v2065_v57  ;;  %v2068_v61 = vsel %vm2054_vm6, %v2053_v58, 0.0 }
 0x2b2   :  { %3239 = vmatpush3.bf16.msra.mxu1 %v3238_v3  ;;  %v166_v1 = vadd.f32 %v165_v63, %v164_v45  ;;  %v146_v2 = vrot.slane %v145_v0, 2  ;;  %v2069_v45 = vadd.f32 %v2068_v61, %v2067_v60 }
 0x2b3   :  { %3240 = vmatprep.subr.bf16.mxu1 %v3430_v55 }
 0x2b4   :  { %v167_v3 = vrot.slane %v166_v1, 2  ;;  %v147_v31 = vadd.f32 %v146_v2, %v145_v0  ;;  %v2070_v62 = vrot.slane %v2069_v45, 4 }
 0x2b5   :  { %2506 = vmatmul.mubr.msk.f32.vlgmr.msra.gmra.mrb[8].mxu1 %vm128_vm0, %v1841_v5 }
 0x2b6   :  { %2524 = vmatprep.mubr.msk.f32.mxu1 %vm3432_vm1, %v3431_v56  ;;  %v168_v4 = vadd.f32 %v167_v3, %v166_v1  ;;  %v148_v5 = vrot.slane %v147_v31, 1  ;;  %v2071_v63 = vadd.f32 %v2070_v62, %v2069_v45 }
 0x2b8   :  { %v2385_v6 = vpop.f32.mrb[2].mxu1  ;;  %v2072_v0 = vrot.slane %v2071_v63, 2 }
 0x2b9   :  { %v2386_v7 = vpop.f32.mrb[3].mxu1 }
 0x2ba   :  { %v2387_v8 = vadd.f32 %v2386_v7, %v2385_v6  ;;  %v169_v6 = vrot.slane %v168_v4, 1  ;;  %v149_v7 = vadd.f32 %v148_v5, %v147_v31  ;;  %v2073_v1 = vadd.f32 %v2072_v0, %v2071_v63 }
 0x2bc   :  { %v2074_v2 = vrot.slane %v2073_v1, 1 }
 0x2be   :  { %v2075_v3 = vadd.f32 %v2074_v2, %v2073_v1 }
 0x2c0   :  { %v2076_v31 = vmax.f32 %v2075_v3, 1e-24 }
 0x2c2   :  { %3292 = vrsqrt.f32 %v2076_v31 }
 0x2d8   :  { %v2420_v40 = vpop.f32.mrb[4].mxu1 }
 0x2d9   :  { %v2421_v9 = vpop.f32.mrb[5].mxu1 }
 0x2da   :  { %v2422_v12 = vadd.f32 %v2421_v9, %v2420_v40  ;;  %v3931_v40 = vmul.f32 0.015625, %v149_v7 }
 0x2dc   :  { %v3917_v20 = vadd.f32 %v2422_v12, %v2387_v8  ;;  %v170_v8 = vadd.f32 %v169_v6, %v168_v4  ;;  %v1996_v34 = vmul.f32 %v3931_v40, %v3931_v40  ;;  %v1916_v12 = vld [vmem:[%s4038_s5 + $0x8] sm:$0xff] }
 0x2dd   :  { %v3241_v49 = vpack.c.bf16 %v1916_v12, %v1915_v11 }
 0x2de   :  { %v3933_v9 = vmul.f32 0.015625, %v170_v8 }
 0x2df   :  { %3242 = vmatpush3.bf16.msra.mxu1 %v3241_v49 }
 0x2e0   :  { %v1997_v10 = vmul.f32 %v3933_v9, %v3933_v9  ;;  %3243 = vmatprep.subr.bf16.mxu1 %v3430_v55 }
 0x2e2   :  { %v2000_v13 = vsel %vm1836_vm2, %v1997_v10, %v1996_v34  ;;  %v3293_v10 = vpop.eup %3292 }
 0x2e3   :  { %v2003_v14 = vsel %vm2002_vm5, %v2000_v13, 0.0  ;;  %3245 = vmatpush3.bf16.msra.mxu1 %v3244_v17  ;;  %v2078_v11 = vmul.f32 %v3293_v10, %v2038_v26  ;;  %v2079_v12 = vmul.f32 %v3293_v10, %v2039_v27  ;;  %v2081_v15 = vmul.f32 %v3293_v10, %v2041_v35 }
 0x2e4   :  { %2004 = vadd.xlane.f32.xlu0 %v2003_v14  ;;  %3246 = vmatprep.subr.bf16.mxu1 %v3430_v55  ;;  %v2080_v14 = vmul.f32 %v3293_v10, %v2040_v22  ;;  %v2083_v23 = vmul.f32 %v3293_v10, %v2043_v44  ;;  %v2085_v26 = vmul.f32 %v3293_v10, %v2045_v54 }
 0x2e5   :  { %v3253_v49 = vpack.c.bf16 %v2079_v12, %v2078_v11 }
 0x2e7   :  { %3248 = vmatpush3.bf16.msra.mxu1 %v3247_v21  ;;  %v2082_v21 = vmul.f32 %v3293_v10, %v2042_v39 }
 0x2e8   :  { %3249 = vmatprep.subr.bf16.mxu1 %v3430_v55 }
 0x2e9   :  { %v3259_v24 = vpack.c.bf16 %v2083_v23, %v2082_v21 }
 0x2eb   :  { %3251 = vmatpush3.bf16.msra.mxu1 %v3250_v25  ;;  %v2084_v25 = vmul.f32 %v3293_v10, %v2044_v50 }
 0x2ec   :  { %3252 = vmatprep.subr.bf16.mxu1 %v3430_v55 }
 0x2ed   :  { %v3262_v27 = vpack.c.bf16 %v2085_v26, %v2084_v25 }
 0x371   :  { %v2005_v18 = vpop.xlane.xlu0 %2004 }
 0x372   :  { %v2006_v19 = vmax.f32 %v2005_v18, 1e-24 }
 0x374   :  { %3294 = vrsqrt.f32 %v2006_v19 }
 0x378   :  { %v2455_v4 = vpop.f32.mrb[6].mxu1 }
 0x379   :  { %v2456_v5 = vpop.f32.mrb[7].mxu1 }
 0x37a   :  { %v2457_v6 = vadd.f32 %v2456_v5, %v2455_v4 }
 0x37c   :  { %v1821_v7 = vadd.f32 %v2457_v6, %v3917_v20  ;;  %v3256_v20 = vpack.c.bf16 %v2081_v15, %v2080_v14 }
 0x37e   :  { %v2031_v8 = vmul.f32 %v1821_v7, %v1821_v7  ;;  %v3295_v28 = vpop.eup %3294 }
 0x37f   :  { %v2008_v29 = vmul.f32 16.0, %v3295_v28 }
 0x380   :  { %v2032_v34 = vsel %vm2002_vm5, %v2031_v8, 0.0 }
 0x381   :  { %2033 = vadd.xlane.f32.xlu0 %v2032_v34  ;;  %v2010_v22 = vrot.slane %v2008_v29, 1  ;;  %v2013_v30 = vmul.f32 %v2008_v29, %v3931_v40 }
 0x383   :  { %v2014_v32 = vmul.f32 %v2010_v22, %v3933_v9 }
 0x385   :  { %v2088_v33 = vrot.slane %v2014_v32, 7 }
 0x387   :  { %v2089_v35 = vsel %vm1836_vm2, %v2088_v33, %v2013_v30 }
 0x388   :  { %v1910_v13 = vpop.f32.mrb[8].mxu1 }
 0x389   :  { %v1914_v16 = vmax.f32 %v1910_v13, 0.0  ;;  %v2507_v17 = vpop.f32.mrb[9].mxu1 }
 0x38b   :  { %2525 = vmatmul.mubr.msk.f32.vlgmr.msra.gmra.mrb[10].mxu1 %vm128_vm0, %v1914_v16 }
 0x38c   :  { %3254 = vmatpush3.bf16.msra.mxu1 %v3253_v49  ;;  %2543 = vmatprep.mubr.msk.f32.mxu1 %vm3432_vm1, %v3431_v56 }
 0x38d   :  { %3255 = vmatprep.subr.bf16.mxu1 %v3430_v55 }
 0x390   :  { %3257 = vmatpush3.bf16.msra.mxu1 %v3256_v20 }
 0x391   :  { %3258 = vmatprep.subr.bf16.mxu1 %v3430_v55 }
 0x394   :  { %3260 = vmatpush3.bf16.msra.mxu1 %v3259_v24 }
 0x395   :  { %3261 = vmatprep.subr.bf16.mxu1 %v3430_v55 }
 0x398   :  { %3263 = vmatpush3.bf16.msra.mxu1 %v3262_v27 }
 0x399   :  { %2546 = vmatprep.subr.mxu1 %v3431_v56 }
 0x39b   :  { %2544 = vmatmul.mubr.msk.f32.vlgmr.msra.gmra.mrb[12].mxu1 %vm128_vm0, %v2089_v35 }
 0x39c   :  { %2548 = vmatprep.mubr.msk.f32.mxu1 %vm3432_vm1, %v3431_v56 }
 0x40e   :  { %v2034_v36 = vpop.xlane.xlu0 %2033 }
 0x40f   :  { %v2035_v55 = vmax.f32 %v2034_v36, 1e-24 }
 0x411   :  { %3296 = vrsqrt.f32 %v2035_v55 }
 0x41b   :  { %v3297_v37 = vpop.eup %3296 }
 0x41c   :  { %v2037_v38 = vmul.f32 %v3297_v37, %v1821_v7 }
 0x41e   :  { %2547 = vmatpush3.xpose.msk.msra.mxu1 %vm128_vm0, %v2037_v38 }
 0x41f   :  { %2551 = vmatprep.subr.mxu1 %v3431_v56 }
 0x421   :  { %2549 = vmatmul.mubr.msk.f32.vlgmr.msra.gmra.mrb[14].mxu1 %vm128_vm0, %v2089_v35 }
 0x422   :  { %2553 = vmatprep.mubr.msk.f32.mxu1 %vm3432_vm1, %v3431_v56 }
 0x45e   :  { %v1992_v40 = vpop.f32.mrb[10].mxu1 }
 0x45f   :  { %v2526_v9 = vpop.f32.mrb[11].mxu1  ;;  %v2015_v39 = vmul.f32 %v1992_v40, %v1992_v40 }
 0x461   :  { %v2025_v41 = vsel %vm2024_vm7, %v2015_v39, 0.0  ;;  %v2017_v42 = vsel %vm2016_vm8, %v2015_v39, 0.0 }
 0x462   :  { %2026 = vadd.xlane.f32.xlu1 %v2025_v41 }
 0x466   :  { %2018 = vadd.xlane.f32.xlu1 %v2017_v42 }
 0x46e   :  { %v2158_v43 = vpop.f32.mrb[12].mxu1 }
 0x46f   :  { %2315 = vst.msk [vmem:[#allocation10] sm:$0x3] %vm2314_vm9, %v2158_v43  ;;  %v2545_v44 = vpop.f32.mrb[13].mxu1 }
 0x4ef   :  { %v2027_v46 = vpop.xlane.xlu1 %2026 }
 0x4f0   :  { %v2028_v47 = vmax.f32 %v2027_v46, 1e-24 }
 0x4f2   :  { %3298 = vrsqrt.f32 %v2028_v47 }
 0x4f3   :  { %v2019_v48 = vpop.xlane.xlu1 %2018 }
 0x4f4   :  { %v2020_v50 = vmax.f32 %v2019_v48, 1e-24  ;;  %v2231_v51 = vpop.f32.mrb[14].mxu1 }
 0x4f5   :  { %v2550_v56 = vpop.f32.mrb[15].mxu1  ;;  %2323 = vrot.lane.b32.xlu1 %v2231_v51, %s3433_s6 }
 0x4f6   :  { %3300 = vrsqrt.f32 %v2020_v50 }
 0x4fc   :  { %v3299_v52 = vpop.eup %3298 }
 0x4fd   :  { %v2030_v53 = vmul.f32 %v3299_v52, %v1992_v40 }
 0x4ff   :  { %v2236_v54 = vrot.slane %v2030_v53, 2 }
 0x500   :  { %v3301_v57 = vpop.eup %3300 }
 0x501   :  { %v2022_v58 = vmul.f32 14.285714, %v3301_v57  ;;  %2552 = vmatpush3.xpose.msk.msra.mxu1 %vm2237_vm10, %v2236_v54 }
 0x503   :  { %v2023_v59 = vmul.f32 %v2022_v58, %v1992_v40 }
 0x505   :  { %2554 = vmatmul.mubr.msk.f32.vlgmr.msra.gmra.mrb[16].mxu1 %vm2237_vm10, %v2023_v59 }
 0x567   :  { %v2324_v62 = vpop.permute.xlu1 %2323 }
 0x5d8   :  { %v2309_v60 = vpop.f32.mrb[16].mxu1 }
 0x5d9   :  { %2317 = vrot.lane.b32.xlu0 %v2309_v60, %s3434_s8  ;;  %v2555_v61 = vpop.f32.mrb[17].mxu1 }
 0x64b   :  { %v2318_v45 = vpop.permute.xlu0 %2317 }
 0x64c   :  { %2321 = vst.msk [vmem:[#allocation10] sm:$0x3] %vm2320_vm11, %v2318_v45 }
 0x64d   :  { %2327 = vst.msk [vmem:[#allocation10] sm:$0x3] %vm2326_vm12, %v2324_v62 }
 0x64e   :  { %3402 = shalt.err (!%p3399_p8)
}
 0x64f   :  { %s3403_s0 = scalar_lea.hbm %s4040_s7, 32 }
 0x650   :  { %p3404_p9 = scmp.ne.s32.totalorder %s4040_s7, %s3403_s0  ;;  %p3407_p10 = scmp.lt.u32.totalorder %s3403_s0, %s4040_s7 }
 0x652   :  { %p3409_p11 = pnand %p3407_p10, %p3404_p9 }
 0x654   :  { %3412 = shalt.err (!%p3409_p11)
}
 0x655   :  { %2337 = dma.vmem_to_hbm [thread:$0]  %s2335_s10, 32, %s4040_s7, [#allocation4]  }
 0x656   :  { %3419 = dma.done.wait [#allocation4], 32  }
 0x657   :  { %3420 = vsyncadd [#allocation4], 4294967264 }
 0x658   :  { %2341 = vsyncpa [#allocation3], 1 }
 0x659   :  { %2342 = vsyncpa [#allocation6], 1 }
 0x65a   :  { %2343 = vsyncpa [#allocation9], 1 }
 0x65b   :  { %2344 = vsyncpa [#allocation4], 1 }

</bundles_post_ra>
